<compile_context>
chip_gen: v7x
topology: tpu7x:2x2x1
jax: 0.10.0
libtpu: 0.0.40
codegen_flags: <defaults>
</compile_context>

<pallas_src>
import functools

import jax
import jax.numpy as jnp
from jax import lax
from jax.experimental import pallas as pl
from jax.experimental.pallas import tpu as pltpu


# --------------------------------------------------------------------------
# Helpers
# --------------------------------------------------------------------------

def _round_up(x, m):
    return ((x + m - 1) // m) * m


def _num_tensorcores():
    """Best-effort TensorCore count per device (v7x: 2, v5e/v6e: 1)."""
    try:
        dev = jax.devices()[0]
        for attr in ("num_cores", "core_count"):
            n = getattr(dev, attr, None)
            if isinstance(n, int) and 0 < n <= 8:
                return n
    except Exception:
        pass
    return 1


# --------------------------------------------------------------------------
# Pallas kernel
# --------------------------------------------------------------------------

def _lstm_kernel(*refs, num_layers, hidden, seq_len):
    """Stacked LSTM over one batch block, batch-first layout.

    refs layout:
      x_ref                                  (bb, T, Din)        input block
      [wih_l (Din_l,4H), whh_l (H,4H), b_l (1,4H)]  x num_layers (MXU dtype / f32)
      seq_ref                                (bb, T, H)   out: last-layer h_t
      h_ref                                  (bb, H)      out: last-layer final h
      buf_ref                                (bb, T, H)   scratch: inter-layer seq
      xw_ref                                 (bb, T, 4H)  scratch: hoisted x-proj

    Gate column order is (i, f, o, g): sigmoid gates contiguous, tanh gate last
    (wrapper permutes the PyTorch (i, f, g, o) columns).
    """
    x_ref = refs[0]
    w_refs = refs[1:1 + 3 * num_layers]
    seq_ref, h_ref, buf_ref, xw_ref = refs[1 + 3 * num_layers:]

    bb = x_ref.shape[0]
    T = seq_len
    H = hidden
    H3 = 3 * H

    def run_layer(src_ref, wih_ref, whh_ref, b_ref, out_ref):
        wih = wih_ref[...]          # (Din_l, 4H)  MXU dtype (bf16 or f32)
        whh = whh_ref[...]          # (H, 4H)      MXU dtype
        b = b_ref[...]              # (1, 4H)      f32

        # ---- hoisted input projection: T independent (bb,Din)@(Din,4H) dots,
        # entirely off the recurrent dependency chain.
        for t in range(T):          # T static -> plain static slices
            x_t = src_ref[:, t, :].astype(wih.dtype)
            xw_ref[:, t, :] = (
                jnp.dot(x_t, wih, preferred_element_type=jnp.float32) + b)

        # ---- serial recurrence: one (bb,H)@(H,4H) matmul + gate math / step.
        # Fully unrolled (small static T) so the scheduler overlaps EUP/VPU
        # gate work with the next step's MXU push.
        h = jnp.zeros((bb, H), jnp.float32)
        c = jnp.zeros((bb, H), jnp.float32)
        for t in range(T):
            pre = xw_ref[:, t, :] + jnp.dot(
                h.astype(whh.dtype), whh, preferred_element_type=jnp.float32)
            sg = jax.nn.sigmoid(pre[:, :H3])      # one EUP push: i, f, o
            g = jnp.tanh(pre[:, H3:])             # one EUP push: g
            i_g = sg[:, 0 * H:1 * H]
            f_g = sg[:, 1 * H:2 * H]
            o_g = sg[:, 2 * H:H3]
            c = f_g * c + i_g * g
            h = o_g * jnp.tanh(c)
            out_ref[:, t, :] = h
        return h

    h_final = None
    for l in range(num_layers):                   # static python loop over layers
        wih_ref, whh_ref, b_ref = w_refs[3 * l:3 * l + 3]
        src_ref = x_ref if l == 0 else buf_ref
        out_ref = seq_ref if l == num_layers - 1 else buf_ref
        h_final = run_layer(src_ref, wih_ref, whh_ref, b_ref, out_ref)

    h_ref[...] = h_final


# --------------------------------------------------------------------------
# Wrapper
# --------------------------------------------------------------------------

def conv_lstm(x, layer_params, *, mxu_dtype=jnp.bfloat16, num_cores=None,
              max_batch_block=256):
    """ConvLSTM.forward.

    x: (B, T, input_size), batch-first (same as the PyTorch module).
    layer_params: list (length = lstm_layers) of dicts
        {'wih': (Din_l, 4H), 'whh': (H, 4H), 'b': (1, 4H)} in PyTorch gate
        order (i, f, g, o); W stored as (in_features, 4H), b = b_ih + b_hh.
    Returns (outputs (B, T, H), h_last (B, H)) == (x, h[-1]) of the reference.
    """
    B, T, Din = x.shape
    num_layers = len(layer_params)
    H = layer_params[0]['whh'].shape[0]
    H4 = 4 * H

    if num_cores is None:
        num_cores = _num_tensorcores()

    # ---- batch block: fold as many rows as possible into the matmul M dim.
    # One parallel block per TensorCore when the batch is large enough (v7x),
    # otherwise a single block (extra grid steps only replay the serial loop).
    if num_cores > 1 and B > 8:
        bb = _round_up(pl.cdiv(B, num_cores), 8)
    else:
        bb = B
    bb = min(bb, max_batch_block)
    if bb < B:
        bb = _round_up(bb, 8)
    Bp = _round_up(B, bb)
    if Bp != B:
        # Zero-pad the batch so padded rows compute on well-defined zeros.
        x = jnp.pad(x, ((0, Bp - B), (0, 0), (0, 0)))
    grid = (Bp // bb,)

    def prep_w(w):
        # Permute gate columns (i, f, g, o) -> (i, f, o, g).
        return jnp.concatenate(
            [w[:, :2 * H], w[:, 3 * H:], w[:, 2 * H:3 * H]], axis=1)

    in_specs = [pl.BlockSpec((bb, T, Din), lambda i: (i, 0, 0))]
    flat_w = []
    for p in layer_params:
        din_l = p['wih'].shape[0]
        flat_w += [prep_w(p['wih']).astype(mxu_dtype),
                   prep_w(p['whh']).astype(mxu_dtype),
                   prep_w(p['b']).astype(jnp.float32)]
        in_specs += [
            pl.BlockSpec((din_l, H4), lambda i: (0, 0)),
            pl.BlockSpec((H, H4), lambda i: (0, 0)),
            pl.BlockSpec((1, H4), lambda i: (0, 0)),
        ]

    # ---- explicit VMEM budget (weights + scratch + double-buffered blocks).
    wbytes = sum(int(w.size) * w.dtype.itemsize for w in flat_w)
    scratch_bytes = bb * T * H4 * 4 + bb * T * H * 4
    io_bytes = bb * T * Din * 4 + bb * T * H * 4 + bb * H * 4
    need = 2 * (wbytes + io_bytes) + scratch_bytes
    vmem_limit = int(min(64 * 2 ** 20, max(32 * 2 ** 20, 2 * need)))

    seq, h_last = pl.pallas_call(
        functools.partial(_lstm_kernel, num_layers=num_layers, hidden=H,
                          seq_len=T),
        grid=grid,
        in_specs=in_specs,
        out_specs=(
            pl.BlockSpec((bb, T, H), lambda i: (i, 0, 0)),
            pl.BlockSpec((bb, H), lambda i: (i, 0)),
        ),
        out_shape=(
            jax.ShapeDtypeStruct((Bp, T, H), jnp.float32),
            jax.ShapeDtypeStruct((Bp, H), jnp.float32),
        ),
        scratch_shapes=[
            pltpu.VMEM((bb, T, H), jnp.float32),    # inter-layer sequence
            pltpu.VMEM((bb, T, H4), jnp.float32),   # hoisted input projection
        ],
        compiler_params=pltpu.CompilerParams(
            dimension_semantics=("parallel",),
            vmem_limit_bytes=vmem_limit,
        ),
    )(x, *flat_w)

    if Bp != B:
        seq = seq[:B]
        h_last = h_last[:B]
    return seq, h_last


# --------------------------------------------------------------------------
# Parameters + pure-JAX reference
# --------------------------------------------------------------------------

def init_lstm_params(key, input_size, hidden_size, num_layers, scale=0.1):
    params = []
    for l in range(num_layers):
        din = input_size if l == 0 else hidden_size
        key, k1, k2, k3 = jax.random.split(key, 4)
        params.append({
            'wih': jax.random.normal(k1, (din, 4 * hidden_size), jnp.float32) * scale,
            'whh': jax.random.normal(k2, (hidden_size, 4 * hidden_size), jnp.float32) * scale,
            'b': jax.random.normal(k3, (1, 4 * hidden_size), jnp.float32) * scale,
        })
    return params


def conv_lstm_ref(x, layer_params):
    """Pure-JAX reference (PyTorch gate order, high-precision f32 matmuls)."""
    B, T, _ = x.shape
    h_seq = x
    h_last = None
    for p in layer_params:
        wih, whh, b = p['wih'], p['whh'], p['b']
        H = whh.shape[0]
        h = jnp.zeros((B, H), jnp.float32)
        c = jnp.zeros((B, H), jnp.float32)
        outs = []
        for t in range(T):
            pre = (jnp.dot(h_seq[:, t, :], wih, precision=lax.Precision.HIGHEST)
                   + jnp.dot(h, whh, precision=lax.Precision.HIGHEST) + b)
            i = jax.nn.sigmoid(pre[:, 0 * H:1 * H])
            f = jax.nn.sigmoid(pre[:, 1 * H:2 * H])
            g = jnp.tanh(pre[:, 2 * H:3 * H])
            o = jax.nn.sigmoid(pre[:, 3 * H:4 * H])
            c = f * c + i * g
            h = o * jnp.tanh(c)
            outs.append(h)
        h_seq = jnp.stack(outs, axis=1)
        h_last = h
    return h_seq, h_last


# --------------------------------------------------------------------------
# Main
# --------------------------------------------------------------------------

if __name__ == "__main__":
    B, T, input_size, hidden_size, lstm_layers = 2, 8, 4, 32, 2

    key = jax.random.PRNGKey(0)
    kp, kx = jax.random.split(key)
    params = init_lstm_params(kp, input_size, hidden_size, lstm_layers)
    x = jax.random.normal(kx, (B, T, input_size), jnp.float32)

    ref_seq, ref_h = conv_lstm_ref(x, params)

    # Default (fast) config: bf16 MXU inputs, f32 accumulation / state.
    fwd = jax.jit(functools.partial(conv_lstm, mxu_dtype=jnp.bfloat16))
    seq_out, h_last = jax.block_until_ready(fwd(x, params))

    assert seq_out.shape == (B, T, hidden_size), seq_out.shape
    assert h_last.shape == (B, hidden_size), h_last.shape
    assert bool(jnp.all(jnp.isfinite(seq_out))) and bool(jnp.all(jnp.isfinite(h_last)))
    assert bool(jnp.allclose(seq_out, ref_seq, atol=2e-2, rtol=2e-2))
    assert bool(jnp.allclose(h_last, ref_h, atol=2e-2, rtol=2e-2))

    # Full-f32 MXU path: tighter numerical check against the reference.
    fwd32 = jax.jit(functools.partial(conv_lstm, mxu_dtype=jnp.float32))
    seq32, h32 = jax.block_until_ready(fwd32(x, params))
    assert bool(jnp.allclose(seq32, ref_seq, atol=1e-3, rtol=1e-3))
    assert bool(jnp.allclose(h32, ref_h, atol=1e-3, rtol=1e-3))

    print("KERNEL_OK")
</pallas_src>

<mosaic_0001>
module attributes {stable_mosaic.version = 11 : i64} {
  func.func @_lstm_kernel(%arg0: i32, %arg1: memref<2x8x4xf32, #tpu.memory_space<vmem>>, %arg2: memref<4x128xbf16, #tpu.memory_space<vmem>>, %arg3: memref<32x128xbf16, #tpu.memory_space<vmem>>, %arg4: memref<1x128xf32, #tpu.memory_space<vmem>>, %arg5: memref<32x128xbf16, #tpu.memory_space<vmem>>, %arg6: memref<32x128xbf16, #tpu.memory_space<vmem>>, %arg7: memref<1x128xf32, #tpu.memory_space<vmem>>, %arg8: memref<2x8x32xf32, #tpu.memory_space<vmem>>, %arg9: memref<2x32xf32, #tpu.memory_space<vmem>>, %arg10: memref<2x8x32xf32, #tpu.memory_space<vmem>>, %arg11: memref<2x8x128xf32, #tpu.memory_space<vmem>>) attributes {dimension_semantics = [#tpu.dimension_semantics<parallel>], iteration_bounds = array<i64: 1>, scalar_prefetch = 0 : i64, scratch_operands = 2 : i64, tpu.core_type = #tpu.core_type<tc>, window_params = [{transform_indices = @transform_0, window_bounds = array<i64: 2, 8, 4>}, {pipeline_mode = #tpu.pipeline_mode<synchronous>, transform_indices = @transform_1, window_bounds = array<i64: 4, 128>}, {pipeline_mode = #tpu.pipeline_mode<synchronous>, transform_indices = @transform_2, window_bounds = array<i64: 32, 128>}, {pipeline_mode = #tpu.pipeline_mode<synchronous>, transform_indices = @transform_3, window_bounds = array<i64: 1, 128>}, {pipeline_mode = #tpu.pipeline_mode<synchronous>, transform_indices = @transform_4, window_bounds = array<i64: 32, 128>}, {pipeline_mode = #tpu.pipeline_mode<synchronous>, transform_indices = @transform_5, window_bounds = array<i64: 32, 128>}, {pipeline_mode = #tpu.pipeline_mode<synchronous>, transform_indices = @transform_6, window_bounds = array<i64: 1, 128>}, {transform_indices = @transform_7, window_bounds = array<i64: 2, 8, 32>}, {transform_indices = @transform_8, window_bounds = array<i64: 2, 32>}]} {
    %c0 = arith.constant 0 : index
    %c0_0 = arith.constant 0 : index
    %0 = vector.load %arg2[%c0, %c0_0] : memref<4x128xbf16, #tpu.memory_space<vmem>>, vector<4x128xbf16>
    %c0_1 = arith.constant 0 : index
    %c0_2 = arith.constant 0 : index
    %1 = vector.load %arg3[%c0_1, %c0_2] : memref<32x128xbf16, #tpu.memory_space<vmem>>, vector<32x128xbf16>
    %c0_3 = arith.constant 0 : index
    %c0_4 = arith.constant 0 : index
    %2 = vector.load %arg4[%c0_3, %c0_4] : memref<1x128xf32, #tpu.memory_space<vmem>>, vector<1x128xf32>
    %c0_5 = arith.constant 0 : index
    %c0_6 = arith.constant 0 : index
    %c0_7 = arith.constant 0 : index
    %3 = vector.load %arg1[%c0_5, %c0_6, %c0_7] : memref<2x8x4xf32, #tpu.memory_space<vmem>>, vector<2x1x4xf32>
    %4 = vector.shape_cast %3 : vector<2x1x4xf32> to vector<2x4xf32>
    %5 = arith.truncf %4 : vector<2x4xf32> to vector<2x4xbf16>
    %cst = arith.constant dense<0.000000e+00> : vector<2x128xf32>
    %6 = tpu.matmul %5, %0, %cst {dimension_numbers = #tpu.dot_dimension_numbers<[1], [0], [0], [1], [0, 0, 1, 1], [], []>} : vector<2x4xbf16>, vector<4x128xbf16>, vector<2x128xf32> -> vector<2x128xf32>
    %7 = vector.broadcast %2 : vector<1x128xf32> to vector<2x128xf32>
    %8 = arith.addf %6, %7 : vector<2x128xf32>
    %c0_8 = arith.constant 0 : index
    %c0_9 = arith.constant 0 : index
    %c0_10 = arith.constant 0 : index
    %9 = vector.load %arg11[%c0_8, %c0_9, %c0_10] : memref<2x8x128xf32, #tpu.memory_space<vmem>>, vector<2x1x128xf32>
    %10 = vector.shape_cast %9 : vector<2x1x128xf32> to vector<2x128xf32>
    %11 = vector.shape_cast %8 : vector<2x128xf32> to vector<2x1x128xf32>
    tpu.vector_store %arg11[%c0_8, %c0_9, %c0_10], %11 {strides = array<i32>} : memref<2x8x128xf32, #tpu.memory_space<vmem>>, vector<2x1x128xf32>,
    %c0_11 = arith.constant 0 : index
    %c1 = arith.constant 1 : index
    %c0_12 = arith.constant 0 : index
    %12 = vector.load %arg1[%c0_11, %c1, %c0_12] : memref<2x8x4xf32, #tpu.memory_space<vmem>>, vector<2x1x4xf32>
    %13 = vector.shape_cast %12 : vector<2x1x4xf32> to vector<2x4xf32>
    %14 = arith.truncf %13 : vector<2x4xf32> to vector<2x4xbf16>
    %cst_13 = arith.constant dense<0.000000e+00> : vector<2x128xf32>
    %15 = tpu.matmul %14, %0, %cst_13 {dimension_numbers = #tpu.dot_dimension_numbers<[1], [0], [0], [1], [0, 0, 1, 1], [], []>} : vector<2x4xbf16>, vector<4x128xbf16>, vector<2x128xf32> -> vector<2x128xf32>
    %16 = vector.broadcast %2 : vector<1x128xf32> to vector<2x128xf32>
    %17 = arith.addf %15, %16 : vector<2x128xf32>
    %c0_14 = arith.constant 0 : index
    %c1_15 = arith.constant 1 : index
    %c0_16 = arith.constant 0 : index
    %18 = vector.load %arg11[%c0_14, %c1_15, %c0_16] : memref<2x8x128xf32, #tpu.memory_space<vmem>>, vector<2x1x128xf32>
    %19 = vector.shape_cast %18 : vector<2x1x128xf32> to vector<2x128xf32>
    %20 = vector.shape_cast %17 : vector<2x128xf32> to vector<2x1x128xf32>
    tpu.vector_store %arg11[%c0_14, %c1_15, %c0_16], %20 {strides = array<i32>} : memref<2x8x128xf32, #tpu.memory_space<vmem>>, vector<2x1x128xf32>,
    %c0_17 = arith.constant 0 : index
    %c2 = arith.constant 2 : index
    %c0_18 = arith.constant 0 : index
    %21 = vector.load %arg1[%c0_17, %c2, %c0_18] : memref<2x8x4xf32, #tpu.memory_space<vmem>>, vector<2x1x4xf32>
    %22 = vector.shape_cast %21 : vector<2x1x4xf32> to vector<2x4xf32>
    %23 = arith.truncf %22 : vector<2x4xf32> to vector<2x4xbf16>
    %cst_19 = arith.constant dense<0.000000e+00> : vector<2x128xf32>
    %24 = tpu.matmul %23, %0, %cst_19 {dimension_numbers = #tpu.dot_dimension_numbers<[1], [0], [0], [1], [0, 0, 1, 1], [], []>} : vector<2x4xbf16>, vector<4x128xbf16>, vector<2x128xf32> -> vector<2x128xf32>
    %25 = vector.broadcast %2 : vector<1x128xf32> to vector<2x128xf32>
    %26 = arith.addf %24, %25 : vector<2x128xf32>
    %c0_20 = arith.constant 0 : index
    %c2_21 = arith.constant 2 : index
    %c0_22 = arith.constant 0 : index
    %27 = vector.load %arg11[%c0_20, %c2_21, %c0_22] : memref<2x8x128xf32, #tpu.memory_space<vmem>>, vector<2x1x128xf32>
    %28 = vector.shape_cast %27 : vector<2x1x128xf32> to vector<2x128xf32>
    %29 = vector.shape_cast %26 : vector<2x128xf32> to vector<2x1x128xf32>
    tpu.vector_store %arg11[%c0_20, %c2_21, %c0_22], %29 {strides = array<i32>} : memref<2x8x128xf32, #tpu.memory_space<vmem>>, vector<2x1x128xf32>,
    %c0_23 = arith.constant 0 : index
    %c3 = arith.constant 3 : index
    %c0_24 = arith.constant 0 : index
    %30 = vector.load %arg1[%c0_23, %c3, %c0_24] : memref<2x8x4xf32, #tpu.memory_space<vmem>>, vector<2x1x4xf32>
    %31 = vector.shape_cast %30 : vector<2x1x4xf32> to vector<2x4xf32>
    %32 = arith.truncf %31 : vector<2x4xf32> to vector<2x4xbf16>
    %cst_25 = arith.constant dense<0.000000e+00> : vector<2x128xf32>
    %33 = tpu.matmul %32, %0, %cst_25 {dimension_numbers = #tpu.dot_dimension_numbers<[1], [0], [0], [1], [0, 0, 1, 1], [], []>} : vector<2x4xbf16>, vector<4x128xbf16>, vector<2x128xf32> -> vector<2x128xf32>
    %34 = vector.broadcast %2 : vector<1x128xf32> to vector<2x128xf32>
    %35 = arith.addf %33, %34 : vector<2x128xf32>
    %c0_26 = arith.constant 0 : index
    %c3_27 = arith.constant 3 : index
    %c0_28 = arith.constant 0 : index
    %36 = vector.load %arg11[%c0_26, %c3_27, %c0_28] : memref<2x8x128xf32, #tpu.memory_space<vmem>>, vector<2x1x128xf32>
    %37 = vector.shape_cast %36 : vector<2x1x128xf32> to vector<2x128xf32>
    %38 = vector.shape_cast %35 : vector<2x128xf32> to vector<2x1x128xf32>
    tpu.vector_store %arg11[%c0_26, %c3_27, %c0_28], %38 {strides = array<i32>} : memref<2x8x128xf32, #tpu.memory_space<vmem>>, vector<2x1x128xf32>,
    %c0_29 = arith.constant 0 : index
    %c4 = arith.constant 4 : index
    %c0_30 = arith.constant 0 : index
    %39 = vector.load %arg1[%c0_29, %c4, %c0_30] : memref<2x8x4xf32, #tpu.memory_space<vmem>>, vector<2x1x4xf32>
    %40 = vector.shape_cast %39 : vector<2x1x4xf32> to vector<2x4xf32>
    %41 = arith.truncf %40 : vector<2x4xf32> to vector<2x4xbf16>
    %cst_31 = arith.constant dense<0.000000e+00> : vector<2x128xf32>
    %42 = tpu.matmul %41, %0, %cst_31 {dimension_numbers = #tpu.dot_dimension_numbers<[1], [0], [0], [1], [0, 0, 1, 1], [], []>} : vector<2x4xbf16>, vector<4x128xbf16>, vector<2x128xf32> -> vector<2x128xf32>
    %43 = vector.broadcast %2 : vector<1x128xf32> to vector<2x128xf32>
    %44 = arith.addf %42, %43 : vector<2x128xf32>
    %c0_32 = arith.constant 0 : index
    %c4_33 = arith.constant 4 : index
    %c0_34 = arith.constant 0 : index
    %45 = vector.load %arg11[%c0_32, %c4_33, %c0_34] : memref<2x8x128xf32, #tpu.memory_space<vmem>>, vector<2x1x128xf32>
    %46 = vector.shape_cast %45 : vector<2x1x128xf32> to vector<2x128xf32>
    %47 = vector.shape_cast %44 : vector<2x128xf32> to vector<2x1x128xf32>
    tpu.vector_store %arg11[%c0_32, %c4_33, %c0_34], %47 {strides = array<i32>} : memref<2x8x128xf32, #tpu.memory_space<vmem>>, vector<2x1x128xf32>,
    %c0_35 = arith.constant 0 : index
    %c5 = arith.constant 5 : index
    %c0_36 = arith.constant 0 : index
    %48 = vector.load %arg1[%c0_35, %c5, %c0_36] : memref<2x8x4xf32, #tpu.memory_space<vmem>>, vector<2x1x4xf32>
    %49 = vector.shape_cast %48 : vector<2x1x4xf32> to vector<2x4xf32>
    %50 = arith.truncf %49 : vector<2x4xf32> to vector<2x4xbf16>
    %cst_37 = arith.constant dense<0.000000e+00> : vector<2x128xf32>
    %51 = tpu.matmul %50, %0, %cst_37 {dimension_numbers = #tpu.dot_dimension_numbers<[1], [0], [0], [1], [0, 0, 1, 1], [], []>} : vector<2x4xbf16>, vector<4x128xbf16>, vector<2x128xf32> -> vector<2x128xf32>
    %52 = vector.broadcast %2 : vector<1x128xf32> to vector<2x128xf32>
    %53 = arith.addf %51, %52 : vector<2x128xf32>
    %c0_38 = arith.constant 0 : index
    %c5_39 = arith.constant 5 : index
    %c0_40 = arith.constant 0 : index
    %54 = vector.load %arg11[%c0_38, %c5_39, %c0_40] : memref<2x8x128xf32, #tpu.memory_space<vmem>>, vector<2x1x128xf32>
    %55 = vector.shape_cast %54 : vector<2x1x128xf32> to vector<2x128xf32>
    %56 = vector.shape_cast %53 : vector<2x128xf32> to vector<2x1x128xf32>
    tpu.vector_store %arg11[%c0_38, %c5_39, %c0_40], %56 {strides = array<i32>} : memref<2x8x128xf32, #tpu.memory_space<vmem>>, vector<2x1x128xf32>,
    %c0_41 = arith.constant 0 : index
    %c6 = arith.constant 6 : index
    %c0_42 = arith.constant 0 : index
    %57 = vector.load %arg1[%c0_41, %c6, %c0_42] : memref<2x8x4xf32, #tpu.memory_space<vmem>>, vector<2x1x4xf32>
    %58 = vector.shape_cast %57 : vector<2x1x4xf32> to vector<2x4xf32>
    %59 = arith.truncf %58 : vector<2x4xf32> to vector<2x4xbf16>
    %cst_43 = arith.constant dense<0.000000e+00> : vector<2x128xf32>
    %60 = tpu.matmul %59, %0, %cst_43 {dimension_numbers = #tpu.dot_dimension_numbers<[1], [0], [0], [1], [0, 0, 1, 1], [], []>} : vector<2x4xbf16>, vector<4x128xbf16>, vector<2x128xf32> -> vector<2x128xf32>
    %61 = vector.broadcast %2 : vector<1x128xf32> to vector<2x128xf32>
    %62 = arith.addf %60, %61 : vector<2x128xf32>
    %c0_44 = arith.constant 0 : index
    %c6_45 = arith.constant 6 : index
    %c0_46 = arith.constant 0 : index
    %63 = vector.load %arg11[%c0_44, %c6_45, %c0_46] : memref<2x8x128xf32, #tpu.memory_space<vmem>>, vector<2x1x128xf32>
    %64 = vector.shape_cast %63 : vector<2x1x128xf32> to vector<2x128xf32>
    %65 = vector.shape_cast %62 : vector<2x128xf32> to vector<2x1x128xf32>
    tpu.vector_store %arg11[%c0_44, %c6_45, %c0_46], %65 {strides = array<i32>} : memref<2x8x128xf32, #tpu.memory_space<vmem>>, vector<2x1x128xf32>,
    %c0_47 = arith.constant 0 : index
    %c7 = arith.constant 7 : index
    %c0_48 = arith.constant 0 : index
    %66 = vector.load %arg1[%c0_47, %c7, %c0_48] : memref<2x8x4xf32, #tpu.memory_space<vmem>>, vector<2x1x4xf32>
    %67 = vector.shape_cast %66 : vector<2x1x4xf32> to vector<2x4xf32>
    %68 = arith.truncf %67 : vector<2x4xf32> to vector<2x4xbf16>
    %cst_49 = arith.constant dense<0.000000e+00> : vector<2x128xf32>
    %69 = tpu.matmul %68, %0, %cst_49 {dimension_numbers = #tpu.dot_dimension_numbers<[1], [0], [0], [1], [0, 0, 1, 1], [], []>} : vector<2x4xbf16>, vector<4x128xbf16>, vector<2x128xf32> -> vector<2x128xf32>
    %70 = vector.broadcast %2 : vector<1x128xf32> to vector<2x128xf32>
    %71 = arith.addf %69, %70 : vector<2x128xf32>
    %c0_50 = arith.constant 0 : index
    %c7_51 = arith.constant 7 : index
    %c0_52 = arith.constant 0 : index
    %72 = vector.load %arg11[%c0_50, %c7_51, %c0_52] : memref<2x8x128xf32, #tpu.memory_space<vmem>>, vector<2x1x128xf32>
    %73 = vector.shape_cast %72 : vector<2x1x128xf32> to vector<2x128xf32>
    %74 = vector.shape_cast %71 : vector<2x128xf32> to vector<2x1x128xf32>
    tpu.vector_store %arg11[%c0_50, %c7_51, %c0_52], %74 {strides = array<i32>} : memref<2x8x128xf32, #tpu.memory_space<vmem>>, vector<2x1x128xf32>,
    %cst_53 = arith.constant 0.000000e+00 : f32
    %75 = vector.broadcast %cst_53 : f32 to vector<2x32xf32>
    %cst_54 = arith.constant 0.000000e+00 : f32
    %76 = vector.broadcast %cst_54 : f32 to vector<2x32xf32>
    %c0_55 = arith.constant 0 : index
    %c0_56 = arith.constant 0 : index
    %c0_57 = arith.constant 0 : index
    %77 = vector.load %arg11[%c0_55, %c0_56, %c0_57] : memref<2x8x128xf32, #tpu.memory_space<vmem>>, vector<2x1x128xf32>
    %78 = vector.shape_cast %77 : vector<2x1x128xf32> to vector<2x128xf32>
    %79 = arith.truncf %75 : vector<2x32xf32> to vector<2x32xbf16>
    %cst_58 = arith.constant dense<0.000000e+00> : vector<2x128xf32>
    %80 = tpu.matmul %79, %1, %cst_58 {dimension_numbers = #tpu.dot_dimension_numbers<[1], [0], [0], [1], [0, 0, 1, 1], [], []>} : vector<2x32xbf16>, vector<32x128xbf16>, vector<2x128xf32> -> vector<2x128xf32>
    %81 = arith.addf %78, %80 : vector<2x128xf32>
    %82 = vector.extract_strided_slice %81 {offsets = [0, 0], sizes = [2, 96], strides = [1, 1]} : vector<2x128xf32> to vector<2x96xf32>
    %83 = arith.negf %82 : vector<2x96xf32>
    %84 = math.exp %83 : vector<2x96xf32>
    %cst_59 = arith.constant 1.000000e+00 : f32
    %85 = vector.broadcast %cst_59 : f32 to vector<2x96xf32>
    %86 = arith.addf %85, %84 : vector<2x96xf32>
    %87 = arith.divf %85, %86 : vector<2x96xf32>
    %88 = vector.extract_strided_slice %81 {offsets = [0, 96], sizes = [2, 32], strides = [1, 1]} : vector<2x128xf32> to vector<2x32xf32>
    %89 = math.tanh %88 : vector<2x32xf32>
    %90 = vector.extract_strided_slice %87 {offsets = [0, 0], sizes = [2, 32], strides = [1, 1]} : vector<2x96xf32> to vector<2x32xf32>
    %91 = vector.extract_strided_slice %87 {offsets = [0, 32], sizes = [2, 32], strides = [1, 1]} : vector<2x96xf32> to vector<2x32xf32>
    %92 = vector.extract_strided_slice %87 {offsets = [0, 64], sizes = [2, 32], strides = [1, 1]} : vector<2x96xf32> to vector<2x32xf32>
    %93 = arith.mulf %91, %76 : vector<2x32xf32>
    %94 = arith.mulf %90, %89 : vector<2x32xf32>
    %95 = arith.addf %93, %94 : vector<2x32xf32>
    %96 = math.tanh %95 : vector<2x32xf32>
    %97 = arith.mulf %92, %96 : vector<2x32xf32>
    %c0_60 = arith.constant 0 : index
    %c0_61 = arith.constant 0 : index
    %c0_62 = arith.constant 0 : index
    %98 = vector.load %arg10[%c0_60, %c0_61, %c0_62] : memref<2x8x32xf32, #tpu.memory_space<vmem>>, vector<2x1x32xf32>
    %99 = vector.shape_cast %98 : vector<2x1x32xf32> to vector<2x32xf32>
    %100 = vector.shape_cast %97 : vector<2x32xf32> to vector<2x1x32xf32>
    tpu.vector_store %arg10[%c0_60, %c0_61, %c0_62], %100 {strides = array<i32>} : memref<2x8x32xf32, #tpu.memory_space<vmem>>, vector<2x1x32xf32>,
    %c0_63 = arith.constant 0 : index
    %c1_64 = arith.constant 1 : index
    %c0_65 = arith.constant 0 : index
    %101 = vector.load %arg11[%c0_63, %c1_64, %c0_65] : memref<2x8x128xf32, #tpu.memory_space<vmem>>, vector<2x1x128xf32>
    %102 = vector.shape_cast %101 : vector<2x1x128xf32> to vector<2x128xf32>
    %103 = arith.truncf %97 : vector<2x32xf32> to vector<2x32xbf16>
    %cst_66 = arith.constant dense<0.000000e+00> : vector<2x128xf32>
    %104 = tpu.matmul %103, %1, %cst_66 {dimension_numbers = #tpu.dot_dimension_numbers<[1], [0], [0], [1], [0, 0, 1, 1], [], []>} : vector<2x32xbf16>, vector<32x128xbf16>, vector<2x128xf32> -> vector<2x128xf32>
    %105 = arith.addf %102, %104 : vector<2x128xf32>
    %106 = vector.extract_strided_slice %105 {offsets = [0, 0], sizes = [2, 96], strides = [1, 1]} : vector<2x128xf32> to vector<2x96xf32>
    %107 = arith.negf %106 : vector<2x96xf32>
    %108 = math.exp %107 : vector<2x96xf32>
    %cst_67 = arith.constant 1.000000e+00 : f32
    %109 = vector.broadcast %cst_67 : f32 to vector<2x96xf32>
    %110 = arith.addf %109, %108 : vector<2x96xf32>
    %111 = arith.divf %109, %110 : vector<2x96xf32>
    %112 = vector.extract_strided_slice %105 {offsets = [0, 96], sizes = [2, 32], strides = [1, 1]} : vector<2x128xf32> to vector<2x32xf32>
    %113 = math.tanh %112 : vector<2x32xf32>
    %114 = vector.extract_strided_slice %111 {offsets = [0, 0], sizes = [2, 32], strides = [1, 1]} : vector<2x96xf32> to vector<2x32xf32>
    %115 = vector.extract_strided_slice %111 {offsets = [0, 32], sizes = [2, 32], strides = [1, 1]} : vector<2x96xf32> to vector<2x32xf32>
    %116 = vector.extract_strided_slice %111 {offsets = [0, 64], sizes = [2, 32], strides = [1, 1]} : vector<2x96xf32> to vector<2x32xf32>
    %117 = arith.mulf %115, %95 : vector<2x32xf32>
    %118 = arith.mulf %114, %113 : vector<2x32xf32>
    %119 = arith.addf %117, %118 : vector<2x32xf32>
    %120 = math.tanh %119 : vector<2x32xf32>
    %121 = arith.mulf %116, %120 : vector<2x32xf32>
    %c0_68 = arith.constant 0 : index
    %c1_69 = arith.constant 1 : index
    %c0_70 = arith.constant 0 : index
    %122 = vector.load %arg10[%c0_68, %c1_69, %c0_70] : memref<2x8x32xf32, #tpu.memory_space<vmem>>, vector<2x1x32xf32>
    %123 = vector.shape_cast %122 : vector<2x1x32xf32> to vector<2x32xf32>
    %124 = vector.shape_cast %121 : vector<2x32xf32> to vector<2x1x32xf32>
    tpu.vector_store %arg10[%c0_68, %c1_69, %c0_70], %124 {strides = array<i32>} : memref<2x8x32xf32, #tpu.memory_space<vmem>>, vector<2x1x32xf32>,
    %c0_71 = arith.constant 0 : index
    %c2_72 = arith.constant 2 : index
    %c0_73 = arith.constant 0 : index
    %125 = vector.load %arg11[%c0_71, %c2_72, %c0_73] : memref<2x8x128xf32, #tpu.memory_space<vmem>>, vector<2x1x128xf32>
    %126 = vector.shape_cast %125 : vector<2x1x128xf32> to vector<2x128xf32>
    %127 = arith.truncf %121 : vector<2x32xf32> to vector<2x32xbf16>
    %cst_74 = arith.constant dense<0.000000e+00> : vector<2x128xf32>
    %128 = tpu.matmul %127, %1, %cst_74 {dimension_numbers = #tpu.dot_dimension_numbers<[1], [0], [0], [1], [0, 0, 1, 1], [], []>} : vector<2x32xbf16>, vector<32x128xbf16>, vector<2x128xf32> -> vector<2x128xf32>
    %129 = arith.addf %126, %128 : vector<2x128xf32>
    %130 = vector.extract_strided_slice %129 {offsets = [0, 0], sizes = [2, 96], strides = [1, 1]} : vector<2x128xf32> to vector<2x96xf32>
    %131 = arith.negf %130 : vector<2x96xf32>
    %132 = math.exp %131 : vector<2x96xf32>
    %cst_75 = arith.constant 1.000000e+00 : f32
    %133 = vector.broadcast %cst_75 : f32 to vector<2x96xf32>
    %134 = arith.addf %133, %132 : vector<2x96xf32>
    %135 = arith.divf %133, %134 : vector<2x96xf32>
    %136 = vector.extract_strided_slice %129 {offsets = [0, 96], sizes = [2, 32], strides = [1, 1]} : vector<2x128xf32> to vector<2x32xf32>
    %137 = math.tanh %136 : vector<2x32xf32>
    %138 = vector.extract_strided_slice %135 {offsets = [0, 0], sizes = [2, 32], strides = [1, 1]} : vector<2x96xf32> to vector<2x32xf32>
    %139 = vector.extract_strided_slice %135 {offsets = [0, 32], sizes = [2, 32], strides = [1, 1]} : vector<2x96xf32> to vector<2x32xf32>
    %140 = vector.extract_strided_slice %135 {offsets = [0, 64], sizes = [2, 32], strides = [1, 1]} : vector<2x96xf32> to vector<2x32xf32>
    %141 = arith.mulf %139, %119 : vector<2x32xf32>
    %142 = arith.mulf %138, %137 : vector<2x32xf32>
    %143 = arith.addf %141, %142 : vector<2x32xf32>
    %144 = math.tanh %143 : vector<2x32xf32>
    %145 = arith.mulf %140, %144 : vector<2x32xf32>
    %c0_76 = arith.constant 0 : index
    %c2_77 = arith.constant 2 : index
    %c0_78 = arith.constant 0 : index
    %146 = vector.load %arg10[%c0_76, %c2_77, %c0_78] : memref<2x8x32xf32, #tpu.memory_space<vmem>>, vector<2x1x32xf32>
    %147 = vector.shape_cast %146 : vector<2x1x32xf32> to vector<2x32xf32>
    %148 = vector.shape_cast %145 : vector<2x32xf32> to vector<2x1x32xf32>
    tpu.vector_store %arg10[%c0_76, %c2_77, %c0_78], %148 {strides = array<i32>} : memref<2x8x32xf32, #tpu.memory_space<vmem>>, vector<2x1x32xf32>,
    %c0_79 = arith.constant 0 : index
    %c3_80 = arith.constant 3 : index
    %c0_81 = arith.constant 0 : index
    %149 = vector.load %arg11[%c0_79, %c3_80, %c0_81] : memref<2x8x128xf32, #tpu.memory_space<vmem>>, vector<2x1x128xf32>
    %150 = vector.shape_cast %149 : vector<2x1x128xf32> to vector<2x128xf32>
    %151 = arith.truncf %145 : vector<2x32xf32> to vector<2x32xbf16>
    %cst_82 = arith.constant dense<0.000000e+00> : vector<2x128xf32>
    %152 = tpu.matmul %151, %1, %cst_82 {dimension_numbers = #tpu.dot_dimension_numbers<[1], [0], [0], [1], [0, 0, 1, 1], [], []>} : vector<2x32xbf16>, vector<32x128xbf16>, vector<2x128xf32> -> vector<2x128xf32>
    %153 = arith.addf %150, %152 : vector<2x128xf32>
    %154 = vector.extract_strided_slice %153 {offsets = [0, 0], sizes = [2, 96], strides = [1, 1]} : vector<2x128xf32> to vector<2x96xf32>
    %155 = arith.negf %154 : vector<2x96xf32>
    %156 = math.exp %155 : vector<2x96xf32>
    %cst_83 = arith.constant 1.000000e+00 : f32
    %157 = vector.broadcast %cst_83 : f32 to vector<2x96xf32>
    %158 = arith.addf %157, %156 : vector<2x96xf32>
    %159 = arith.divf %157, %158 : vector<2x96xf32>
    %160 = vector.extract_strided_slice %153 {offsets = [0, 96], sizes = [2, 32], strides = [1, 1]} : vector<2x128xf32> to vector<2x32xf32>
    %161 = math.tanh %160 : vector<2x32xf32>
    %162 = vector.extract_strided_slice %159 {offsets = [0, 0], sizes = [2, 32], strides = [1, 1]} : vector<2x96xf32> to vector<2x32xf32>
    %163 = vector.extract_strided_slice %159 {offsets = [0, 32], sizes = [2, 32], strides = [1, 1]} : vector<2x96xf32> to vector<2x32xf32>
    %164 = vector.extract_strided_slice %159 {offsets = [0, 64], sizes = [2, 32], strides = [1, 1]} : vector<2x96xf32> to vector<2x32xf32>
    %165 = arith.mulf %163, %143 : vector<2x32xf32>
    %166 = arith.mulf %162, %161 : vector<2x32xf32>
    %167 = arith.addf %165, %166 : vector<2x32xf32>
    %168 = math.tanh %167 : vector<2x32xf32>
    %169 = arith.mulf %164, %168 : vector<2x32xf32>
    %c0_84 = arith.constant 0 : index
    %c3_85 = arith.constant 3 : index
    %c0_86 = arith.constant 0 : index
    %170 = vector.load %arg10[%c0_84, %c3_85, %c0_86] : memref<2x8x32xf32, #tpu.memory_space<vmem>>, vector<2x1x32xf32>
    %171 = vector.shape_cast %170 : vector<2x1x32xf32> to vector<2x32xf32>
    %172 = vector.shape_cast %169 : vector<2x32xf32> to vector<2x1x32xf32>
    tpu.vector_store %arg10[%c0_84, %c3_85, %c0_86], %172 {strides = array<i32>} : memref<2x8x32xf32, #tpu.memory_space<vmem>>, vector<2x1x32xf32>,
    %c0_87 = arith.constant 0 : index
    %c4_88 = arith.constant 4 : index
    %c0_89 = arith.constant 0 : index
    %173 = vector.load %arg11[%c0_87, %c4_88, %c0_89] : memref<2x8x128xf32, #tpu.memory_space<vmem>>, vector<2x1x128xf32>
    %174 = vector.shape_cast %173 : vector<2x1x128xf32> to vector<2x128xf32>
    %175 = arith.truncf %169 : vector<2x32xf32> to vector<2x32xbf16>
    %cst_90 = arith.constant dense<0.000000e+00> : vector<2x128xf32>
    %176 = tpu.matmul %175, %1, %cst_90 {dimension_numbers = #tpu.dot_dimension_numbers<[1], [0], [0], [1], [0, 0, 1, 1], [], []>} : vector<2x32xbf16>, vector<32x128xbf16>, vector<2x128xf32> -> vector<2x128xf32>
    %177 = arith.addf %174, %176 : vector<2x128xf32>
    %178 = vector.extract_strided_slice %177 {offsets = [0, 0], sizes = [2, 96], strides = [1, 1]} : vector<2x128xf32> to vector<2x96xf32>
    %179 = arith.negf %178 : vector<2x96xf32>
    %180 = math.exp %179 : vector<2x96xf32>
    %cst_91 = arith.constant 1.000000e+00 : f32
    %181 = vector.broadcast %cst_91 : f32 to vector<2x96xf32>
    %182 = arith.addf %181, %180 : vector<2x96xf32>
    %183 = arith.divf %181, %182 : vector<2x96xf32>
    %184 = vector.extract_strided_slice %177 {offsets = [0, 96], sizes = [2, 32], strides = [1, 1]} : vector<2x128xf32> to vector<2x32xf32>
    %185 = math.tanh %184 : vector<2x32xf32>
    %186 = vector.extract_strided_slice %183 {offsets = [0, 0], sizes = [2, 32], strides = [1, 1]} : vector<2x96xf32> to vector<2x32xf32>
    %187 = vector.extract_strided_slice %183 {offsets = [0, 32], sizes = [2, 32], strides = [1, 1]} : vector<2x96xf32> to vector<2x32xf32>
    %188 = vector.extract_strided_slice %183 {offsets = [0, 64], sizes = [2, 32], strides = [1, 1]} : vector<2x96xf32> to vector<2x32xf32>
    %189 = arith.mulf %187, %167 : vector<2x32xf32>
    %190 = arith.mulf %186, %185 : vector<2x32xf32>
    %191 = arith.addf %189, %190 : vector<2x32xf32>
    %192 = math.tanh %191 : vector<2x32xf32>
    %193 = arith.mulf %188, %192 : vector<2x32xf32>
    %c0_92 = arith.constant 0 : index
    %c4_93 = arith.constant 4 : index
    %c0_94 = arith.constant 0 : index
    %194 = vector.load %arg10[%c0_92, %c4_93, %c0_94] : memref<2x8x32xf32, #tpu.memory_space<vmem>>, vector<2x1x32xf32>
    %195 = vector.shape_cast %194 : vector<2x1x32xf32> to vector<2x32xf32>
    %196 = vector.shape_cast %193 : vector<2x32xf32> to vector<2x1x32xf32>
    tpu.vector_store %arg10[%c0_92, %c4_93, %c0_94], %196 {strides = array<i32>} : memref<2x8x32xf32, #tpu.memory_space<vmem>>, vector<2x1x32xf32>,
    %c0_95 = arith.constant 0 : index
    %c5_96 = arith.constant 5 : index
    %c0_97 = arith.constant 0 : index
    %197 = vector.load %arg11[%c0_95, %c5_96, %c0_97] : memref<2x8x128xf32, #tpu.memory_space<vmem>>, vector<2x1x128xf32>
    %198 = vector.shape_cast %197 : vector<2x1x128xf32> to vector<2x128xf32>
    %199 = arith.truncf %193 : vector<2x32xf32> to vector<2x32xbf16>
    %cst_98 = arith.constant dense<0.000000e+00> : vector<2x128xf32>
    %200 = tpu.matmul %199, %1, %cst_98 {dimension_numbers = #tpu.dot_dimension_numbers<[1], [0], [0], [1], [0, 0, 1, 1], [], []>} : vector<2x32xbf16>, vector<32x128xbf16>, vector<2x128xf32> -> vector<2x128xf32>
    %201 = arith.addf %198, %200 : vector<2x128xf32>
    %202 = vector.extract_strided_slice %201 {offsets = [0, 0], sizes = [2, 96], strides = [1, 1]} : vector<2x128xf32> to vector<2x96xf32>
    %203 = arith.negf %202 : vector<2x96xf32>
    %204 = math.exp %203 : vector<2x96xf32>
    %cst_99 = arith.constant 1.000000e+00 : f32
    %205 = vector.broadcast %cst_99 : f32 to vector<2x96xf32>
    %206 = arith.addf %205, %204 : vector<2x96xf32>
    %207 = arith.divf %205, %206 : vector<2x96xf32>
    %208 = vector.extract_strided_slice %201 {offsets = [0, 96], sizes = [2, 32], strides = [1, 1]} : vector<2x128xf32> to vector<2x32xf32>
    %209 = math.tanh %208 : vector<2x32xf32>
    %210 = vector.extract_strided_slice %207 {offsets = [0, 0], sizes = [2, 32], strides = [1, 1]} : vector<2x96xf32> to vector<2x32xf32>
    %211 = vector.extract_strided_slice %207 {offsets = [0, 32], sizes = [2, 32], strides = [1, 1]} : vector<2x96xf32> to vector<2x32xf32>
    %212 = vector.extract_strided_slice %207 {offsets = [0, 64], sizes = [2, 32], strides = [1, 1]} : vector<2x96xf32> to vector<2x32xf32>
    %213 = arith.mulf %211, %191 : vector<2x32xf32>
    %214 = arith.mulf %210, %209 : vector<2x32xf32>
    %215 = arith.addf %213, %214 : vector<2x32xf32>
    %216 = math.tanh %215 : vector<2x32xf32>
    %217 = arith.mulf %212, %216 : vector<2x32xf32>
    %c0_100 = arith.constant 0 : index
    %c5_101 = arith.constant 5 : index
    %c0_102 = arith.constant 0 : index
    %218 = vector.load %arg10[%c0_100, %c5_101, %c0_102] : memref<2x8x32xf32, #tpu.memory_space<vmem>>, vector<2x1x32xf32>
    %219 = vector.shape_cast %218 : vector<2x1x32xf32> to vector<2x32xf32>
    %220 = vector.shape_cast %217 : vector<2x32xf32> to vector<2x1x32xf32>
    tpu.vector_store %arg10[%c0_100, %c5_101, %c0_102], %220 {strides = array<i32>} : memref<2x8x32xf32, #tpu.memory_space<vmem>>, vector<2x1x32xf32>,
    %c0_103 = arith.constant 0 : index
    %c6_104 = arith.constant 6 : index
    %c0_105 = arith.constant 0 : index
    %221 = vector.load %arg11[%c0_103, %c6_104, %c0_105] : memref<2x8x128xf32, #tpu.memory_space<vmem>>, vector<2x1x128xf32>
    %222 = vector.shape_cast %221 : vector<2x1x128xf32> to vector<2x128xf32>
    %223 = arith.truncf %217 : vector<2x32xf32> to vector<2x32xbf16>
    %cst_106 = arith.constant dense<0.000000e+00> : vector<2x128xf32>
    %224 = tpu.matmul %223, %1, %cst_106 {dimension_numbers = #tpu.dot_dimension_numbers<[1], [0], [0], [1], [0, 0, 1, 1], [], []>} : vector<2x32xbf16>, vector<32x128xbf16>, vector<2x128xf32> -> vector<2x128xf32>
    %225 = arith.addf %222, %224 : vector<2x128xf32>
    %226 = vector.extract_strided_slice %225 {offsets = [0, 0], sizes = [2, 96], strides = [1, 1]} : vector<2x128xf32> to vector<2x96xf32>
    %227 = arith.negf %226 : vector<2x96xf32>
    %228 = math.exp %227 : vector<2x96xf32>
    %cst_107 = arith.constant 1.000000e+00 : f32
    %229 = vector.broadcast %cst_107 : f32 to vector<2x96xf32>
    %230 = arith.addf %229, %228 : vector<2x96xf32>
    %231 = arith.divf %229, %230 : vector<2x96xf32>
    %232 = vector.extract_strided_slice %225 {offsets = [0, 96], sizes = [2, 32], strides = [1, 1]} : vector<2x128xf32> to vector<2x32xf32>
    %233 = math.tanh %232 : vector<2x32xf32>
    %234 = vector.extract_strided_slice %231 {offsets = [0, 0], sizes = [2, 32], strides = [1, 1]} : vector<2x96xf32> to vector<2x32xf32>
    %235 = vector.extract_strided_slice %231 {offsets = [0, 32], sizes = [2, 32], strides = [1, 1]} : vector<2x96xf32> to vector<2x32xf32>
    %236 = vector.extract_strided_slice %231 {offsets = [0, 64], sizes = [2, 32], strides = [1, 1]} : vector<2x96xf32> to vector<2x32xf32>
    %237 = arith.mulf %235, %215 : vector<2x32xf32>
    %238 = arith.mulf %234, %233 : vector<2x32xf32>
    %239 = arith.addf %237, %238 : vector<2x32xf32>
    %240 = math.tanh %239 : vector<2x32xf32>
    %241 = arith.mulf %236, %240 : vector<2x32xf32>
    %c0_108 = arith.constant 0 : index
    %c6_109 = arith.constant 6 : index
    %c0_110 = arith.constant 0 : index
    %242 = vector.load %arg10[%c0_108, %c6_109, %c0_110] : memref<2x8x32xf32, #tpu.memory_space<vmem>>, vector<2x1x32xf32>
    %243 = vector.shape_cast %242 : vector<2x1x32xf32> to vector<2x32xf32>
    %244 = vector.shape_cast %241 : vector<2x32xf32> to vector<2x1x32xf32>
    tpu.vector_store %arg10[%c0_108, %c6_109, %c0_110], %244 {strides = array<i32>} : memref<2x8x32xf32, #tpu.memory_space<vmem>>, vector<2x1x32xf32>,
    %c0_111 = arith.constant 0 : index
    %c7_112 = arith.constant 7 : index
    %c0_113 = arith.constant 0 : index
    %245 = vector.load %arg11[%c0_111, %c7_112, %c0_113] : memref<2x8x128xf32, #tpu.memory_space<vmem>>, vector<2x1x128xf32>
    %246 = vector.shape_cast %245 : vector<2x1x128xf32> to vector<2x128xf32>
    %247 = arith.truncf %241 : vector<2x32xf32> to vector<2x32xbf16>
    %cst_114 = arith.constant dense<0.000000e+00> : vector<2x128xf32>
    %248 = tpu.matmul %247, %1, %cst_114 {dimension_numbers = #tpu.dot_dimension_numbers<[1], [0], [0], [1], [0, 0, 1, 1], [], []>} : vector<2x32xbf16>, vector<32x128xbf16>, vector<2x128xf32> -> vector<2x128xf32>
    %249 = arith.addf %246, %248 : vector<2x128xf32>
    %250 = vector.extract_strided_slice %249 {offsets = [0, 0], sizes = [2, 96], strides = [1, 1]} : vector<2x128xf32> to vector<2x96xf32>
    %251 = arith.negf %250 : vector<2x96xf32>
    %252 = math.exp %251 : vector<2x96xf32>
    %cst_115 = arith.constant 1.000000e+00 : f32
    %253 = vector.broadcast %cst_115 : f32 to vector<2x96xf32>
    %254 = arith.addf %253, %252 : vector<2x96xf32>
    %255 = arith.divf %253, %254 : vector<2x96xf32>
    %256 = vector.extract_strided_slice %249 {offsets = [0, 96], sizes = [2, 32], strides = [1, 1]} : vector<2x128xf32> to vector<2x32xf32>
    %257 = math.tanh %256 : vector<2x32xf32>
    %258 = vector.extract_strided_slice %255 {offsets = [0, 0], sizes = [2, 32], strides = [1, 1]} : vector<2x96xf32> to vector<2x32xf32>
    %259 = vector.extract_strided_slice %255 {offsets = [0, 32], sizes = [2, 32], strides = [1, 1]} : vector<2x96xf32> to vector<2x32xf32>
    %260 = vector.extract_strided_slice %255 {offsets = [0, 64], sizes = [2, 32], strides = [1, 1]} : vector<2x96xf32> to vector<2x32xf32>
    %261 = arith.mulf %259, %239 : vector<2x32xf32>
    %262 = arith.mulf %258, %257 : vector<2x32xf32>
    %263 = arith.addf %261, %262 : vector<2x32xf32>
    %264 = math.tanh %263 : vector<2x32xf32>
    %265 = arith.mulf %260, %264 : vector<2x32xf32>
    %c0_116 = arith.constant 0 : index
    %c7_117 = arith.constant 7 : index
    %c0_118 = arith.constant 0 : index
    %266 = vector.load %arg10[%c0_116, %c7_117, %c0_118] : memref<2x8x32xf32, #tpu.memory_space<vmem>>, vector<2x1x32xf32>
    %267 = vector.shape_cast %266 : vector<2x1x32xf32> to vector<2x32xf32>
    %268 = vector.shape_cast %265 : vector<2x32xf32> to vector<2x1x32xf32>
    tpu.vector_store %arg10[%c0_116, %c7_117, %c0_118], %268 {strides = array<i32>} : memref<2x8x32xf32, #tpu.memory_space<vmem>>, vector<2x1x32xf32>,
    %c0_119 = arith.constant 0 : index
    %c0_120 = arith.constant 0 : index
    %269 = vector.load %arg5[%c0_119, %c0_120] : memref<32x128xbf16, #tpu.memory_space<vmem>>, vector<32x128xbf16>
    %c0_121 = arith.constant 0 : index
    %c0_122 = arith.constant 0 : index
    %270 = vector.load %arg6[%c0_121, %c0_122] : memref<32x128xbf16, #tpu.memory_space<vmem>>, vector<32x128xbf16>
    %c0_123 = arith.constant 0 : index
    %c0_124 = arith.constant 0 : index
    %271 = vector.load %arg7[%c0_123, %c0_124] : memref<1x128xf32, #tpu.memory_space<vmem>>, vector<1x128xf32>
    %c0_125 = arith.constant 0 : index
    %c0_126 = arith.constant 0 : index
    %c0_127 = arith.constant 0 : index
    %272 = vector.load %arg10[%c0_125, %c0_126, %c0_127] : memref<2x8x32xf32, #tpu.memory_space<vmem>>, vector<2x1x32xf32>
    %273 = vector.shape_cast %272 : vector<2x1x32xf32> to vector<2x32xf32>
    %274 = arith.truncf %273 : vector<2x32xf32> to vector<2x32xbf16>
    %cst_128 = arith.constant dense<0.000000e+00> : vector<2x128xf32>
    %275 = tpu.matmul %274, %269, %cst_128 {dimension_numbers = #tpu.dot_dimension_numbers<[1], [0], [0], [1], [0, 0, 1, 1], [], []>} : vector<2x32xbf16>, vector<32x128xbf16>, vector<2x128xf32> -> vector<2x128xf32>
    %276 = vector.broadcast %271 : vector<1x128xf32> to vector<2x128xf32>
    %277 = arith.addf %275, %276 : vector<2x128xf32>
    %c0_129 = arith.constant 0 : index
    %c0_130 = arith.constant 0 : index
    %c0_131 = arith.constant 0 : index
    %278 = vector.load %arg11[%c0_129, %c0_130, %c0_131] : memref<2x8x128xf32, #tpu.memory_space<vmem>>, vector<2x1x128xf32>
    %279 = vector.shape_cast %278 : vector<2x1x128xf32> to vector<2x128xf32>
    %280 = vector.shape_cast %277 : vector<2x128xf32> to vector<2x1x128xf32>
    tpu.vector_store %arg11[%c0_129, %c0_130, %c0_131], %280 {strides = array<i32>} : memref<2x8x128xf32, #tpu.memory_space<vmem>>, vector<2x1x128xf32>,
    %c0_132 = arith.constant 0 : index
    %c1_133 = arith.constant 1 : index
    %c0_134 = arith.constant 0 : index
    %281 = vector.load %arg10[%c0_132, %c1_133, %c0_134] : memref<2x8x32xf32, #tpu.memory_space<vmem>>, vector<2x1x32xf32>
    %282 = vector.shape_cast %281 : vector<2x1x32xf32> to vector<2x32xf32>
    %283 = arith.truncf %282 : vector<2x32xf32> to vector<2x32xbf16>
    %cst_135 = arith.constant dense<0.000000e+00> : vector<2x128xf32>
    %284 = tpu.matmul %283, %269, %cst_135 {dimension_numbers = #tpu.dot_dimension_numbers<[1], [0], [0], [1], [0, 0, 1, 1], [], []>} : vector<2x32xbf16>, vector<32x128xbf16>, vector<2x128xf32> -> vector<2x128xf32>
    %285 = vector.broadcast %271 : vector<1x128xf32> to vector<2x128xf32>
    %286 = arith.addf %284, %285 : vector<2x128xf32>
    %c0_136 = arith.constant 0 : index
    %c1_137 = arith.constant 1 : index
    %c0_138 = arith.constant 0 : index
    %287 = vector.load %arg11[%c0_136, %c1_137, %c0_138] : memref<2x8x128xf32, #tpu.memory_space<vmem>>, vector<2x1x128xf32>
    %288 = vector.shape_cast %287 : vector<2x1x128xf32> to vector<2x128xf32>
    %289 = vector.shape_cast %286 : vector<2x128xf32> to vector<2x1x128xf32>
    tpu.vector_store %arg11[%c0_136, %c1_137, %c0_138], %289 {strides = array<i32>} : memref<2x8x128xf32, #tpu.memory_space<vmem>>, vector<2x1x128xf32>,
    %c0_139 = arith.constant 0 : index
    %c2_140 = arith.constant 2 : index
    %c0_141 = arith.constant 0 : index
    %290 = vector.load %arg10[%c0_139, %c2_140, %c0_141] : memref<2x8x32xf32, #tpu.memory_space<vmem>>, vector<2x1x32xf32>
    %291 = vector.shape_cast %290 : vector<2x1x32xf32> to vector<2x32xf32>
    %292 = arith.truncf %291 : vector<2x32xf32> to vector<2x32xbf16>
    %cst_142 = arith.constant dense<0.000000e+00> : vector<2x128xf32>
    %293 = tpu.matmul %292, %269, %cst_142 {dimension_numbers = #tpu.dot_dimension_numbers<[1], [0], [0], [1], [0, 0, 1, 1], [], []>} : vector<2x32xbf16>, vector<32x128xbf16>, vector<2x128xf32> -> vector<2x128xf32>
    %294 = vector.broadcast %271 : vector<1x128xf32> to vector<2x128xf32>
    %295 = arith.addf %293, %294 : vector<2x128xf32>
    %c0_143 = arith.constant 0 : index
    %c2_144 = arith.constant 2 : index
    %c0_145 = arith.constant 0 : index
    %296 = vector.load %arg11[%c0_143, %c2_144, %c0_145] : memref<2x8x128xf32, #tpu.memory_space<vmem>>, vector<2x1x128xf32>
    %297 = vector.shape_cast %296 : vector<2x1x128xf32> to vector<2x128xf32>
    %298 = vector.shape_cast %295 : vector<2x128xf32> to vector<2x1x128xf32>
    tpu.vector_store %arg11[%c0_143, %c2_144, %c0_145], %298 {strides = array<i32>} : memref<2x8x128xf32, #tpu.memory_space<vmem>>, vector<2x1x128xf32>,
    %c0_146 = arith.constant 0 : index
    %c3_147 = arith.constant 3 : index
    %c0_148 = arith.constant 0 : index
    %299 = vector.load %arg10[%c0_146, %c3_147, %c0_148] : memref<2x8x32xf32, #tpu.memory_space<vmem>>, vector<2x1x32xf32>
    %300 = vector.shape_cast %299 : vector<2x1x32xf32> to vector<2x32xf32>
    %301 = arith.truncf %300 : vector<2x32xf32> to vector<2x32xbf16>
    %cst_149 = arith.constant dense<0.000000e+00> : vector<2x128xf32>
    %302 = tpu.matmul %301, %269, %cst_149 {dimension_numbers = #tpu.dot_dimension_numbers<[1], [0], [0], [1], [0, 0, 1, 1], [], []>} : vector<2x32xbf16>, vector<32x128xbf16>, vector<2x128xf32> -> vector<2x128xf32>
    %303 = vector.broadcast %271 : vector<1x128xf32> to vector<2x128xf32>
    %304 = arith.addf %302, %303 : vector<2x128xf32>
    %c0_150 = arith.constant 0 : index
    %c3_151 = arith.constant 3 : index
    %c0_152 = arith.constant 0 : index
    %305 = vector.load %arg11[%c0_150, %c3_151, %c0_152] : memref<2x8x128xf32, #tpu.memory_space<vmem>>, vector<2x1x128xf32>
    %306 = vector.shape_cast %305 : vector<2x1x128xf32> to vector<2x128xf32>
    %307 = vector.shape_cast %304 : vector<2x128xf32> to vector<2x1x128xf32>
    tpu.vector_store %arg11[%c0_150, %c3_151, %c0_152], %307 {strides = array<i32>} : memref<2x8x128xf32, #tpu.memory_space<vmem>>, vector<2x1x128xf32>,
    %c0_153 = arith.constant 0 : index
    %c4_154 = arith.constant 4 : index
    %c0_155 = arith.constant 0 : index
    %308 = vector.load %arg10[%c0_153, %c4_154, %c0_155] : memref<2x8x32xf32, #tpu.memory_space<vmem>>, vector<2x1x32xf32>
    %309 = vector.shape_cast %308 : vector<2x1x32xf32> to vector<2x32xf32>
    %310 = arith.truncf %309 : vector<2x32xf32> to vector<2x32xbf16>
    %cst_156 = arith.constant dense<0.000000e+00> : vector<2x128xf32>
    %311 = tpu.matmul %310, %269, %cst_156 {dimension_numbers = #tpu.dot_dimension_numbers<[1], [0], [0], [1], [0, 0, 1, 1], [], []>} : vector<2x32xbf16>, vector<32x128xbf16>, vector<2x128xf32> -> vector<2x128xf32>
    %312 = vector.broadcast %271 : vector<1x128xf32> to vector<2x128xf32>
    %313 = arith.addf %311, %312 : vector<2x128xf32>
    %c0_157 = arith.constant 0 : index
    %c4_158 = arith.constant 4 : index
    %c0_159 = arith.constant 0 : index
    %314 = vector.load %arg11[%c0_157, %c4_158, %c0_159] : memref<2x8x128xf32, #tpu.memory_space<vmem>>, vector<2x1x128xf32>
    %315 = vector.shape_cast %314 : vector<2x1x128xf32> to vector<2x128xf32>
    %316 = vector.shape_cast %313 : vector<2x128xf32> to vector<2x1x128xf32>
    tpu.vector_store %arg11[%c0_157, %c4_158, %c0_159], %316 {strides = array<i32>} : memref<2x8x128xf32, #tpu.memory_space<vmem>>, vector<2x1x128xf32>,
    %c0_160 = arith.constant 0 : index
    %c5_161 = arith.constant 5 : index
    %c0_162 = arith.constant 0 : index
    %317 = vector.load %arg10[%c0_160, %c5_161, %c0_162] : memref<2x8x32xf32, #tpu.memory_space<vmem>>, vector<2x1x32xf32>
    %318 = vector.shape_cast %317 : vector<2x1x32xf32> to vector<2x32xf32>
    %319 = arith.truncf %318 : vector<2x32xf32> to vector<2x32xbf16>
    %cst_163 = arith.constant dense<0.000000e+00> : vector<2x128xf32>
    %320 = tpu.matmul %319, %269, %cst_163 {dimension_numbers = #tpu.dot_dimension_numbers<[1], [0], [0], [1], [0, 0, 1, 1], [], []>} : vector<2x32xbf16>, vector<32x128xbf16>, vector<2x128xf32> -> vector<2x128xf32>
    %321 = vector.broadcast %271 : vector<1x128xf32> to vector<2x128xf32>
    %322 = arith.addf %320, %321 : vector<2x128xf32>
    %c0_164 = arith.constant 0 : index
    %c5_165 = arith.constant 5 : index
    %c0_166 = arith.constant 0 : index
    %323 = vector.load %arg11[%c0_164, %c5_165, %c0_166] : memref<2x8x128xf32, #tpu.memory_space<vmem>>, vector<2x1x128xf32>
    %324 = vector.shape_cast %323 : vector<2x1x128xf32> to vector<2x128xf32>
    %325 = vector.shape_cast %322 : vector<2x128xf32> to vector<2x1x128xf32>
    tpu.vector_store %arg11[%c0_164, %c5_165, %c0_166], %325 {strides = array<i32>} : memref<2x8x128xf32, #tpu.memory_space<vmem>>, vector<2x1x128xf32>,
    %c0_167 = arith.constant 0 : index
    %c6_168 = arith.constant 6 : index
    %c0_169 = arith.constant 0 : index
    %326 = vector.load %arg10[%c0_167, %c6_168, %c0_169] : memref<2x8x32xf32, #tpu.memory_space<vmem>>, vector<2x1x32xf32>
    %327 = vector.shape_cast %326 : vector<2x1x32xf32> to vector<2x32xf32>
    %328 = arith.truncf %327 : vector<2x32xf32> to vector<2x32xbf16>
    %cst_170 = arith.constant dense<0.000000e+00> : vector<2x128xf32>
    %329 = tpu.matmul %328, %269, %cst_170 {dimension_numbers = #tpu.dot_dimension_numbers<[1], [0], [0], [1], [0, 0, 1, 1], [], []>} : vector<2x32xbf16>, vector<32x128xbf16>, vector<2x128xf32> -> vector<2x128xf32>
    %330 = vector.broadcast %271 : vector<1x128xf32> to vector<2x128xf32>
    %331 = arith.addf %329, %330 : vector<2x128xf32>
    %c0_171 = arith.constant 0 : index
    %c6_172 = arith.constant 6 : index
    %c0_173 = arith.constant 0 : index
    %332 = vector.load %arg11[%c0_171, %c6_172, %c0_173] : memref<2x8x128xf32, #tpu.memory_space<vmem>>, vector<2x1x128xf32>
    %333 = vector.shape_cast %332 : vector<2x1x128xf32> to vector<2x128xf32>
    %334 = vector.shape_cast %331 : vector<2x128xf32> to vector<2x1x128xf32>
    tpu.vector_store %arg11[%c0_171, %c6_172, %c0_173], %334 {strides = array<i32>} : memref<2x8x128xf32, #tpu.memory_space<vmem>>, vector<2x1x128xf32>,
    %c0_174 = arith.constant 0 : index
    %c7_175 = arith.constant 7 : index
    %c0_176 = arith.constant 0 : index
    %335 = vector.load %arg10[%c0_174, %c7_175, %c0_176] : memref<2x8x32xf32, #tpu.memory_space<vmem>>, vector<2x1x32xf32>
    %336 = vector.shape_cast %335 : vector<2x1x32xf32> to vector<2x32xf32>
    %337 = arith.truncf %336 : vector<2x32xf32> to vector<2x32xbf16>
    %cst_177 = arith.constant dense<0.000000e+00> : vector<2x128xf32>
    %338 = tpu.matmul %337, %269, %cst_177 {dimension_numbers = #tpu.dot_dimension_numbers<[1], [0], [0], [1], [0, 0, 1, 1], [], []>} : vector<2x32xbf16>, vector<32x128xbf16>, vector<2x128xf32> -> vector<2x128xf32>
    %339 = vector.broadcast %271 : vector<1x128xf32> to vector<2x128xf32>
    %340 = arith.addf %338, %339 : vector<2x128xf32>
    %c0_178 = arith.constant 0 : index
    %c7_179 = arith.constant 7 : index
    %c0_180 = arith.constant 0 : index
    %341 = vector.load %arg11[%c0_178, %c7_179, %c0_180] : memref<2x8x128xf32, #tpu.memory_space<vmem>>, vector<2x1x128xf32>
    %342 = vector.shape_cast %341 : vector<2x1x128xf32> to vector<2x128xf32>
    %343 = vector.shape_cast %340 : vector<2x128xf32> to vector<2x1x128xf32>
    tpu.vector_store %arg11[%c0_178, %c7_179, %c0_180], %343 {strides = array<i32>} : memref<2x8x128xf32, #tpu.memory_space<vmem>>, vector<2x1x128xf32>,
    %cst_181 = arith.constant 0.000000e+00 : f32
    %344 = vector.broadcast %cst_181 : f32 to vector<2x32xf32>
    %cst_182 = arith.constant 0.000000e+00 : f32
    %345 = vector.broadcast %cst_182 : f32 to vector<2x32xf32>
    %c0_183 = arith.constant 0 : index
    %c0_184 = arith.constant 0 : index
    %c0_185 = arith.constant 0 : index
    %346 = vector.load %arg11[%c0_183, %c0_184, %c0_185] : memref<2x8x128xf32, #tpu.memory_space<vmem>>, vector<2x1x128xf32>
    %347 = vector.shape_cast %346 : vector<2x1x128xf32> to vector<2x128xf32>
    %348 = arith.truncf %344 : vector<2x32xf32> to vector<2x32xbf16>
    %cst_186 = arith.constant dense<0.000000e+00> : vector<2x128xf32>
    %349 = tpu.matmul %348, %270, %cst_186 {dimension_numbers = #tpu.dot_dimension_numbers<[1], [0], [0], [1], [0, 0, 1, 1], [], []>} : vector<2x32xbf16>, vector<32x128xbf16>, vector<2x128xf32> -> vector<2x128xf32>
    %350 = arith.addf %347, %349 : vector<2x128xf32>
    %351 = vector.extract_strided_slice %350 {offsets = [0, 0], sizes = [2, 96], strides = [1, 1]} : vector<2x128xf32> to vector<2x96xf32>
    %352 = arith.negf %351 : vector<2x96xf32>
    %353 = math.exp %352 : vector<2x96xf32>
    %cst_187 = arith.constant 1.000000e+00 : f32
    %354 = vector.broadcast %cst_187 : f32 to vector<2x96xf32>
    %355 = arith.addf %354, %353 : vector<2x96xf32>
    %356 = arith.divf %354, %355 : vector<2x96xf32>
    %357 = vector.extract_strided_slice %350 {offsets = [0, 96], sizes = [2, 32], strides = [1, 1]} : vector<2x128xf32> to vector<2x32xf32>
    %358 = math.tanh %357 : vector<2x32xf32>
    %359 = vector.extract_strided_slice %356 {offsets = [0, 0], sizes = [2, 32], strides = [1, 1]} : vector<2x96xf32> to vector<2x32xf32>
    %360 = vector.extract_strided_slice %356 {offsets = [0, 32], sizes = [2, 32], strides = [1, 1]} : vector<2x96xf32> to vector<2x32xf32>
    %361 = vector.extract_strided_slice %356 {offsets = [0, 64], sizes = [2, 32], strides = [1, 1]} : vector<2x96xf32> to vector<2x32xf32>
    %362 = arith.mulf %360, %345 : vector<2x32xf32>
    %363 = arith.mulf %359, %358 : vector<2x32xf32>
    %364 = arith.addf %362, %363 : vector<2x32xf32>
    %365 = math.tanh %364 : vector<2x32xf32>
    %366 = arith.mulf %361, %365 : vector<2x32xf32>
    %c0_188 = arith.constant 0 : index
    %c0_189 = arith.constant 0 : index
    %c0_190 = arith.constant 0 : index
    %367 = vector.load %arg8[%c0_188, %c0_189, %c0_190] : memref<2x8x32xf32, #tpu.memory_space<vmem>>, vector<2x1x32xf32>
    %368 = vector.shape_cast %367 : vector<2x1x32xf32> to vector<2x32xf32>
    %369 = vector.shape_cast %366 : vector<2x32xf32> to vector<2x1x32xf32>
    tpu.vector_store %arg8[%c0_188, %c0_189, %c0_190], %369 {strides = array<i32>} : memref<2x8x32xf32, #tpu.memory_space<vmem>>, vector<2x1x32xf32>,
    %c0_191 = arith.constant 0 : index
    %c1_192 = arith.constant 1 : index
    %c0_193 = arith.constant 0 : index
    %370 = vector.load %arg11[%c0_191, %c1_192, %c0_193] : memref<2x8x128xf32, #tpu.memory_space<vmem>>, vector<2x1x128xf32>
    %371 = vector.shape_cast %370 : vector<2x1x128xf32> to vector<2x128xf32>
    %372 = arith.truncf %366 : vector<2x32xf32> to vector<2x32xbf16>
    %cst_194 = arith.constant dense<0.000000e+00> : vector<2x128xf32>
    %373 = tpu.matmul %372, %270, %cst_194 {dimension_numbers = #tpu.dot_dimension_numbers<[1], [0], [0], [1], [0, 0, 1, 1], [], []>} : vector<2x32xbf16>, vector<32x128xbf16>, vector<2x128xf32> -> vector<2x128xf32>
    %374 = arith.addf %371, %373 : vector<2x128xf32>
    %375 = vector.extract_strided_slice %374 {offsets = [0, 0], sizes = [2, 96], strides = [1, 1]} : vector<2x128xf32> to vector<2x96xf32>
    %376 = arith.negf %375 : vector<2x96xf32>
    %377 = math.exp %376 : vector<2x96xf32>
    %cst_195 = arith.constant 1.000000e+00 : f32
    %378 = vector.broadcast %cst_195 : f32 to vector<2x96xf32>
    %379 = arith.addf %378, %377 : vector<2x96xf32>
    %380 = arith.divf %378, %379 : vector<2x96xf32>
    %381 = vector.extract_strided_slice %374 {offsets = [0, 96], sizes = [2, 32], strides = [1, 1]} : vector<2x128xf32> to vector<2x32xf32>
    %382 = math.tanh %381 : vector<2x32xf32>
    %383 = vector.extract_strided_slice %380 {offsets = [0, 0], sizes = [2, 32], strides = [1, 1]} : vector<2x96xf32> to vector<2x32xf32>
    %384 = vector.extract_strided_slice %380 {offsets = [0, 32], sizes = [2, 32], strides = [1, 1]} : vector<2x96xf32> to vector<2x32xf32>
    %385 = vector.extract_strided_slice %380 {offsets = [0, 64], sizes = [2, 32], strides = [1, 1]} : vector<2x96xf32> to vector<2x32xf32>
    %386 = arith.mulf %384, %364 : vector<2x32xf32>
    %387 = arith.mulf %383, %382 : vector<2x32xf32>
    %388 = arith.addf %386, %387 : vector<2x32xf32>
    %389 = math.tanh %388 : vector<2x32xf32>
    %390 = arith.mulf %385, %389 : vector<2x32xf32>
    %c0_196 = arith.constant 0 : index
    %c1_197 = arith.constant 1 : index
    %c0_198 = arith.constant 0 : index
    %391 = vector.load %arg8[%c0_196, %c1_197, %c0_198] : memref<2x8x32xf32, #tpu.memory_space<vmem>>, vector<2x1x32xf32>
    %392 = vector.shape_cast %391 : vector<2x1x32xf32> to vector<2x32xf32>
    %393 = vector.shape_cast %390 : vector<2x32xf32> to vector<2x1x32xf32>
    tpu.vector_store %arg8[%c0_196, %c1_197, %c0_198], %393 {strides = array<i32>} : memref<2x8x32xf32, #tpu.memory_space<vmem>>, vector<2x1x32xf32>,
    %c0_199 = arith.constant 0 : index
    %c2_200 = arith.constant 2 : index
    %c0_201 = arith.constant 0 : index
    %394 = vector.load %arg11[%c0_199, %c2_200, %c0_201] : memref<2x8x128xf32, #tpu.memory_space<vmem>>, vector<2x1x128xf32>
    %395 = vector.shape_cast %394 : vector<2x1x128xf32> to vector<2x128xf32>
    %396 = arith.truncf %390 : vector<2x32xf32> to vector<2x32xbf16>
    %cst_202 = arith.constant dense<0.000000e+00> : vector<2x128xf32>
    %397 = tpu.matmul %396, %270, %cst_202 {dimension_numbers = #tpu.dot_dimension_numbers<[1], [0], [0], [1], [0, 0, 1, 1], [], []>} : vector<2x32xbf16>, vector<32x128xbf16>, vector<2x128xf32> -> vector<2x128xf32>
    %398 = arith.addf %395, %397 : vector<2x128xf32>
    %399 = vector.extract_strided_slice %398 {offsets = [0, 0], sizes = [2, 96], strides = [1, 1]} : vector<2x128xf32> to vector<2x96xf32>
    %400 = arith.negf %399 : vector<2x96xf32>
    %401 = math.exp %400 : vector<2x96xf32>
    %cst_203 = arith.constant 1.000000e+00 : f32
    %402 = vector.broadcast %cst_203 : f32 to vector<2x96xf32>
    %403 = arith.addf %402, %401 : vector<2x96xf32>
    %404 = arith.divf %402, %403 : vector<2x96xf32>
    %405 = vector.extract_strided_slice %398 {offsets = [0, 96], sizes = [2, 32], strides = [1, 1]} : vector<2x128xf32> to vector<2x32xf32>
    %406 = math.tanh %405 : vector<2x32xf32>
    %407 = vector.extract_strided_slice %404 {offsets = [0, 0], sizes = [2, 32], strides = [1, 1]} : vector<2x96xf32> to vector<2x32xf32>
    %408 = vector.extract_strided_slice %404 {offsets = [0, 32], sizes = [2, 32], strides = [1, 1]} : vector<2x96xf32> to vector<2x32xf32>
    %409 = vector.extract_strided_slice %404 {offsets = [0, 64], sizes = [2, 32], strides = [1, 1]} : vector<2x96xf32> to vector<2x32xf32>
    %410 = arith.mulf %408, %388 : vector<2x32xf32>
    %411 = arith.mulf %407, %406 : vector<2x32xf32>
    %412 = arith.addf %410, %411 : vector<2x32xf32>
    %413 = math.tanh %412 : vector<2x32xf32>
    %414 = arith.mulf %409, %413 : vector<2x32xf32>
    %c0_204 = arith.constant 0 : index
    %c2_205 = arith.constant 2 : index
    %c0_206 = arith.constant 0 : index
    %415 = vector.load %arg8[%c0_204, %c2_205, %c0_206] : memref<2x8x32xf32, #tpu.memory_space<vmem>>, vector<2x1x32xf32>
    %416 = vector.shape_cast %415 : vector<2x1x32xf32> to vector<2x32xf32>
    %417 = vector.shape_cast %414 : vector<2x32xf32> to vector<2x1x32xf32>
    tpu.vector_store %arg8[%c0_204, %c2_205, %c0_206], %417 {strides = array<i32>} : memref<2x8x32xf32, #tpu.memory_space<vmem>>, vector<2x1x32xf32>,
    %c0_207 = arith.constant 0 : index
    %c3_208 = arith.constant 3 : index
    %c0_209 = arith.constant 0 : index
    %418 = vector.load %arg11[%c0_207, %c3_208, %c0_209] : memref<2x8x128xf32, #tpu.memory_space<vmem>>, vector<2x1x128xf32>
    %419 = vector.shape_cast %418 : vector<2x1x128xf32> to vector<2x128xf32>
    %420 = arith.truncf %414 : vector<2x32xf32> to vector<2x32xbf16>
    %cst_210 = arith.constant dense<0.000000e+00> : vector<2x128xf32>
    %421 = tpu.matmul %420, %270, %cst_210 {dimension_numbers = #tpu.dot_dimension_numbers<[1], [0], [0], [1], [0, 0, 1, 1], [], []>} : vector<2x32xbf16>, vector<32x128xbf16>, vector<2x128xf32> -> vector<2x128xf32>
    %422 = arith.addf %419, %421 : vector<2x128xf32>
    %423 = vector.extract_strided_slice %422 {offsets = [0, 0], sizes = [2, 96], strides = [1, 1]} : vector<2x128xf32> to vector<2x96xf32>
    %424 = arith.negf %423 : vector<2x96xf32>
    %425 = math.exp %424 : vector<2x96xf32>
    %cst_211 = arith.constant 1.000000e+00 : f32
    %426 = vector.broadcast %cst_211 : f32 to vector<2x96xf32>
    %427 = arith.addf %426, %425 : vector<2x96xf32>
    %428 = arith.divf %426, %427 : vector<2x96xf32>
    %429 = vector.extract_strided_slice %422 {offsets = [0, 96], sizes = [2, 32], strides = [1, 1]} : vector<2x128xf32> to vector<2x32xf32>
    %430 = math.tanh %429 : vector<2x32xf32>
    %431 = vector.extract_strided_slice %428 {offsets = [0, 0], sizes = [2, 32], strides = [1, 1]} : vector<2x96xf32> to vector<2x32xf32>
    %432 = vector.extract_strided_slice %428 {offsets = [0, 32], sizes = [2, 32], strides = [1, 1]} : vector<2x96xf32> to vector<2x32xf32>
    %433 = vector.extract_strided_slice %428 {offsets = [0, 64], sizes = [2, 32], strides = [1, 1]} : vector<2x96xf32> to vector<2x32xf32>
    %434 = arith.mulf %432, %412 : vector<2x32xf32>
    %435 = arith.mulf %431, %430 : vector<2x32xf32>
    %436 = arith.addf %434, %435 : vector<2x32xf32>
    %437 = math.tanh %436 : vector<2x32xf32>
    %438 = arith.mulf %433, %437 : vector<2x32xf32>
    %c0_212 = arith.constant 0 : index
    %c3_213 = arith.constant 3 : index
    %c0_214 = arith.constant 0 : index
    %439 = vector.load %arg8[%c0_212, %c3_213, %c0_214] : memref<2x8x32xf32, #tpu.memory_space<vmem>>, vector<2x1x32xf32>
    %440 = vector.shape_cast %439 : vector<2x1x32xf32> to vector<2x32xf32>
    %441 = vector.shape_cast %438 : vector<2x32xf32> to vector<2x1x32xf32>
    tpu.vector_store %arg8[%c0_212, %c3_213, %c0_214], %441 {strides = array<i32>} : memref<2x8x32xf32, #tpu.memory_space<vmem>>, vector<2x1x32xf32>,
    %c0_215 = arith.constant 0 : index
    %c4_216 = arith.constant 4 : index
    %c0_217 = arith.constant 0 : index
    %442 = vector.load %arg11[%c0_215, %c4_216, %c0_217] : memref<2x8x128xf32, #tpu.memory_space<vmem>>, vector<2x1x128xf32>
    %443 = vector.shape_cast %442 : vector<2x1x128xf32> to vector<2x128xf32>
    %444 = arith.truncf %438 : vector<2x32xf32> to vector<2x32xbf16>
    %cst_218 = arith.constant dense<0.000000e+00> : vector<2x128xf32>
    %445 = tpu.matmul %444, %270, %cst_218 {dimension_numbers = #tpu.dot_dimension_numbers<[1], [0], [0], [1], [0, 0, 1, 1], [], []>} : vector<2x32xbf16>, vector<32x128xbf16>, vector<2x128xf32> -> vector<2x128xf32>
    %446 = arith.addf %443, %445 : vector<2x128xf32>
    %447 = vector.extract_strided_slice %446 {offsets = [0, 0], sizes = [2, 96], strides = [1, 1]} : vector<2x128xf32> to vector<2x96xf32>
    %448 = arith.negf %447 : vector<2x96xf32>
    %449 = math.exp %448 : vector<2x96xf32>
    %cst_219 = arith.constant 1.000000e+00 : f32
    %450 = vector.broadcast %cst_219 : f32 to vector<2x96xf32>
    %451 = arith.addf %450, %449 : vector<2x96xf32>
    %452 = arith.divf %450, %451 : vector<2x96xf32>
    %453 = vector.extract_strided_slice %446 {offsets = [0, 96], sizes = [2, 32], strides = [1, 1]} : vector<2x128xf32> to vector<2x32xf32>
    %454 = math.tanh %453 : vector<2x32xf32>
    %455 = vector.extract_strided_slice %452 {offsets = [0, 0], sizes = [2, 32], strides = [1, 1]} : vector<2x96xf32> to vector<2x32xf32>
    %456 = vector.extract_strided_slice %452 {offsets = [0, 32], sizes = [2, 32], strides = [1, 1]} : vector<2x96xf32> to vector<2x32xf32>
    %457 = vector.extract_strided_slice %452 {offsets = [0, 64], sizes = [2, 32], strides = [1, 1]} : vector<2x96xf32> to vector<2x32xf32>
    %458 = arith.mulf %456, %436 : vector<2x32xf32>
    %459 = arith.mulf %455, %454 : vector<2x32xf32>
    %460 = arith.addf %458, %459 : vector<2x32xf32>
    %461 = math.tanh %460 : vector<2x32xf32>
    %462 = arith.mulf %457, %461 : vector<2x32xf32>
    %c0_220 = arith.constant 0 : index
    %c4_221 = arith.constant 4 : index
    %c0_222 = arith.constant 0 : index
    %463 = vector.load %arg8[%c0_220, %c4_221, %c0_222] : memref<2x8x32xf32, #tpu.memory_space<vmem>>, vector<2x1x32xf32>
    %464 = vector.shape_cast %463 : vector<2x1x32xf32> to vector<2x32xf32>
    %465 = vector.shape_cast %462 : vector<2x32xf32> to vector<2x1x32xf32>
    tpu.vector_store %arg8[%c0_220, %c4_221, %c0_222], %465 {strides = array<i32>} : memref<2x8x32xf32, #tpu.memory_space<vmem>>, vector<2x1x32xf32>,
    %c0_223 = arith.constant 0 : index
    %c5_224 = arith.constant 5 : index
    %c0_225 = arith.constant 0 : index
    %466 = vector.load %arg11[%c0_223, %c5_224, %c0_225] : memref<2x8x128xf32, #tpu.memory_space<vmem>>, vector<2x1x128xf32>
    %467 = vector.shape_cast %466 : vector<2x1x128xf32> to vector<2x128xf32>
    %468 = arith.truncf %462 : vector<2x32xf32> to vector<2x32xbf16>
    %cst_226 = arith.constant dense<0.000000e+00> : vector<2x128xf32>
    %469 = tpu.matmul %468, %270, %cst_226 {dimension_numbers = #tpu.dot_dimension_numbers<[1], [0], [0], [1], [0, 0, 1, 1], [], []>} : vector<2x32xbf16>, vector<32x128xbf16>, vector<2x128xf32> -> vector<2x128xf32>
    %470 = arith.addf %467, %469 : vector<2x128xf32>
    %471 = vector.extract_strided_slice %470 {offsets = [0, 0], sizes = [2, 96], strides = [1, 1]} : vector<2x128xf32> to vector<2x96xf32>
    %472 = arith.negf %471 : vector<2x96xf32>
    %473 = math.exp %472 : vector<2x96xf32>
    %cst_227 = arith.constant 1.000000e+00 : f32
    %474 = vector.broadcast %cst_227 : f32 to vector<2x96xf32>
    %475 = arith.addf %474, %473 : vector<2x96xf32>
    %476 = arith.divf %474, %475 : vector<2x96xf32>
    %477 = vector.extract_strided_slice %470 {offsets = [0, 96], sizes = [2, 32], strides = [1, 1]} : vector<2x128xf32> to vector<2x32xf32>
    %478 = math.tanh %477 : vector<2x32xf32>
    %479 = vector.extract_strided_slice %476 {offsets = [0, 0], sizes = [2, 32], strides = [1, 1]} : vector<2x96xf32> to vector<2x32xf32>
    %480 = vector.extract_strided_slice %476 {offsets = [0, 32], sizes = [2, 32], strides = [1, 1]} : vector<2x96xf32> to vector<2x32xf32>
    %481 = vector.extract_strided_slice %476 {offsets = [0, 64], sizes = [2, 32], strides = [1, 1]} : vector<2x96xf32> to vector<2x32xf32>
    %482 = arith.mulf %480, %460 : vector<2x32xf32>
    %483 = arith.mulf %479, %478 : vector<2x32xf32>
    %484 = arith.addf %482, %483 : vector<2x32xf32>
    %485 = math.tanh %484 : vector<2x32xf32>
    %486 = arith.mulf %481, %485 : vector<2x32xf32>
    %c0_228 = arith.constant 0 : index
    %c5_229 = arith.constant 5 : index
    %c0_230 = arith.constant 0 : index
    %487 = vector.load %arg8[%c0_228, %c5_229, %c0_230] : memref<2x8x32xf32, #tpu.memory_space<vmem>>, vector<2x1x32xf32>
    %488 = vector.shape_cast %487 : vector<2x1x32xf32> to vector<2x32xf32>
    %489 = vector.shape_cast %486 : vector<2x32xf32> to vector<2x1x32xf32>
    tpu.vector_store %arg8[%c0_228, %c5_229, %c0_230], %489 {strides = array<i32>} : memref<2x8x32xf32, #tpu.memory_space<vmem>>, vector<2x1x32xf32>,
    %c0_231 = arith.constant 0 : index
    %c6_232 = arith.constant 6 : index
    %c0_233 = arith.constant 0 : index
    %490 = vector.load %arg11[%c0_231, %c6_232, %c0_233] : memref<2x8x128xf32, #tpu.memory_space<vmem>>, vector<2x1x128xf32>
    %491 = vector.shape_cast %490 : vector<2x1x128xf32> to vector<2x128xf32>
    %492 = arith.truncf %486 : vector<2x32xf32> to vector<2x32xbf16>
    %cst_234 = arith.constant dense<0.000000e+00> : vector<2x128xf32>
    %493 = tpu.matmul %492, %270, %cst_234 {dimension_numbers = #tpu.dot_dimension_numbers<[1], [0], [0], [1], [0, 0, 1, 1], [], []>} : vector<2x32xbf16>, vector<32x128xbf16>, vector<2x128xf32> -> vector<2x128xf32>
    %494 = arith.addf %491, %493 : vector<2x128xf32>
    %495 = vector.extract_strided_slice %494 {offsets = [0, 0], sizes = [2, 96], strides = [1, 1]} : vector<2x128xf32> to vector<2x96xf32>
    %496 = arith.negf %495 : vector<2x96xf32>
    %497 = math.exp %496 : vector<2x96xf32>
    %cst_235 = arith.constant 1.000000e+00 : f32
    %498 = vector.broadcast %cst_235 : f32 to vector<2x96xf32>
    %499 = arith.addf %498, %497 : vector<2x96xf32>
    %500 = arith.divf %498, %499 : vector<2x96xf32>
    %501 = vector.extract_strided_slice %494 {offsets = [0, 96], sizes = [2, 32], strides = [1, 1]} : vector<2x128xf32> to vector<2x32xf32>
    %502 = math.tanh %501 : vector<2x32xf32>
    %503 = vector.extract_strided_slice %500 {offsets = [0, 0], sizes = [2, 32], strides = [1, 1]} : vector<2x96xf32> to vector<2x32xf32>
    %504 = vector.extract_strided_slice %500 {offsets = [0, 32], sizes = [2, 32], strides = [1, 1]} : vector<2x96xf32> to vector<2x32xf32>
    %505 = vector.extract_strided_slice %500 {offsets = [0, 64], sizes = [2, 32], strides = [1, 1]} : vector<2x96xf32> to vector<2x32xf32>
    %506 = arith.mulf %504, %484 : vector<2x32xf32>
    %507 = arith.mulf %503, %502 : vector<2x32xf32>
    %508 = arith.addf %506, %507 : vector<2x32xf32>
    %509 = math.tanh %508 : vector<2x32xf32>
    %510 = arith.mulf %505, %509 : vector<2x32xf32>
    %c0_236 = arith.constant 0 : index
    %c6_237 = arith.constant 6 : index
    %c0_238 = arith.constant 0 : index
    %511 = vector.load %arg8[%c0_236, %c6_237, %c0_238] : memref<2x8x32xf32, #tpu.memory_space<vmem>>, vector<2x1x32xf32>
    %512 = vector.shape_cast %511 : vector<2x1x32xf32> to vector<2x32xf32>
    %513 = vector.shape_cast %510 : vector<2x32xf32> to vector<2x1x32xf32>
    tpu.vector_store %arg8[%c0_236, %c6_237, %c0_238], %513 {strides = array<i32>} : memref<2x8x32xf32, #tpu.memory_space<vmem>>, vector<2x1x32xf32>,
    %c0_239 = arith.constant 0 : index
    %c7_240 = arith.constant 7 : index
    %c0_241 = arith.constant 0 : index
    %514 = vector.load %arg11[%c0_239, %c7_240, %c0_241] : memref<2x8x128xf32, #tpu.memory_space<vmem>>, vector<2x1x128xf32>
    %515 = vector.shape_cast %514 : vector<2x1x128xf32> to vector<2x128xf32>
    %516 = arith.truncf %510 : vector<2x32xf32> to vector<2x32xbf16>
    %cst_242 = arith.constant dense<0.000000e+00> : vector<2x128xf32>
    %517 = tpu.matmul %516, %270, %cst_242 {dimension_numbers = #tpu.dot_dimension_numbers<[1], [0], [0], [1], [0, 0, 1, 1], [], []>} : vector<2x32xbf16>, vector<32x128xbf16>, vector<2x128xf32> -> vector<2x128xf32>
    %518 = arith.addf %515, %517 : vector<2x128xf32>
    %519 = vector.extract_strided_slice %518 {offsets = [0, 0], sizes = [2, 96], strides = [1, 1]} : vector<2x128xf32> to vector<2x96xf32>
    %520 = arith.negf %519 : vector<2x96xf32>
    %521 = math.exp %520 : vector<2x96xf32>
    %cst_243 = arith.constant 1.000000e+00 : f32
    %522 = vector.broadcast %cst_243 : f32 to vector<2x96xf32>
    %523 = arith.addf %522, %521 : vector<2x96xf32>
    %524 = arith.divf %522, %523 : vector<2x96xf32>
    %525 = vector.extract_strided_slice %518 {offsets = [0, 96], sizes = [2, 32], strides = [1, 1]} : vector<2x128xf32> to vector<2x32xf32>
    %526 = math.tanh %525 : vector<2x32xf32>
    %527 = vector.extract_strided_slice %524 {offsets = [0, 0], sizes = [2, 32], strides = [1, 1]} : vector<2x96xf32> to vector<2x32xf32>
    %528 = vector.extract_strided_slice %524 {offsets = [0, 32], sizes = [2, 32], strides = [1, 1]} : vector<2x96xf32> to vector<2x32xf32>
    %529 = vector.extract_strided_slice %524 {offsets = [0, 64], sizes = [2, 32], strides = [1, 1]} : vector<2x96xf32> to vector<2x32xf32>
    %530 = arith.mulf %528, %508 : vector<2x32xf32>
    %531 = arith.mulf %527, %526 : vector<2x32xf32>
    %532 = arith.addf %530, %531 : vector<2x32xf32>
    %533 = math.tanh %532 : vector<2x32xf32>
    %534 = arith.mulf %529, %533 : vector<2x32xf32>
    %c0_244 = arith.constant 0 : index
    %c7_245 = arith.constant 7 : index
    %c0_246 = arith.constant 0 : index
    %535 = vector.load %arg8[%c0_244, %c7_245, %c0_246] : memref<2x8x32xf32, #tpu.memory_space<vmem>>, vector<2x1x32xf32>
    %536 = vector.shape_cast %535 : vector<2x1x32xf32> to vector<2x32xf32>
    %537 = vector.shape_cast %534 : vector<2x32xf32> to vector<2x1x32xf32>
    tpu.vector_store %arg8[%c0_244, %c7_245, %c0_246], %537 {strides = array<i32>} : memref<2x8x32xf32, #tpu.memory_space<vmem>>, vector<2x1x32xf32>,
    %c0_247 = arith.constant 0 : index
    %c0_248 = arith.constant 0 : index
    %538 = vector.load %arg9[%c0_247, %c0_248] : memref<2x32xf32, #tpu.memory_space<vmem>>, vector<2x32xf32>
    tpu.vector_store %arg9[%c0_247, %c0_248], %534 {strides = array<i32>} : memref<2x32xf32, #tpu.memory_space<vmem>>, vector<2x32xf32>,
    return
  }
  func.func @transform_0(%arg0: i32) -> (i32, i32, i32) {
    %c0_i32 = arith.constant 0 : i32
    %c0_i32_0 = arith.constant 0 : i32
    %c0_i32_1 = arith.constant 0 : i32
    return %arg0, %c0_i32, %c0_i32_0 : i32, i32, i32
  }
  func.func @transform_1(%arg0: i32) -> (i32, i32) {
    %c0_i32 = arith.constant 0 : i32
    %c0_i32_0 = arith.constant 0 : i32
    %c0_i32_1 = arith.constant 0 : i32
    return %c0_i32, %c0_i32_0 : i32, i32
  }
  func.func @transform_2(%arg0: i32) -> (i32, i32) {
    %c0_i32 = arith.constant 0 : i32
    %c0_i32_0 = arith.constant 0 : i32
    %c0_i32_1 = arith.constant 0 : i32
    return %c0_i32, %c0_i32_0 : i32, i32
  }
  func.func @transform_3(%arg0: i32) -> (i32, i32) {
    %c0_i32 = arith.constant 0 : i32
    %c0_i32_0 = arith.constant 0 : i32
    %c0_i32_1 = arith.constant 0 : i32
    return %c0_i32, %c0_i32_0 : i32, i32
  }
  func.func @transform_4(%arg0: i32) -> (i32, i32) {
    %c0_i32 = arith.constant 0 : i32
    %c0_i32_0 = arith.constant 0 : i32
    %c0_i32_1 = arith.constant 0 : i32
    return %c0_i32, %c0_i32_0 : i32, i32
  }
  func.func @transform_5(%arg0: i32) -> (i32, i32) {
    %c0_i32 = arith.constant 0 : i32
    %c0_i32_0 = arith.constant 0 : i32
    %c0_i32_1 = arith.constant 0 : i32
    return %c0_i32, %c0_i32_0 : i32, i32
  }
  func.func @transform_6(%arg0: i32) -> (i32, i32) {
    %c0_i32 = arith.constant 0 : i32
    %c0_i32_0 = arith.constant 0 : i32
    %c0_i32_1 = arith.constant 0 : i32
    return %c0_i32, %c0_i32_0 : i32, i32
  }
  func.func @transform_7(%arg0: i32) -> (i32, i32, i32) {
    %c0_i32 = arith.constant 0 : i32
    %c0_i32_0 = arith.constant 0 : i32
    %c0_i32_1 = arith.constant 0 : i32
    return %arg0, %c0_i32, %c0_i32_0 : i32, i32, i32
  }
  func.func @transform_8(%arg0: i32) -> (i32, i32) {
    %c0_i32 = arith.constant 0 : i32
    %c0_i32_0 = arith.constant 0 : i32
    return %arg0, %c0_i32 : i32, i32
  }
}

</mosaic_0001>

<bundles_post_ra>
// kernel: conv_lstm.1
= control target key start
LH: loop header
LB: loop body
LE: loop exit
PB: predicated region body
PF: predicated region fallthrough
CT: control target
= control target key end

     0   :  { %14 = vsyncpa [#allocation5], 0  ;;  %vm59_vm0 = vcmask 1041408   ;;  %v4082_v1 = vmov 0.0   ;;  %vm4083_vm1 = vmmov 0   ;;  %vm52_vm2 = vcmask 1041409   ;;  %s4882_s0 = inlined_call_operand.vmem [shape: f32[2,8,4], index: 0, kind: input, shape index: {}]   ;;  %s4883_s1 = inlined_call_operand.vmem [shape: bf16[4,128], index: 1, kind: input, shape index: {}]   ;;  %s4884_s2 = inlined_call_operand.vmem [shape: bf16[32,128], index: 2, kind: input, shape index: {}]   ;;  %s4885_s3 = inlined_call_operand.vmem [shape: f32[1,128], index: 3, kind: input, shape index: {}]   ;;  %s4886_s4 = inlined_call_operand.vmem [shape: bf16[32,128], index: 4, kind: input, shape index: {}]   ;;  %s4887_s5 = inlined_call_operand.vmem [shape: bf16[32,128], index: 5, kind: input, shape index: {}]   ;;  %s4888_s6 = inlined_call_operand.vmem [shape: f32[1,128], index: 6, kind: input, shape index: {}]   ;;  %s4889_s7 = inlined_call_operand.hbm [shape: f32[2,8,32], index: 7, kind: output, shape index: {0}]   ;;  %s4890_s8 = inlined_call_operand.hbm [shape: f32[2,32], index: 8, kind: output, shape index: {1}]  }
   0x1   :  { %v31_v0 = vld [vmem:[%s4883_s1] sm:$0x3]  ;;  %3520 = vmatprep.subr.bf16.mxu0 %v4082_v1  ;;  %3522 = vmatprep.mubr.msk.bf16.mxu0 %vm4083_vm1, %v4082_v1  ;;  %v38_v4 = vld [vmem:[%s4882_s0 + $0x8] sm:$0x1]  ;;  %v211_v7 = vld [vmem:[%s4882_s0 + $0x2] sm:$0x1] }
   0x2   :  { %v4141_v2 = vsel %vm59_vm0, %v31_v0, 0  ;;  %v37_v3 = vld [vmem:[%s4882_s0] sm:$0x1]  ;;  %v40_v6 = vpack.c.bf16 %v38_v4, %v38_v4  ;;  %v212_v8 = vld [vmem:[%s4882_s0 + $0xa] sm:$0x1]  ;;  %3526 = vmatprep.subr.bf16.mxu1 %v4082_v1  ;;  %v213_v12 = vpack.c.bf16 %v211_v7, %v211_v7  ;;  %3528 = vmatprep.mubr.msk.bf16.mxu1 %vm4083_vm1, %v4082_v1  ;;  %vm55_vm3 = vcmask 31744  }
   0x3   :  { %3521 = vmatpush3.bf16.msra.mxu0 %v4141_v2  ;;  %v39_v5 = vpack.c.bf16 %v37_v3, %v37_v3  ;;  %v214_v9 = vpack.c.bf16 %v212_v8, %v212_v8  ;;  %3527 = vmatpush3.bf16.msra.mxu1 %v4141_v2  ;;  %v374_v14 = vld [vmem:[%s4882_s0 + $0xc] sm:$0x1]  ;;  %v373_v21 = vld [vmem:[%s4882_s0 + $0x4] sm:$0x1] }
   0x4   :  { %3532 = vmatprep.subr.bf16.mxu0 %v4082_v1  ;;  %v50_v11 = vunpack.c.l.b16 %v40_v6  ;;  %3538 = vmatprep.subr.bf16.mxu1 %v4082_v1  ;;  %v217_v17 = vunpack.c.l.b16 %v213_v12  ;;  %v376_v19 = vpack.c.bf16 %v374_v14, %v374_v14 }
   0x5   :  { %v49_v10 = vunpack.c.l.b16 %v39_v5  ;;  %v218_v13 = vunpack.c.l.b16 %v214_v9 }
   0x6   :  { %v51_v15 = vrot.slane %v50_v11, 7 }
   0x7   :  { %v219_v18 = vrot.slane %v218_v13, 7 }
   0x8   :  { %v53_v16 = vsel %vm52_vm2, %v51_v15, %v49_v10 }
   0x9   :  { %v54_v20 = vpack.c.b16 %v53_v16, %v53_v16 }
   0xa   :  { %15 = vsyncpa [#allocation7], 0  ;;  %v220_v22 = vsel %vm52_vm2, %v219_v18, %v217_v17  ;;  %v375_v23 = vpack.c.bf16 %v373_v21, %v373_v21  ;;  %v380_v24 = vunpack.c.l.b16 %v376_v19  ;;  %v536_v25 = vld [vmem:[%s4882_s0 + $0xe] sm:$0x1]  ;;  %v535_v30 = vld [vmem:[%s4882_s0 + $0x6] sm:$0x1]  ;;  %v107_v44 = vlaneseq }
   0xb   :  { %3523 = vmatmul.mubr.msk.bf16.vlgmr.msra.gmra.mrb[0].mxu0 %vm55_vm3, %v54_v20  ;;  %v221_v26 = vpack.c.b16 %v220_v22, %v220_v22  ;;  %v538_v29 = vpack.c.bf16 %v536_v25, %v536_v25  ;;  %v537_v32 = vpack.c.bf16 %v535_v30, %v535_v30  ;;  %v4198_v39 = vld [vmem:[%s4884_s2] sm:$0xff]   ;;  %v4205_v40 = vld [vmem:[%s4884_s2 + $0x8] sm:$0xff]   ;;  %v4084_v41 = vmov 0   ;;  %s4089_s9 = smov [#allocation6]  }
   0xc   :  { %3533 = vmatpush3.bf16.msra.mxu0 %v4141_v2  ;;  %3534 = vmatprep.mubr.msk.bf16.mxu0 %vm4083_vm1, %v4082_v1  ;;  %v379_v27 = vunpack.c.l.b16 %v375_v23  ;;  %v381_v28 = vrot.slane %v380_v24, 7  ;;  %v4085_v42 = vmov 1966171168   ;;  %v108_v46 = vshrl.u32 %v107_v44, 7  ;;  %v4222_v47 = vld [vmem:[%s4885_s3] ss:$0 sm:$0xff] }
   0xd   :  { %3544 = vmatprep.subr.bf16.mxu0 %v4082_v1  ;;  %v542_v33 = vunpack.c.l.b16 %v538_v29  ;;  %v541_v35 = vunpack.c.l.b16 %v537_v32  ;;  %v105_v43 = vunpack.c.l.s4 %v4085_v42  ;;  %s4086_s3 = smov 32   ;;  %vm711_vm4 = vcmask 261120   ;;  %s3318_s10 = sshll.u32 %s4089_s9, 4  ;;  %s4850_s10 = int_to_ptr.vmem [resolvable:$true] %s3318_s10 }
   0xe   :  { %v382_v31 = vsel %vm52_vm2, %v381_v28, %v379_v27  ;;  %vm817_vm5 = vcmask 253952   ;;  %vm3298_vm6 = vcmask 254976  }
   0xf   :  { %v383_v34 = vpack.c.b16 %v382_v31, %v382_v31  ;;  %v543_v36 = vrot.slane %v542_v33, 7  ;;  %v106_v45 = vunpack.c.0.s8 %v105_v43 }
  0x11   :  { %v544_v37 = vsel %vm52_vm2, %v543_v36, %v541_v35  ;;  %v4224_v48 = vsub.s32 %v106_v45, %v108_v46 }
  0x12   :  { %v545_v38 = vpack.c.b16 %v544_v37, %v544_v37 }
  0x13   :  { %3535 = vmatmul.mubr.msk.bf16.vlgmr.msra.gmra.mrb[4].mxu0 %vm55_vm3, %v221_v26 }
  0x14   :  { %3545 = vmatpush3.bf16.msra.mxu0 %v4141_v2  ;;  %3546 = vmatprep.mubr.msk.bf16.mxu0 %vm4083_vm1, %v4082_v1 }
  0x15   :  { %3556 = vmatprep.subr.bf16.mxu0 %v4082_v1 }
  0x1b   :  { %3547 = vmatmul.mubr.msk.bf16.vlgmr.msra.gmra.mrb[8].mxu0 %vm55_vm3, %v383_v34 }
  0x1c   :  { %3557 = vmatpush3.bf16.msra.mxu0 %v4141_v2  ;;  %3558 = vmatprep.mubr.msk.bf16.mxu0 %vm4083_vm1, %v4082_v1 }
  0x1d   :  { %3568 = vmatprep.subr.bf16.mxu0 %v4082_v1 }
  0x23   :  { %3559 = vmatmul.mubr.msk.bf16.vlgmr.msra.gmra.mrb[12].mxu0 %vm55_vm3, %v545_v38 }
  0x24   :  { %3569 = vmatpush3.bf16.msra.mxu0 %v4198_v39  ;;  %3572 = vmatprep.mubr.msk.bf16.mxu0 %vm4083_vm1, %v4082_v1 }
  0x25   :  { %3570 = vmatprep.subr.bf16.mxu0 %v4082_v1 }
  0x28   :  { %3571 = vmatpush3.bf16.msra.mxu0 %v4205_v40 }
  0x29   :  { %3584 = vmatprep.subr.bf16.mxu0 %v4082_v1 }
  0x2b   :  { %3573 = vmatmul.mubr.bf16.vlgmr.msra.gmra.mrb[16].mxu0 %v4084_v41 }
  0x2c   :  { %3585 = vmatpush3.bf16.msra.mxu0 %v4198_v39  ;;  %3588 = vmatprep.mubr.msk.bf16.mxu0 %vm4083_vm1, %v4082_v1 }
  0x2d   :  { %3586 = vmatprep.subr.bf16.mxu0 %v4082_v1 }
  0x30   :  { %3587 = vmatpush3.bf16.msra.mxu0 %v4205_v40 }
  0x31   :  { %3600 = vmatprep.subr.bf16.mxu0 %v4082_v1 }
  0xde   :  { %v97_v49 = vpop.f32.mrb[0].mxu0 }
  0xdf   :  { %v98_v50 = vadd.f32 %v4222_v47, %v97_v49  ;;  %v3524_v51 = vpop.f32.mrb[1].mxu0 }
  0xe0   :  { %v100_v52 = vpop.f32.mrb[2].mxu0  ;;  %v131_v51 = vld [vmem:[%s4882_s0 + $0x9] sm:$0x1] }
  0xe1   :  { %v110_v53 = vrot.slane %v98_v50, %v4224_v48  ;;  %v3525_v54 = vpop.f32.mrb[3].mxu0  ;;  %v130_v50 = vld [vmem:[%s4882_s0 + $0x1] sm:$0x1]  ;;  %v292_v52 = vld [vmem:[%s4882_s0 + $0x3] sm:$0x1] }
  0xe2   :  { %v133_v54 = vpack.c.bf16 %v131_v51, %v131_v51 }
  0xe3   :  { %v111_v55 = vcombine.high %v110_v53, %v110_v53  ;;  %3332 = vst.sshfl [vmem:[#allocation3] sm:$0x1 pattern:$0x73625140] %v110_v53  ;;  %v132_v53 = vpack.c.bf16 %v130_v50, %v130_v50 }
  0xe5   :  { %3333 = vst.sshfl [vmem:[#allocation3 + $0x8] sm:$0x1 pattern:$0x73625140] %v111_v55  ;;  %v293_v55 = vld [vmem:[%s4882_s0 + $0xb] sm:$0x1] }
  0xe6   :  { %v259_v56 = vpop.f32.mrb[4].mxu0 }
  0xe7   :  { %v260_v57 = vadd.f32 %v4222_v47, %v259_v56  ;;  %v3536_v58 = vpop.f32.mrb[5].mxu0  ;;  %v295_v56 = vpack.c.bf16 %v293_v55, %v293_v55 }
  0xe8   :  { %v262_v59 = vpop.f32.mrb[6].mxu0  ;;  %v136_v58 = vunpack.c.l.b16 %v132_v53 }
  0xe9   :  { %v272_v60 = vrot.slane %v260_v57, %v4224_v48  ;;  %v3537_v61 = vpop.f32.mrb[7].mxu0  ;;  %v137_v59 = vunpack.c.l.b16 %v133_v54 }
  0xea   :  { %v697_v22 = vld [vmem:[#allocation3] sm:$0x1]  ;;  %v299_v61 = vunpack.c.l.b16 %v295_v56 }
  0xeb   :  { %v273_v62 = vcombine.high %v272_v60, %v272_v60  ;;  %3338 = vst.sshfl [vmem:[#allocation3 + $0x2] sm:$0x1 pattern:$0x73625140] %v272_v60  ;;  %v294_v60 = vpack.c.bf16 %v292_v52, %v292_v52 }
  0xec   :  { %v698_v18 = vld [vmem:[#allocation3 + $0x8] sm:$0x1] }
  0xed   :  { %3339 = vst.sshfl [vmem:[#allocation3 + $0xa] sm:$0x1 pattern:$0x73625140] %v273_v62  ;;  %v455_v62 = vld [vmem:[%s4882_s0 + $0xd] sm:$0x1] }
  0xee   :  { %v421_v63 = vpop.f32.mrb[8].mxu0 }
  0xef   :  { %v422_v0 = vadd.f32 %v4222_v47, %v421_v63  ;;  %v3548_v3 = vpop.f32.mrb[9].mxu0  ;;  %v138_v63 = vrot.slane %v137_v59, 7 }
  0xf0   :  { %v424_v4 = vpop.f32.mrb[10].mxu0  ;;  %v298_v3 = vunpack.c.l.b16 %v294_v60 }
  0xf1   :  { %v434_v5 = vrot.slane %v422_v0, %v4224_v48  ;;  %v3549_v6 = vpop.f32.mrb[11].mxu0  ;;  %v139_v0 = vsel %vm52_vm2, %v138_v63, %v136_v58  ;;  %v300_v4 = vrot.slane %v299_v61, 7 }
  0xf2   :  { %v140_v6 = vpack.c.b16 %v139_v0, %v139_v0 }
  0xf3   :  { %v435_v7 = vcombine.high %v434_v5, %v434_v5  ;;  %3344 = vst.sshfl [vmem:[#allocation3 + $0x4] sm:$0x1 pattern:$0x73625140] %v434_v5  ;;  %v457_v5 = vpack.c.bf16 %v455_v62, %v455_v62 }
  0xf4   :  { %3529 = vmatmul.mubr.msk.bf16.vlgmr.msra.gmra.mrb[0].mxu1 %vm55_vm3, %v140_v6 }
  0xf5   :  { %3345 = vst.sshfl [vmem:[#allocation3 + $0xc] sm:$0x1 pattern:$0x73625140] %v435_v7  ;;  %v454_v7 = vld [vmem:[%s4882_s0 + $0x5] sm:$0x1]  ;;  %3539 = vmatpush3.bf16.msra.mxu1 %v4141_v2  ;;  %3540 = vmatprep.mubr.msk.bf16.mxu1 %vm4083_vm1, %v4082_v1 }
  0xf6   :  { %v583_v8 = vpop.f32.mrb[12].mxu0  ;;  %3550 = vmatprep.subr.bf16.mxu1 %v4082_v1 }
  0xf7   :  { %v584_v9 = vadd.f32 %v4222_v47, %v583_v8  ;;  %v3560_v10 = vpop.f32.mrb[13].mxu0  ;;  %v301_v8 = vsel %vm52_vm2, %v300_v4, %v298_v3 }
  0xf8   :  { %v586_v11 = vpop.f32.mrb[14].mxu0  ;;  %v461_v10 = vunpack.c.l.b16 %v457_v5 }
  0xf9   :  { %v596_v12 = vrot.slane %v584_v9, %v4224_v48  ;;  %v3561_v13 = vpop.f32.mrb[15].mxu0  ;;  %v456_v9 = vpack.c.bf16 %v454_v7, %v454_v7  ;;  %v617_v11 = vld [vmem:[%s4882_s0 + $0xf] sm:$0x1] }
  0xfb   :  { %v597_v14 = vcombine.high %v596_v12, %v596_v12  ;;  %3350 = vst.sshfl [vmem:[#allocation3 + $0x6] sm:$0x1 pattern:$0x73625140] %v596_v12  ;;  %v302_v12 = vpack.c.b16 %v301_v8, %v301_v8  ;;  %v460_v13 = vunpack.c.l.b16 %v456_v9 }
  0xfd   :  { %3351 = vst.sshfl [vmem:[#allocation3 + $0xe] sm:$0x1 pattern:$0x73625140] %v597_v14  ;;  %v462_v14 = vrot.slane %v461_v10, 7  ;;  %3541 = vmatmul.mubr.msk.bf16.vlgmr.msra.gmra.mrb[4].mxu1 %vm55_vm3, %v302_v12 }
  0xfe   :  { %v749_v15 = vpop.f32.mrb[16].mxu0  ;;  %3551 = vmatpush3.bf16.msra.mxu1 %v4141_v2  ;;  %3552 = vmatprep.mubr.msk.bf16.mxu1 %vm4083_vm1, %v4082_v1 }
  0xff   :  { %v756_v16 = vrot.slane %v749_v15, 1  ;;  %v3574_v17 = vpop.f32.mrb[17].mxu0  ;;  %v759_v23 = vadd.f32 %v749_v15, %v697_v22  ;;  %v619_v15 = vpack.c.bf16 %v617_v11, %v617_v11  ;;  %3562 = vmatprep.subr.bf16.mxu1 %v4082_v1 }
 0x100   :  { %v752_v19 = vpop.f32.mrb[18].mxu0  ;;  %v463_v17 = vsel %vm52_vm2, %v462_v14, %v460_v13 }
 0x101   :  { %v760_v20 = vadd.f32 %v756_v16, %v698_v18  ;;  %v3575_v21 = vpop.f32.mrb[19].mxu0  ;;  %v3357_v27 = vmul.f32 -1.442695, %v759_v23  ;;  %v616_v16 = vld [vmem:[%s4882_s0 + $0x7] sm:$0x1]  ;;  %v623_v19 = vunpack.c.l.b16 %v619_v15  ;;  %s4087_s0 = smov 64  }
 0x102   :  { %v618_v18 = vpack.c.bf16 %v616_v16, %v616_v16 }
 0x103   :  { %3776 = vtanh.f32 %v760_v20  ;;  %v3358_v26 = vmul.f32 -1.442695, %v760_v20  ;;  %v464_v20 = vpack.c.b16 %v463_v17, %v463_v17  ;;  %v624_v22 = vrot.slane %v623_v19, 7 }
 0x104   :  { %3778 = vtanh.f32 %v759_v23  ;;  %v622_v21 = vunpack.c.l.b16 %v618_v18 }
 0x105   :  { %3780 = vpow2.f32 %v3358_v26  ;;  %3553 = vmatmul.mubr.msk.bf16.vlgmr.msra.gmra.mrb[8].mxu1 %vm55_vm3, %v464_v20 }
 0x106   :  { %3782 = vpow2.f32 %v3357_v27  ;;  %3563 = vmatpush3.bf16.msra.mxu1 %v4141_v2  ;;  %3564 = vmatprep.mubr.msk.bf16.mxu1 %vm4083_vm1, %v4082_v1  ;;  %v625_v23 = vsel %vm52_vm2, %v624_v22, %v622_v21 }
 0x107   :  { %3576 = vmatprep.subr.bf16.mxu1 %v4082_v1 }
 0x10d   :  { %v3777_v24 = vpop.eup %3776 }
 0x10e   :  { %781 = vrot.lane.b32.xlu0 %v3777_v24, %s4086_s3  ;;  %v3779_v25 = vpop.eup %3778  ;;  %v626_v24 = vpack.c.b16 %v625_v23, %v625_v23 }
 0x10f   :  { %v3781_v28 = vpop.eup %3780 }
 0x110   :  { %v768_v29 = vadd.f32 1.0, %v3781_v28  ;;  %v3783_v30 = vpop.eup %3782  ;;  %3565 = vmatmul.mubr.msk.bf16.vlgmr.msra.gmra.mrb[12].mxu1 %vm55_vm3, %v626_v24 }
 0x111   :  { %v767_v31 = vadd.f32 1.0, %v3783_v30  ;;  %3577 = vmatpush3.bf16.msra.mxu1 %v4198_v39  ;;  %3580 = vmatprep.mubr.msk.bf16.mxu1 %vm4083_vm1, %v4082_v1 }
 0x112   :  { %779 = vrot.lane.b32.xlu0 %v3779_v25, %s4086_s3  ;;  %3784 = vrcp.f32 %v768_v29  ;;  %3578 = vmatprep.subr.bf16.mxu1 %v4082_v1 }
 0x113   :  { %3786 = vrcp.f32 %v767_v31 }
 0x115   :  { %3579 = vmatpush3.bf16.msra.mxu1 %v4205_v40 }
 0x116   :  { %3592 = vmatprep.subr.bf16.mxu1 %v4082_v1 }
 0x11c   :  { %v4236_v32 = vpop.eup %3784 }
 0x11d   :  { %v4240_v35 = vpop.eup %3786  ;;  %v776_v38 = vmul.f32 0.0, %v4236_v32 }
 0x11e   :  { %v775_v44 = vmul.f32 0.0, %v4240_v35 }
 0x180   :  { %v782_v33 = vpop.permute.xlu0 %781 }
 0x181   :  { %v786_v34 = vmul.f32 %v4236_v32, %v782_v33 }
 0x183   :  { %791 = vrot.lane.b32.xlu1 %v786_v34, %s4086_s3 }
 0x184   :  { %v780_v36 = vpop.permute.xlu0 %779 }
 0x185   :  { %v785_v37 = vmul.f32 %v4240_v35, %v780_v36 }
 0x187   :  { %789 = vrot.lane.b32.xlu1 %v785_v37, %s4086_s3 }
 0x1f5   :  { %v792_v42 = vpop.permute.xlu1 %791 }
 0x1f6   :  { %v4245_v43 = vadd.f32 %v792_v42, %v776_v38 }
 0x1f8   :  { %3788 = vtanh.f32 %v4245_v43 }
 0x1f9   :  { %v790_v45 = vpop.permute.xlu1 %789 }
 0x1fa   :  { %v4249_v46 = vadd.f32 %v790_v45, %v775_v44 }
 0x1fc   :  { %3790 = vtanh.f32 %v4249_v46 }
 0x202   :  { %v3789_v49 = vpop.eup %3788 }
 0x203   :  { %803 = vrot.lane.b32.xlu0 %v3789_v49, %s4086_s3 }
 0x206   :  { %v3791_v57 = vpop.eup %3790 }
 0x207   :  { %801 = vrot.lane.b32.xlu1 %v3791_v57, %s4086_s3 }
 0x275   :  { %v804_v2 = vpop.permute.xlu0 %803 }
 0x276   :  { %v4305_v25 = vmul.f32 %v4236_v32, %v804_v2  ;;  %v178_v32 = vpop.f32.mrb[0].mxu1 }
 0x277   :  { %v179_v37 = vadd.f32 %v4222_v47, %v178_v32  ;;  %v3530_v38 = vpop.f32.mrb[1].mxu1 }
 0x278   :  { %v823_v26 = vpack.c.bf16 %v4305_v25, %v4305_v25  ;;  %v181_v42 = vpop.f32.mrb[2].mxu1 }
 0x279   :  { %v802_v27 = vpop.permute.xlu1 %801  ;;  %v191_v44 = vrot.slane %v179_v37, %v4224_v48 }
 0x27a   :  { %v827_v28 = vunpack.c.l.b16 %v823_v26  ;;  %v4310_v29 = vmul.f32 %v4240_v35, %v802_v27  ;;  %v3531_v35 = vpop.f32.mrb[3].mxu1 }
 0x27b   :  { %v192_v45 = vcombine.high %v191_v44, %v191_v44  ;;  %3335 = vst.sshfl [vmem:[#allocation3 + $0x1] sm:$0x1 pattern:$0x73625140] %v191_v44  ;;  %v340_v49 = vpop.f32.mrb[4].mxu1 }
 0x27c   :  { %v822_v30 = vpack.c.bf16 %v4310_v29, %v4310_v29  ;;  %v828_v31 = vrot.slane %v827_v28, 7  ;;  %v341_v50 = vadd.f32 %v4222_v47, %v340_v49  ;;  %v3542_v51 = vpop.f32.mrb[5].mxu1 }
 0x27d   :  { %3336 = vst.sshfl [vmem:[#allocation3 + $0x9] sm:$0x1 pattern:$0x73625140] %v192_v45  ;;  %v343_v52 = vpop.f32.mrb[6].mxu1 }
 0x27e   :  { %v826_v33 = vunpack.c.l.b16 %v822_v30  ;;  %v353_v53 = vrot.slane %v341_v50, %v4224_v48  ;;  %v3543_v54 = vpop.f32.mrb[7].mxu1 }
 0x27f   :  { %v502_v56 = vpop.f32.mrb[8].mxu1 }
 0x280   :  { %v829_v34 = vsel %vm52_vm2, %v828_v31, %v826_v33  ;;  %v354_v55 = vcombine.high %v353_v53, %v353_v53  ;;  %3341 = vst.sshfl [vmem:[#allocation3 + $0x3] sm:$0x1 pattern:$0x73625140] %v353_v53  ;;  %v503_v57 = vadd.f32 %v4222_v47, %v502_v56  ;;  %v3554_v58 = vpop.f32.mrb[9].mxu1 }
 0x281   :  { %v830_v36 = vpack.c.b16 %v829_v34, %v829_v34  ;;  %v505_v59 = vpop.f32.mrb[10].mxu1 }
 0x282   :  { %3342 = vst.sshfl [vmem:[#allocation3 + $0xb] sm:$0x1 pattern:$0x73625140] %v354_v55  ;;  %v515_v60 = vrot.slane %v503_v57, %v4224_v48  ;;  %v3555_v61 = vpop.f32.mrb[11].mxu1 }
 0x283   :  { %831 = vrot.lane.b32.xlu0 %v830_v36, %s4087_s0  ;;  %v664_v0 = vpop.f32.mrb[12].mxu1  ;;  %v820_v9 = vld [vmem:[#allocation3 + $0x1] sm:$0x1]  ;;  %v940_v57 = vld [vmem:[#allocation3 + $0x2] sm:$0x1] }
 0x284   :  { %v516_v63 = vcombine.high %v515_v60, %v515_v60  ;;  %3347 = vst.sshfl [vmem:[#allocation3 + $0x5] sm:$0x1 pattern:$0x73625140] %v515_v60  ;;  %v665_v3 = vadd.f32 %v4222_v47, %v664_v0  ;;  %v3566_v4 = vpop.f32.mrb[13].mxu1 }
 0x285   :  { %v667_v5 = vpop.f32.mrb[14].mxu1  ;;  %v821_v14 = vld [vmem:[#allocation3 + $0x9] sm:$0x1] }
 0x286   :  { %3348 = vst.sshfl [vmem:[#allocation3 + $0xd] sm:$0x1 pattern:$0x73625140] %v516_v63  ;;  %v677_v6 = vrot.slane %v665_v3, %v4224_v48  ;;  %v3567_v7 = vpop.f32.mrb[15].mxu1 }
 0x288   :  { %v678_v8 = vcombine.high %v677_v6, %v677_v6  ;;  %3353 = vst.sshfl [vmem:[#allocation3 + $0x7] sm:$0x1 pattern:$0x73625140] %v677_v6 }
 0x28a   :  { %3354 = vst.sshfl [vmem:[#allocation3 + $0xf] sm:$0x1 pattern:$0x73625140] %v678_v8 }
 0x2f5   :  { %v832_v62 = vpop.permute.xlu0 %831 }
 0x2f6   :  { %3581 = vmatmul.mubr.msk.bf16.vlgmr.msra.gmra.mrb[16].mxu1 %vm711_vm4, %v832_v62  ;;  %v941_v62 = vld [vmem:[#allocation3 + $0xa] sm:$0x1] }
 0x2f7   :  { %3593 = vmatpush3.bf16.msra.mxu1 %v4198_v39  ;;  %3596 = vmatprep.mubr.msk.bf16.mxu1 %vm4083_vm1, %v4082_v1 }
 0x2f8   :  { %3594 = vmatprep.subr.bf16.mxu1 %v4082_v1 }
 0x2fb   :  { %3595 = vmatpush3.bf16.msra.mxu1 %v4205_v40 }
 0x2fc   :  { %3608 = vmatprep.subr.bf16.mxu1 %v4082_v1 }
 0x3c9   :  { %v870_v10 = vpop.f32.mrb[16].mxu1 }
 0x3ca   :  { %v877_v11 = vrot.slane %v870_v10, 1  ;;  %v880_v12 = vadd.f32 %v870_v10, %v820_v9  ;;  %v3582_v13 = vpop.f32.mrb[17].mxu1 }
 0x3cb   :  { %v873_v15 = vpop.f32.mrb[18].mxu1 }
 0x3cc   :  { %v881_v47 = vadd.f32 %v877_v11, %v821_v14  ;;  %3792 = vtanh.f32 %v880_v12  ;;  %v3583_v16 = vpop.f32.mrb[19].mxu1  ;;  %v3360_v19 = vmul.f32 -1.442695, %v880_v12 }
 0x3ce   :  { %3794 = vtanh.f32 %v881_v47  ;;  %v3361_v20 = vmul.f32 -1.442695, %v881_v47 }
 0x3cf   :  { %3796 = vpow2.f32 %v3360_v19 }
 0x3d0   :  { %3798 = vpow2.f32 %v3361_v20 }
 0x3d6   :  { %v3793_v17 = vpop.eup %3792 }
 0x3d7   :  { %900 = vrot.lane.b32.xlu0 %v3793_v17, %s4086_s3 }
 0x3d8   :  { %v3795_v18 = vpop.eup %3794 }
 0x3d9   :  { %902 = vrot.lane.b32.xlu1 %v3795_v18, %s4086_s3  ;;  %v3797_v21 = vpop.eup %3796 }
 0x3da   :  { %v3799_v22 = vpop.eup %3798  ;;  %v888_v23 = vadd.f32 1.0, %v3797_v21 }
 0x3db   :  { %v889_v24 = vadd.f32 1.0, %v3799_v22 }
 0x3dc   :  { %3800 = vrcp.f32 %v888_v23 }
 0x3dd   :  { %3802 = vrcp.f32 %v889_v24 }
 0x3e6   :  { %v3801_v2 = vpop.eup %3800 }
 0x3e7   :  { %v3803_v28 = vpop.eup %3802  ;;  %v896_v33 = vmul.f32 %v3801_v2, %v4249_v46 }
 0x3e8   :  { %v897_v32 = vmul.f32 %v3803_v28, %v4245_v43 }
 0x449   :  { %v901_v26 = vpop.permute.xlu0 %900 }
 0x44a   :  { %v906_v27 = vmul.f32 %v3801_v2, %v901_v26 }
 0x44b   :  { %v903_v30 = vpop.permute.xlu1 %902 }
 0x44c   :  { %910 = vrot.lane.b32.xlu0 %v906_v27, %s4086_s3  ;;  %v907_v31 = vmul.f32 %v3803_v28, %v903_v30 }
 0x44e   :  { %912 = vrot.lane.b32.xlu1 %v907_v31, %s4086_s3 }
 0x4be   :  { %v911_v34 = vpop.permute.xlu0 %910 }
 0x4bf   :  { %v916_v36 = vadd.f32 %v911_v34, %v896_v33 }
 0x4c0   :  { %v913_v37 = vpop.permute.xlu1 %912 }
 0x4c1   :  { %3804 = vtanh.f32 %v916_v36  ;;  %v917_v38 = vadd.f32 %v913_v37, %v897_v32 }
 0x4c3   :  { %3806 = vtanh.f32 %v917_v38 }
 0x4cb   :  { %v3805_v42 = vpop.eup %3804 }
 0x4cc   :  { %922 = vrot.lane.b32.xlu0 %v3805_v42, %s4086_s3  ;;  %v1060_v42 = vld [vmem:[#allocation3 + $0x3] sm:$0x1] }
 0x4cd   :  { %v3807_v44 = vpop.eup %3806 }
 0x4ce   :  { %924 = vrot.lane.b32.xlu1 %v3807_v44, %s4086_s3 }
 0x53e   :  { %v923_v35 = vpop.permute.xlu0 %922 }
 0x53f   :  { %v4339_v45 = vmul.f32 %v3801_v2, %v923_v35 }
 0x540   :  { %v925_v49 = vpop.permute.xlu1 %924 }
 0x541   :  { %v4341_v50 = vmul.f32 %v3803_v28, %v925_v49  ;;  %v942_v46 = vpack.c.bf16 %v4339_v45, %v4339_v45 }
 0x543   :  { %v943_v43 = vpack.c.bf16 %v4341_v50, %v4341_v50  ;;  %v946_v52 = vunpack.c.l.b16 %v942_v46 }
 0x545   :  { %v947_v51 = vunpack.c.l.b16 %v943_v43  ;;  %v1061_v43 = vld [vmem:[#allocation3 + $0xb] sm:$0x1] }
 0x547   :  { %v948_v53 = vrot.slane %v947_v51, 7 }
 0x549   :  { %v949_v54 = vsel %vm52_vm2, %v948_v53, %v946_v52 }
 0x54a   :  { %v950_v55 = vpack.c.b16 %v949_v54, %v949_v54 }
 0x54c   :  { %951 = vrot.lane.b32.xlu1 %v950_v55, %s4087_s0 }
 0x5be   :  { %v952_v56 = vpop.permute.xlu1 %951 }
 0x5bf   :  { %3589 = vmatmul.mubr.msk.bf16.vlgmr.msra.gmra.mrb[20].mxu0 %vm711_vm4, %v952_v56 }
 0x5c0   :  { %3601 = vmatpush3.bf16.msra.mxu0 %v4198_v39  ;;  %3604 = vmatprep.mubr.msk.bf16.mxu0 %vm4083_vm1, %v4082_v1 }
 0x5c1   :  { %3602 = vmatprep.subr.bf16.mxu0 %v4082_v1 }
 0x5c4   :  { %3603 = vmatpush3.bf16.msra.mxu0 %v4205_v40 }
 0x5c5   :  { %3616 = vmatprep.subr.bf16.mxu0 %v4082_v1 }
 0x692   :  { %v990_v58 = vpop.f32.mrb[20].mxu0 }
 0x693   :  { %v997_v59 = vrot.slane %v990_v58, 1  ;;  %v1000_v60 = vadd.f32 %v990_v58, %v940_v57  ;;  %v3590_v61 = vpop.f32.mrb[21].mxu0 }
 0x694   :  { %v993_v63 = vpop.f32.mrb[22].mxu0 }
 0x695   :  { %v1001_v0 = vadd.f32 %v997_v59, %v941_v62  ;;  %3808 = vtanh.f32 %v1000_v60  ;;  %v3591_v3 = vpop.f32.mrb[23].mxu0  ;;  %v3363_v6 = vmul.f32 -1.442695, %v1000_v60 }
 0x697   :  { %3810 = vtanh.f32 %v1001_v0  ;;  %v3364_v7 = vmul.f32 -1.442695, %v1001_v0 }
 0x698   :  { %3812 = vpow2.f32 %v3363_v6 }
 0x699   :  { %3814 = vpow2.f32 %v3364_v7 }
 0x69f   :  { %v3809_v4 = vpop.eup %3808 }
 0x6a0   :  { %1020 = vrot.lane.b32.xlu1 %v3809_v4, %s4086_s3 }
 0x6a1   :  { %v3811_v5 = vpop.eup %3810 }
 0x6a2   :  { %1022 = vrot.lane.b32.xlu0 %v3811_v5, %s4086_s3  ;;  %v3813_v8 = vpop.eup %3812 }
 0x6a3   :  { %v3815_v9 = vpop.eup %3814  ;;  %v1008_v10 = vadd.f32 1.0, %v3813_v8 }
 0x6a4   :  { %v1009_v11 = vadd.f32 1.0, %v3815_v9 }
 0x6a5   :  { %3816 = vrcp.f32 %v1008_v10 }
 0x6a6   :  { %3818 = vrcp.f32 %v1009_v11 }
 0x6af   :  { %v3817_v12 = vpop.eup %3816 }
 0x6b0   :  { %v3819_v15 = vpop.eup %3818  ;;  %v1016_v17 = vmul.f32 %v3817_v12, %v916_v36 }
 0x6b1   :  { %v1017_v20 = vmul.f32 %v3819_v15, %v917_v38 }
 0x712   :  { %v1021_v13 = vpop.permute.xlu1 %1020 }
 0x713   :  { %v1026_v14 = vmul.f32 %v3817_v12, %v1021_v13 }
 0x714   :  { %v1023_v47 = vpop.permute.xlu0 %1022 }
 0x715   :  { %1030 = vrot.lane.b32.xlu1 %v1026_v14, %s4086_s3  ;;  %v1027_v16 = vmul.f32 %v3819_v15, %v1023_v47 }
 0x717   :  { %1032 = vrot.lane.b32.xlu0 %v1027_v16, %s4086_s3 }
 0x787   :  { %v1031_v18 = vpop.permute.xlu1 %1030 }
 0x788   :  { %v1036_v19 = vadd.f32 %v1031_v18, %v1016_v17 }
 0x789   :  { %v1033_v21 = vpop.permute.xlu0 %1032 }
 0x78a   :  { %3820 = vtanh.f32 %v1036_v19  ;;  %v1037_v22 = vadd.f32 %v1033_v21, %v1017_v20 }
 0x78c   :  { %3822 = vtanh.f32 %v1037_v22 }
 0x794   :  { %v3821_v23 = vpop.eup %3820 }
 0x795   :  { %1042 = vrot.lane.b32.xlu1 %v3821_v23, %s4086_s3 }
 0x796   :  { %v3823_v24 = vpop.eup %3822 }
 0x797   :  { %1044 = vrot.lane.b32.xlu0 %v3823_v24, %s4086_s3 }
 0x807   :  { %v1043_v2 = vpop.permute.xlu1 %1042 }
 0x808   :  { %v4362_v26 = vmul.f32 %v3817_v12, %v1043_v2  ;;  %v1180_v2 = vld [vmem:[#allocation3 + $0x4] sm:$0x1] }
 0x809   :  { %v1045_v27 = vpop.permute.xlu0 %1044 }
 0x80a   :  { %v4364_v28 = vmul.f32 %v3819_v15, %v1045_v27  ;;  %v1062_v30 = vpack.c.bf16 %v4362_v26, %v4362_v26 }
 0x80c   :  { %v1063_v31 = vpack.c.bf16 %v4364_v28, %v4364_v28  ;;  %v1066_v34 = vunpack.c.l.b16 %v1062_v30 }
 0x80e   :  { %v1067_v33 = vunpack.c.l.b16 %v1063_v31 }
 0x810   :  { %v1068_v36 = vrot.slane %v1067_v33, 7 }
 0x812   :  { %v1069_v32 = vsel %vm52_vm2, %v1068_v36, %v1066_v34  ;;  %v1181_v34 = vld [vmem:[#allocation3 + $0xc] sm:$0x1] }
 0x813   :  { %v1070_v37 = vpack.c.b16 %v1069_v32, %v1069_v32 }
 0x815   :  { %1071 = vrot.lane.b32.xlu0 %v1070_v37, %s4087_s0 }
 0x887   :  { %v1072_v38 = vpop.permute.xlu0 %1071 }
 0x888   :  { %3597 = vmatmul.mubr.msk.bf16.vlgmr.msra.gmra.mrb[20].mxu1 %vm711_vm4, %v1072_v38 }
 0x889   :  { %3609 = vmatpush3.bf16.msra.mxu1 %v4198_v39  ;;  %3612 = vmatprep.mubr.msk.bf16.mxu1 %vm4083_vm1, %v4082_v1 }
 0x88a   :  { %3610 = vmatprep.subr.bf16.mxu1 %v4082_v1 }
 0x88d   :  { %3611 = vmatpush3.bf16.msra.mxu1 %v4205_v40 }
 0x88e   :  { %3624 = vmatprep.subr.bf16.mxu1 %v4082_v1 }
 0x95b   :  { %v1110_v44 = vpop.f32.mrb[20].mxu1 }
 0x95c   :  { %v1117_v35 = vrot.slane %v1110_v44, 1  ;;  %v1120_v49 = vadd.f32 %v1110_v44, %v1060_v42  ;;  %v3598_v46 = vpop.f32.mrb[21].mxu1 }
 0x95d   :  { %v1113_v51 = vpop.f32.mrb[22].mxu1 }
 0x95e   :  { %v1121_v52 = vadd.f32 %v1117_v35, %v1061_v43  ;;  %3824 = vtanh.f32 %v1120_v49  ;;  %v3599_v53 = vpop.f32.mrb[23].mxu1  ;;  %v3366_v56 = vmul.f32 -1.442695, %v1120_v49 }
 0x960   :  { %3826 = vtanh.f32 %v1121_v52  ;;  %v3367_v57 = vmul.f32 -1.442695, %v1121_v52 }
 0x961   :  { %3828 = vpow2.f32 %v3366_v56 }
 0x962   :  { %3830 = vpow2.f32 %v3367_v57 }
 0x968   :  { %v3825_v54 = vpop.eup %3824 }
 0x969   :  { %1140 = vrot.lane.b32.xlu0 %v3825_v54, %s4086_s3 }
 0x96a   :  { %v3827_v55 = vpop.eup %3826 }
 0x96b   :  { %1142 = vrot.lane.b32.xlu1 %v3827_v55, %s4086_s3  ;;  %v3829_v58 = vpop.eup %3828 }
 0x96c   :  { %v3831_v59 = vpop.eup %3830  ;;  %v1128_v60 = vadd.f32 1.0, %v3829_v58 }
 0x96d   :  { %v1129_v61 = vadd.f32 1.0, %v3831_v59 }
 0x96e   :  { %3832 = vrcp.f32 %v1128_v60 }
 0x96f   :  { %3834 = vrcp.f32 %v1129_v61 }
 0x978   :  { %v3833_v62 = vpop.eup %3832 }
 0x979   :  { %v3835_v3 = vpop.eup %3834  ;;  %v1136_v6 = vmul.f32 %v3833_v62, %v1036_v19 }
 0x97a   :  { %v1137_v9 = vmul.f32 %v3835_v3, %v1037_v22 }
 0x9db   :  { %v1141_v63 = vpop.permute.xlu0 %1140 }
 0x9dc   :  { %v1146_v0 = vmul.f32 %v3833_v62, %v1141_v63 }
 0x9dd   :  { %v1143_v4 = vpop.permute.xlu1 %1142 }
 0x9de   :  { %1150 = vrot.lane.b32.xlu0 %v1146_v0, %s4086_s3  ;;  %v1147_v5 = vmul.f32 %v3835_v3, %v1143_v4 }
 0x9e0   :  { %1152 = vrot.lane.b32.xlu1 %v1147_v5, %s4086_s3 }
 0xa50   :  { %v1151_v7 = vpop.permute.xlu0 %1150 }
 0xa51   :  { %v1156_v8 = vadd.f32 %v1151_v7, %v1136_v6 }
 0xa52   :  { %v1153_v10 = vpop.permute.xlu1 %1152 }
 0xa53   :  { %3836 = vtanh.f32 %v1156_v8  ;;  %v1157_v11 = vadd.f32 %v1153_v10, %v1137_v9 }
 0xa55   :  { %3838 = vtanh.f32 %v1157_v11 }
 0xa5d   :  { %v3837_v12 = vpop.eup %3836 }
 0xa5e   :  { %1162 = vrot.lane.b32.xlu0 %v3837_v12, %s4086_s3 }
 0xa5f   :  { %v3839_v13 = vpop.eup %3838 }
 0xa60   :  { %1164 = vrot.lane.b32.xlu1 %v3839_v13, %s4086_s3 }
 0xad0   :  { %v1163_v14 = vpop.permute.xlu0 %1162 }
 0xad1   :  { %v4385_v15 = vmul.f32 %v3833_v62, %v1163_v14 }
 0xad2   :  { %v1165_v47 = vpop.permute.xlu1 %1164 }
 0xad3   :  { %v4387_v16 = vmul.f32 %v3835_v3, %v1165_v47  ;;  %v1182_v17 = vpack.c.bf16 %v4385_v15, %v4385_v15 }
 0xad5   :  { %v1183_v18 = vpack.c.bf16 %v4387_v16, %v4387_v16  ;;  %v1186_v20 = vunpack.c.l.b16 %v1182_v17  ;;  %v1300_v17 = vld [vmem:[#allocation3 + $0x5] sm:$0x1] }
 0xad7   :  { %v1187_v19 = vunpack.c.l.b16 %v1183_v18 }
 0xad9   :  { %v1188_v21 = vrot.slane %v1187_v19, 7 }
 0xadb   :  { %v1189_v22 = vsel %vm52_vm2, %v1188_v21, %v1186_v20 }
 0xadc   :  { %v1190_v23 = vpack.c.b16 %v1189_v22, %v1189_v22  ;;  %v1301_v22 = vld [vmem:[#allocation3 + $0xd] sm:$0x1] }
 0xade   :  { %1191 = vrot.lane.b32.xlu1 %v1190_v23, %s4087_s0 }
 0xb50   :  { %v1192_v24 = vpop.permute.xlu1 %1191 }
 0xb51   :  { %3605 = vmatmul.mubr.msk.bf16.vlgmr.msra.gmra.mrb[24].mxu0 %vm711_vm4, %v1192_v24 }
 0xb52   :  { %3617 = vmatpush3.bf16.msra.mxu0 %v4198_v39  ;;  %3620 = vmatprep.mubr.msk.bf16.mxu0 %vm4083_vm1, %v4082_v1 }
 0xb53   :  { %3618 = vmatprep.subr.bf16.mxu0 %v4082_v1 }
 0xb56   :  { %3619 = vmatpush3.bf16.msra.mxu0 %v4205_v40 }
 0xb57   :  { %3632 = vmatprep.subr.bf16.mxu0 %v4082_v1 }
 0xc24   :  { %v1230_v27 = vpop.f32.mrb[24].mxu0 }
 0xc25   :  { %v1237_v30 = vrot.slane %v1230_v27, 1  ;;  %v1240_v31 = vadd.f32 %v1230_v27, %v1180_v2  ;;  %v3606_v33 = vpop.f32.mrb[25].mxu0 }
 0xc26   :  { %v1233_v36 = vpop.f32.mrb[26].mxu0 }
 0xc27   :  { %v1241_v32 = vadd.f32 %v1237_v30, %v1181_v34  ;;  %3840 = vtanh.f32 %v1240_v31  ;;  %v3607_v37 = vpop.f32.mrb[27].mxu0  ;;  %v3369_v44 = vmul.f32 -1.442695, %v1240_v31 }
 0xc29   :  { %3842 = vtanh.f32 %v1241_v32  ;;  %v3370_v35 = vmul.f32 -1.442695, %v1241_v32 }
 0xc2a   :  { %3844 = vpow2.f32 %v3369_v44 }
 0xc2b   :  { %3846 = vpow2.f32 %v3370_v35 }
 0xc31   :  { %v3841_v38 = vpop.eup %3840 }
 0xc32   :  { %1260 = vrot.lane.b32.xlu1 %v3841_v38, %s4086_s3 }
 0xc33   :  { %v3843_v42 = vpop.eup %3842 }
 0xc34   :  { %1262 = vrot.lane.b32.xlu0 %v3843_v42, %s4086_s3  ;;  %v3845_v49 = vpop.eup %3844 }
 0xc35   :  { %v3847_v46 = vpop.eup %3846  ;;  %v1248_v43 = vadd.f32 1.0, %v3845_v49 }
 0xc36   :  { %v1249_v51 = vadd.f32 1.0, %v3847_v46 }
 0xc37   :  { %3848 = vrcp.f32 %v1248_v43 }
 0xc38   :  { %3850 = vrcp.f32 %v1249_v51 }
 0xc41   :  { %v3849_v52 = vpop.eup %3848 }
 0xc42   :  { %v3851_v55 = vpop.eup %3850  ;;  %v1256_v58 = vmul.f32 %v3849_v52, %v1156_v8 }
 0xc43   :  { %v1257_v61 = vmul.f32 %v3851_v55, %v1157_v11 }
 0xca4   :  { %v1261_v53 = vpop.permute.xlu1 %1260 }
 0xca5   :  { %v1266_v54 = vmul.f32 %v3849_v52, %v1261_v53 }
 0xca6   :  { %v1263_v56 = vpop.permute.xlu0 %1262 }
 0xca7   :  { %1270 = vrot.lane.b32.xlu1 %v1266_v54, %s4086_s3  ;;  %v1267_v57 = vmul.f32 %v3851_v55, %v1263_v56 }
 0xca9   :  { %1272 = vrot.lane.b32.xlu0 %v1267_v57, %s4086_s3 }
 0xd19   :  { %v1271_v59 = vpop.permute.xlu1 %1270 }
 0xd1a   :  { %v1276_v60 = vadd.f32 %v1271_v59, %v1256_v58 }
 0xd1b   :  { %v1273_v62 = vpop.permute.xlu0 %1272 }
 0xd1c   :  { %3852 = vtanh.f32 %v1276_v60  ;;  %v1277_v63 = vadd.f32 %v1273_v62, %v1257_v61 }
 0xd1e   :  { %3854 = vtanh.f32 %v1277_v63 }
 0xd26   :  { %v3853_v0 = vpop.eup %3852 }
 0xd27   :  { %1282 = vrot.lane.b32.xlu1 %v3853_v0, %s4086_s3 }
 0xd28   :  { %v3855_v3 = vpop.eup %3854 }
 0xd29   :  { %1284 = vrot.lane.b32.xlu0 %v3855_v3, %s4086_s3 }
 0xd99   :  { %v1283_v4 = vpop.permute.xlu1 %1282 }
 0xd9a   :  { %v4408_v5 = vmul.f32 %v3849_v52, %v1283_v4 }
 0xd9b   :  { %v1285_v6 = vpop.permute.xlu0 %1284 }
 0xd9c   :  { %v4410_v7 = vmul.f32 %v3851_v55, %v1285_v6  ;;  %v1302_v8 = vpack.c.bf16 %v4408_v5, %v4408_v5 }
 0xd9e   :  { %v1303_v9 = vpack.c.bf16 %v4410_v7, %v4410_v7  ;;  %v1306_v11 = vunpack.c.l.b16 %v1302_v8  ;;  %v1420_v8 = vld [vmem:[#allocation3 + $0x6] sm:$0x1] }
 0xda0   :  { %v1307_v10 = vunpack.c.l.b16 %v1303_v9 }
 0xda2   :  { %v1308_v12 = vrot.slane %v1307_v10, 7 }
 0xda4   :  { %v1309_v13 = vsel %vm52_vm2, %v1308_v12, %v1306_v11 }
 0xda5   :  { %v1310_v14 = vpack.c.b16 %v1309_v13, %v1309_v13  ;;  %v1421_v13 = vld [vmem:[#allocation3 + $0xe] sm:$0x1] }
 0xda7   :  { %1311 = vrot.lane.b32.xlu0 %v1310_v14, %s4087_s0 }
 0xe19   :  { %v1312_v47 = vpop.permute.xlu0 %1311 }
 0xe1a   :  { %3613 = vmatmul.mubr.msk.bf16.vlgmr.msra.gmra.mrb[24].mxu1 %vm711_vm4, %v1312_v47 }
 0xe1b   :  { %3625 = vmatpush3.bf16.msra.mxu1 %v4198_v39  ;;  %3628 = vmatprep.mubr.msk.bf16.mxu1 %vm4083_vm1, %v4082_v1 }
 0xe1c   :  { %3626 = vmatprep.subr.bf16.mxu1 %v4082_v1 }
 0xe1f   :  { %3627 = vmatpush3.bf16.msra.mxu1 %v4205_v40 }
 0xe20   :  { %3640 = vmatprep.subr.bf16.mxu1 %v4082_v1 }
 0xeed   :  { %v1350_v18 = vpop.f32.mrb[24].mxu1 }
 0xeee   :  { %v1357_v19 = vrot.slane %v1350_v18, 1  ;;  %v1360_v20 = vadd.f32 %v1350_v18, %v1300_v17  ;;  %v3614_v21 = vpop.f32.mrb[25].mxu1 }
 0xeef   :  { %v1353_v23 = vpop.f32.mrb[26].mxu1 }
 0xef0   :  { %v1361_v24 = vadd.f32 %v1357_v19, %v1301_v22  ;;  %3856 = vtanh.f32 %v1360_v20  ;;  %v3615_v2 = vpop.f32.mrb[27].mxu1  ;;  %v3372_v40 = vmul.f32 -1.442695, %v1360_v20 }
 0xef2   :  { %3858 = vtanh.f32 %v1361_v24  ;;  %v3373_v30 = vmul.f32 -1.442695, %v1361_v24 }
 0xef3   :  { %3860 = vpow2.f32 %v3372_v40 }
 0xef4   :  { %3862 = vpow2.f32 %v3373_v30 }
 0xefa   :  { %v3857_v39 = vpop.eup %3856 }
 0xefb   :  { %1380 = vrot.lane.b32.xlu0 %v3857_v39, %s4086_s3 }
 0xefc   :  { %v3859_v27 = vpop.eup %3858 }
 0xefd   :  { %1382 = vrot.lane.b32.xlu1 %v3859_v27, %s4086_s3  ;;  %v3861_v31 = vpop.eup %3860 }
 0xefe   :  { %v3863_v33 = vpop.eup %3862  ;;  %v1368_v34 = vadd.f32 1.0, %v3861_v31 }
 0xeff   :  { %v1369_v36 = vadd.f32 1.0, %v3863_v33 }
 0xf00   :  { %3864 = vrcp.f32 %v1368_v34 }
 0xf01   :  { %3866 = vrcp.f32 %v1369_v36 }
 0xf0a   :  { %v3865_v32 = vpop.eup %3864 }
 0xf0b   :  { %v3867_v42 = vpop.eup %3866  ;;  %v1376_v49 = vmul.f32 %v3865_v32, %v1276_v60 }
 0xf0c   :  { %v1377_v51 = vmul.f32 %v3867_v42, %v1277_v63 }
 0xf6d   :  { %v1381_v37 = vpop.permute.xlu0 %1380 }
 0xf6e   :  { %v1386_v38 = vmul.f32 %v3865_v32, %v1381_v37 }
 0xf6f   :  { %v1383_v44 = vpop.permute.xlu1 %1382 }
 0xf70   :  { %1390 = vrot.lane.b32.xlu0 %v1386_v38, %s4086_s3  ;;  %v1387_v35 = vmul.f32 %v3867_v42, %v1383_v44 }
 0xf72   :  { %1392 = vrot.lane.b32.xlu1 %v1387_v35, %s4086_s3 }
 0xfe2   :  { %v1391_v46 = vpop.permute.xlu0 %1390 }
 0xfe3   :  { %v1396_v43 = vadd.f32 %v1391_v46, %v1376_v49  ;;  %v4458_v49 = vld [vmem:[%s4886_s4] sm:$0xff]   ;;  %v4467_v46 = vld [vmem:[%s4886_s4 + $0x8] sm:$0xff]  }
 0xfe4   :  { %v1393_v52 = vpop.permute.xlu1 %1392 }
 0xfe5   :  { %3868 = vtanh.f32 %v1396_v43  ;;  %v1397_v53 = vadd.f32 %v1393_v52, %v1377_v51 }
 0xfe7   :  { %3870 = vtanh.f32 %v1397_v53 }
 0xfef   :  { %v3869_v54 = vpop.eup %3868 }
 0xff0   :  { %1402 = vrot.lane.b32.xlu0 %v3869_v54, %s4086_s3 }
 0xff1   :  { %v3871_v55 = vpop.eup %3870 }
 0xff2   :  { %1404 = vrot.lane.b32.xlu1 %v3871_v55, %s4086_s3 }
0x1062   :  { %v1403_v56 = vpop.permute.xlu0 %1402 }
0x1063   :  { %v4431_v57 = vmul.f32 %v3865_v32, %v1403_v56 }
0x1064   :  { %v1405_v58 = vpop.permute.xlu1 %1404 }
0x1065   :  { %v4433_v59 = vmul.f32 %v3867_v42, %v1405_v58  ;;  %v1422_v60 = vpack.c.bf16 %v4431_v57, %v4431_v57 }
0x1067   :  { %v1423_v61 = vpack.c.bf16 %v4433_v59, %v4433_v59  ;;  %v1426_v63 = vunpack.c.l.b16 %v1422_v60 }
0x1069   :  { %v1427_v62 = vunpack.c.l.b16 %v1423_v61 }
0x106b   :  { %v1428_v0 = vrot.slane %v1427_v62, 7 }
0x106d   :  { %v1429_v3 = vsel %vm52_vm2, %v1428_v0, %v1426_v63 }
0x106e   :  { %v1430_v4 = vpack.c.b16 %v1429_v3, %v1429_v3 }
0x1070   :  { %1431 = vrot.lane.b32.xlu1 %v1430_v4, %s4087_s0 }
0x10e2   :  { %v1432_v6 = vpop.permute.xlu1 %1431 }
0x10e3   :  { %3621 = vmatmul.mubr.msk.bf16.vlgmr.msra.gmra.mrb[28].mxu0 %vm711_vm4, %v1432_v6 }
0x10e4   :  { %3636 = vmatprep.mubr.msk.bf16.mxu0 %vm4083_vm1, %v4082_v1  ;;  %3633 = vmatpush3.bf16.msra.mxu0 %v4458_v49 }
0x10e5   :  { %3634 = vmatprep.subr.bf16.mxu0 %v4082_v1 }
0x10e8   :  { %3635 = vmatpush3.bf16.msra.mxu0 %v4467_v46 }
0x10e9   :  { %3648 = vmatprep.subr.bf16.mxu0 %v4082_v1 }
0x11b6   :  { %v1470_v9 = vpop.f32.mrb[28].mxu0 }
0x11b7   :  { %v1477_v10 = vrot.slane %v1470_v9, 1  ;;  %v1480_v11 = vadd.f32 %v1470_v9, %v1420_v8  ;;  %v3622_v12 = vpop.f32.mrb[29].mxu0 }
0x11b8   :  { %v1473_v14 = vpop.f32.mrb[30].mxu0 }
0x11b9   :  { %v1481_v47 = vadd.f32 %v1477_v10, %v1421_v13  ;;  %3872 = vtanh.f32 %v1480_v11  ;;  %v3623_v17 = vpop.f32.mrb[31].mxu0  ;;  %v3375_v20 = vmul.f32 -1.442695, %v1480_v11 }
0x11bb   :  { %3874 = vtanh.f32 %v1481_v47  ;;  %v3376_v21 = vmul.f32 -1.442695, %v1481_v47 }
0x11bc   :  { %3876 = vpow2.f32 %v3375_v20 }
0x11bd   :  { %3878 = vpow2.f32 %v3376_v21 }
0x11c3   :  { %v3873_v18 = vpop.eup %3872 }
0x11c4   :  { %1500 = vrot.lane.b32.xlu1 %v3873_v18, %s4086_s3 }
0x11c5   :  { %v3875_v19 = vpop.eup %3874 }
0x11c6   :  { %1502 = vrot.lane.b32.xlu0 %v3875_v19, %s4086_s3  ;;  %v3877_v22 = vpop.eup %3876 }
0x11c7   :  { %v3879_v23 = vpop.eup %3878  ;;  %v1488_v24 = vadd.f32 1.0, %v3877_v22 }
0x11c8   :  { %v1489_v2 = vadd.f32 1.0, %v3879_v23 }
0x11c9   :  { %3880 = vrcp.f32 %v1488_v24 }
0x11ca   :  { %3882 = vrcp.f32 %v1489_v2 }
0x11d3   :  { %v3881_v39 = vpop.eup %3880 }
0x11d4   :  { %v3883_v30 = vpop.eup %3882  ;;  %v1496_v34 = vmul.f32 %v3881_v39, %v1396_v43 }
0x11d5   :  { %v1497_v37 = vmul.f32 %v3883_v30, %v1397_v53 }
0x1236   :  { %v1501_v27 = vpop.permute.xlu1 %1500 }
0x1237   :  { %v1506_v40 = vmul.f32 %v3881_v39, %v1501_v27 }
0x1238   :  { %v1503_v31 = vpop.permute.xlu0 %1502 }
0x1239   :  { %1510 = vrot.lane.b32.xlu1 %v1506_v40, %s4086_s3  ;;  %v1507_v33 = vmul.f32 %v3883_v30, %v1503_v31 }
0x123b   :  { %1512 = vrot.lane.b32.xlu0 %v1507_v33, %s4086_s3 }
0x12ab   :  { %v1511_v36 = vpop.permute.xlu1 %1510 }
0x12ac   :  { %v4448_v32 = vadd.f32 %v1511_v36, %v1496_v34 }
0x12ad   :  { %v1513_v38 = vpop.permute.xlu0 %1512 }
0x12ae   :  { %3884 = vtanh.f32 %v4448_v32  ;;  %v4451_v42 = vadd.f32 %v1513_v38, %v1497_v37 }
0x12b0   :  { %3886 = vtanh.f32 %v4451_v42 }
0x12b8   :  { %v3885_v44 = vpop.eup %3884 }
0x12b9   :  { %1522 = vrot.lane.b32.xlu1 %v3885_v44, %s4086_s3 }
0x12ba   :  { %v3887_v35 = vpop.eup %3886 }
0x12bb   :  { %1524 = vrot.lane.b32.xlu0 %v3887_v35, %s4086_s3 }
0x12bd   :  { %811 = vrot.lane.b32.xlu1 %v4310_v29, %s4087_s0 }
0x12bf   :  { %813 = vrot.lane.b32.xlu0 %v4305_v25, %s4087_s0 }
0x12c1   :  { %1052 = vrot.lane.b32.xlu1 %v4362_v26, %s4087_s0 }
0x12c3   :  { %1054 = vrot.lane.b32.xlu0 %v4364_v28, %s4087_s0 }
0x12c5   :  { %1292 = vrot.lane.b32.xlu1 %v4408_v5, %s4087_s0 }
0x12c7   :  { %1294 = vrot.lane.b32.xlu0 %v4410_v7, %s4087_s0 }
0x132b   :  { %v1523_v29 = vpop.permute.xlu1 %1522 }
0x132c   :  { %v1528_v43 = vmul.f32 %v3881_v39, %v1523_v29 }
0x132d   :  { %v1525_v25 = vpop.permute.xlu0 %1524 }
0x132e   :  { %1532 = vrot.lane.b32.xlu1 %v1528_v43, %s4087_s0  ;;  %v1529_v26 = vmul.f32 %v3883_v30, %v1525_v25  ;;  %v1542_v52 = vpack.c.bf16 %v1528_v43, %v1528_v43 }
0x132f   :  { %v812_v51 = vpop.permute.xlu1 %811 }
0x1330   :  { %818 = vst.msk [vmem:[#allocation2] sm:$0x1] %vm817_vm5, %v812_v51  ;;  %v1543_v53 = vpack.c.bf16 %v1529_v26, %v1529_v26  ;;  %1534 = vrot.lane.b32.xlu0 %v1529_v26, %s4087_s0  ;;  %v1546_v7 = vunpack.c.l.b16 %v1542_v52  ;;  %v4527_v51 = vld [vmem:[%s4887_s5] sm:$0xff]  }
0x1331   :  { %v814_v28 = vpop.permute.xlu0 %813 }
0x1332   :  { %v1547_v54 = vunpack.c.l.b16 %v1543_v53  ;;  %819 = vst.msk [vmem:[#allocation2 + $0x8] sm:$0x1] %vm817_vm5, %v814_v28  ;;  %v4536_v53 = vld [vmem:[%s4887_s5 + $0x8] sm:$0xff]   ;;  %v4553_v28 = vld [vmem:[%s4888_s6] ss:$0 sm:$0xff] }
0x1333   :  { %v1053_v5 = vpop.permute.xlu1 %1052 }
0x1334   :  { %1058 = vst.msk [vmem:[#allocation2 + $0x2] sm:$0x1] %vm817_vm5, %v1053_v5  ;;  %v1548_v55 = vrot.slane %v1547_v54, 7 }
0x1335   :  { %v1055_v56 = vpop.permute.xlu0 %1054 }
0x1336   :  { %1059 = vst.msk [vmem:[#allocation2 + $0xa] sm:$0x1] %vm817_vm5, %v1055_v56  ;;  %v1549_v60 = vsel %vm52_vm2, %v1548_v55, %v1546_v7 }
0x1337   :  { %v1293_v58 = vpop.permute.xlu1 %1292  ;;  %v1550_v61 = vpack.c.b16 %v1549_v60, %v1549_v60  ;;  %v1669_v62 = vld [vmem:[#allocation2] sm:$0x1] }
0x1338   :  { %1298 = vst.msk [vmem:[#allocation2 + $0x4] sm:$0x1] %vm817_vm5, %v1293_v58  ;;  %v1671_v3 = vpack.c.bf16 %v1669_v62, %v1669_v62 }
0x1339   :  { %1551 = vrot.lane.b32.xlu0 %v1550_v61, %s4087_s0  ;;  %v1295_v63 = vpop.permute.xlu0 %1294  ;;  %v1670_v0 = vld [vmem:[#allocation2 + $0x8] sm:$0x1] }
0x133a   :  { %1299 = vst.msk [vmem:[#allocation2 + $0xc] sm:$0x1] %vm817_vm5, %v1295_v63  ;;  %v1672_v4 = vpack.c.bf16 %v1670_v0, %v1670_v0  ;;  %v1681_v10 = vunpack.c.l.b16 %v1671_v3 }
0x133b   :  { %v1849_v8 = vld [vmem:[#allocation2 + $0x2] sm:$0x1] }
0x133c   :  { %v1682_v6 = vunpack.c.l.b16 %v1672_v4  ;;  %v1851_v14 = vpack.c.bf16 %v1849_v8, %v1849_v8 }
0x133d   :  { %v1850_v9 = vld [vmem:[#allocation2 + $0xa] sm:$0x1] }
0x133e   :  { %v1683_v11 = vrot.slane %v1682_v6, 7  ;;  %v1852_v12 = vpack.c.bf16 %v1850_v9, %v1850_v9  ;;  %v1855_v21 = vunpack.c.l.b16 %v1851_v14  ;;  %v1540_v14 = vld [vmem:[#allocation3 + $0x7] sm:$0x1] }
0x133f   :  { %v2011_v22 = vld [vmem:[#allocation2 + $0x4] sm:$0x1] }
0x1340   :  { %v1684_v13 = vsel %vm52_vm2, %v1683_v11, %v1681_v10  ;;  %v1856_v47 = vunpack.c.l.b16 %v1852_v12  ;;  %v2013_v2 = vpack.c.bf16 %v2011_v22, %v2011_v22 }
0x1341   :  { %v1685_v17 = vpack.c.b16 %v1684_v13, %v1684_v13  ;;  %v2012_v18 = vld [vmem:[#allocation2 + $0xc] sm:$0x1] }
0x1342   :  { %v1857_v19 = vrot.slane %v1856_v47, 7  ;;  %v2014_v20 = vpack.c.bf16 %v2012_v18, %v2012_v18  ;;  %v2017_v40 = vunpack.c.l.b16 %v2013_v2 }
0x1343   :  { %3637 = vmatmul.mubr.msk.bf16.vlgmr.msra.gmra.mrb[32].mxu0 %vm711_vm4, %v1685_v17 }
0x1344   :  { %3649 = vmatpush3.bf16.msra.mxu0 %v4458_v49  ;;  %3652 = vmatprep.mubr.msk.bf16.mxu0 %vm4083_vm1, %v4082_v1  ;;  %v1858_v23 = vsel %vm52_vm2, %v1857_v19, %v1855_v21  ;;  %v2018_v24 = vunpack.c.l.b16 %v2014_v20  ;;  %v1541_v20 = vld [vmem:[#allocation3 + $0xf] sm:$0x1] }
0x1345   :  { %3650 = vmatprep.subr.bf16.mxu0 %v4082_v1  ;;  %v1859_v39 = vpack.c.b16 %v1858_v23, %v1858_v23 }
0x1346   :  { %v2019_v27 = vrot.slane %v2018_v24, 7 }
0x1348   :  { %3651 = vmatpush3.bf16.msra.mxu0 %v4467_v46  ;;  %v2020_v30 = vsel %vm52_vm2, %v2019_v27, %v2017_v40 }
0x1349   :  { %3664 = vmatprep.subr.bf16.mxu0 %v4082_v1  ;;  %v2021_v31 = vpack.c.b16 %v2020_v30, %v2020_v30 }
0x134b   :  { %3653 = vmatmul.mubr.msk.bf16.vlgmr.msra.gmra.mrb[36].mxu0 %vm711_vm4, %v1859_v39 }
0x134c   :  { %3665 = vmatpush3.bf16.msra.mxu0 %v4458_v49  ;;  %3668 = vmatprep.mubr.msk.bf16.mxu0 %vm4083_vm1, %v4082_v1 }
0x134d   :  { %3666 = vmatprep.subr.bf16.mxu0 %v4082_v1 }
0x1350   :  { %3667 = vmatpush3.bf16.msra.mxu0 %v4467_v46 }
0x1351   :  { %3680 = vmatprep.subr.bf16.mxu0 %v4082_v1 }
0x1353   :  { %3669 = vmatmul.mubr.msk.bf16.vlgmr.msra.gmra.mrb[40].mxu0 %vm711_vm4, %v2021_v31 }
0x1354   :  { %3681 = vmatpush3.bf16.msra.mxu0 %v4458_v49  ;;  %3684 = vmatprep.mubr.msk.bf16.mxu0 %vm4083_vm1, %v4082_v1 }
0x1355   :  { %3682 = vmatprep.subr.bf16.mxu0 %v4082_v1 }
0x1358   :  { %3683 = vmatpush3.bf16.msra.mxu0 %v4467_v46 }
0x1359   :  { %3696 = vmatprep.subr.bf16.mxu0 %v4082_v1 }
0x13a0   :  { %v1533_v33 = vpop.permute.xlu1 %1532 }
0x13a1   :  { %1538 = vst.msk [vmem:[#allocation2 + $0x6] sm:$0x1] %vm817_vm5, %v1533_v33 }
0x13a2   :  { %v1535_v34 = vpop.permute.xlu0 %1534 }
0x13a3   :  { %1539 = vst.msk [vmem:[#allocation2 + $0xe] sm:$0x1] %vm817_vm5, %v1535_v34 }
0x13a8   :  { %v2173_v36 = vld [vmem:[#allocation2 + $0x6] sm:$0x1] }
0x13a9   :  { %v2175_v44 = vpack.c.bf16 %v2173_v36, %v2173_v36 }
0x13aa   :  { %v2174_v37 = vld [vmem:[#allocation2 + $0xe] sm:$0x1] }
0x13ab   :  { %v1552_v38 = vpop.permute.xlu0 %1551  ;;  %v2176_v35 = vpack.c.bf16 %v2174_v37, %v2174_v37  ;;  %v2179_v43 = vunpack.c.l.b16 %v2175_v44 }
0x13ac   :  { %3629 = vmatmul.mubr.msk.bf16.vlgmr.msra.gmra.mrb[28].mxu1 %vm711_vm4, %v1552_v38 }
0x13ad   :  { %v2180_v29 = vunpack.c.l.b16 %v2176_v35  ;;  %3641 = vmatpush3.bf16.msra.mxu1 %v4458_v49  ;;  %3644 = vmatprep.mubr.msk.bf16.mxu1 %vm4083_vm1, %v4082_v1 }
0x13ae   :  { %3642 = vmatprep.subr.bf16.mxu1 %v4082_v1 }
0x13af   :  { %v2181_v25 = vrot.slane %v2180_v29, 7 }
0x13b1   :  { %v2182_v26 = vsel %vm52_vm2, %v2181_v25, %v2179_v43  ;;  %3643 = vmatpush3.bf16.msra.mxu1 %v4467_v46 }
0x13b2   :  { %v2183_v52 = vpack.c.b16 %v2182_v26, %v2182_v26  ;;  %3656 = vmatprep.subr.bf16.mxu1 %v4082_v1 }
0x13b4   :  { %3685 = vmatmul.mubr.msk.bf16.vlgmr.msra.gmra.mrb[44].mxu0 %vm711_vm4, %v2183_v52 }
0x13b5   :  { %3697 = vmatpush3.bf16.msra.mxu0 %v4527_v51  ;;  %3700 = vmatprep.mubr.msk.bf16.mxu0 %vm4083_vm1, %v4082_v1 }
0x13b6   :  { %3698 = vmatprep.subr.bf16.mxu0 %v4082_v1 }
0x13b9   :  { %3699 = vmatpush3.bf16.msra.mxu0 %v4536_v53 }
0x13ba   :  { %3712 = vmatprep.subr.bf16.mxu0 %v4082_v1 }
0x13bc   :  { %3701 = vmatmul.mubr.bf16.vlgmr.msra.gmra.mrb[48].mxu0 %v4084_v41 }
0x13bd   :  { %3713 = vmatpush3.bf16.msra.mxu0 %v4527_v51  ;;  %3716 = vmatprep.mubr.msk.bf16.mxu0 %vm4083_vm1, %v4082_v1 }
0x13be   :  { %3714 = vmatprep.subr.bf16.mxu0 %v4082_v1 }
0x13c1   :  { %3715 = vmatpush3.bf16.msra.mxu0 %v4536_v53 }
0x13c2   :  { %3728 = vmatprep.subr.bf16.mxu0 %v4082_v1 }
0x1416   :  { %v1735_v54 = vpop.f32.mrb[32].mxu0 }
0x1417   :  { %v1736_v5 = vadd.f32 %v4553_v28, %v1735_v54  ;;  %v3638_v41 = vpop.f32.mrb[33].mxu0 }
0x1418   :  { %v1738_v7 = vpop.f32.mrb[34].mxu0 }
0x1419   :  { %v1748_v55 = vrot.slane %v1736_v5, %v4224_v48  ;;  %v3639_v56 = vpop.f32.mrb[35].mxu0 }
0x141b   :  { %v1749_v58 = vcombine.high %v1748_v55, %v1748_v55  ;;  %3384 = vst.sshfl [vmem:[#allocation3] sm:$0x1 pattern:$0x73625140] %v1748_v55 }
0x141d   :  { %3385 = vst.sshfl [vmem:[#allocation3 + $0x8] sm:$0x1 pattern:$0x73625140] %v1749_v58 }
0x141e   :  { %v1897_v60 = vpop.f32.mrb[36].mxu0 }
0x141f   :  { %v1898_v61 = vadd.f32 %v4553_v28, %v1897_v60  ;;  %v3654_v62 = vpop.f32.mrb[37].mxu0 }
0x1420   :  { %v1900_v63 = vpop.f32.mrb[38].mxu0 }
0x1421   :  { %v1910_v0 = vrot.slane %v1898_v61, %v4224_v48  ;;  %v3655_v3 = vpop.f32.mrb[39].mxu0 }
0x1422   :  { %v2335_v36 = vld [vmem:[#allocation3] sm:$0x1] }
0x1423   :  { %v1911_v4 = vcombine.high %v1910_v0, %v1910_v0  ;;  %3390 = vst.sshfl [vmem:[#allocation3 + $0x2] sm:$0x1 pattern:$0x73625140] %v1910_v0 }
0x1424   :  { %v2336_v29 = vld [vmem:[#allocation3 + $0x8] sm:$0x1] }
0x1425   :  { %3391 = vst.sshfl [vmem:[#allocation3 + $0xa] sm:$0x1 pattern:$0x73625140] %v1911_v4 }
0x1426   :  { %v2059_v6 = vpop.f32.mrb[40].mxu0 }
0x1427   :  { %v2060_v8 = vadd.f32 %v4553_v28, %v2059_v6  ;;  %v3670_v9 = vpop.f32.mrb[41].mxu0 }
0x1428   :  { %v2062_v10 = vpop.f32.mrb[42].mxu0 }
0x1429   :  { %v2072_v11 = vrot.slane %v2060_v8, %v4224_v48  ;;  %v3671_v12 = vpop.f32.mrb[43].mxu0 }
0x142b   :  { %v2073_v13 = vcombine.high %v2072_v11, %v2072_v11  ;;  %3396 = vst.sshfl [vmem:[#allocation3 + $0x4] sm:$0x1 pattern:$0x73625140] %v2072_v11 }
0x142d   :  { %3397 = vst.sshfl [vmem:[#allocation3 + $0xc] sm:$0x1 pattern:$0x73625140] %v2073_v13 }
0x147f   :  { %v1590_v47 = vpop.f32.mrb[28].mxu1 }
0x1480   :  { %v1597_v17 = vrot.slane %v1590_v47, 1  ;;  %v1600_v18 = vadd.f32 %v1590_v47, %v1540_v14  ;;  %v3630_v19 = vpop.f32.mrb[29].mxu1 }
0x1481   :  { %v1593_v21 = vpop.f32.mrb[30].mxu1 }
0x1482   :  { %v1601_v22 = vadd.f32 %v1597_v17, %v1541_v20  ;;  %3888 = vtanh.f32 %v1600_v18  ;;  %v3631_v23 = vpop.f32.mrb[31].mxu1  ;;  %v3378_v5 = vmul.f32 -1.442695, %v1600_v18 }
0x1484   :  { %3890 = vtanh.f32 %v1601_v22  ;;  %v3379_v41 = vmul.f32 -1.442695, %v1601_v22 }
0x1487   :  { %v2221_v24 = vpop.f32.mrb[44].mxu0 }
0x1488   :  { %v2222_v2 = vadd.f32 %v4553_v28, %v2221_v24  ;;  %v3686_v39 = vpop.f32.mrb[45].mxu0 }
0x1489   :  { %v2224_v27 = vpop.f32.mrb[46].mxu0 }
0x148a   :  { %v2234_v40 = vrot.slane %v2222_v2, %v4224_v48  ;;  %v3687_v30 = vpop.f32.mrb[47].mxu0 }
0x148c   :  { %v3889_v31 = vpop.eup %3888  ;;  %v2235_v33 = vcombine.high %v2234_v40, %v2234_v40  ;;  %3402 = vst.sshfl [vmem:[#allocation3 + $0x6] sm:$0x1 pattern:$0x73625140] %v2234_v40 }
0x148d   :  { %1620 = vrot.lane.b32.xlu0 %v3889_v31, %s4086_s3 }
0x148e   :  { %3403 = vst.sshfl [vmem:[#allocation3 + $0xe] sm:$0x1 pattern:$0x73625140] %v2235_v33  ;;  %v3891_v34 = vpop.eup %3890 }
0x148f   :  { %v2383_v37 = vpop.f32.mrb[48].mxu0  ;;  %1622 = vrot.lane.b32.xlu1 %v3891_v34, %s4086_s3 }
0x1490   :  { %v2390_v38 = vrot.slane %v2383_v37, 1  ;;  %v2393_v44 = vadd.f32 %v2383_v37, %v2335_v36  ;;  %v3702_v35 = vpop.f32.mrb[49].mxu0 }
0x1491   :  { %v2386_v43 = vpop.f32.mrb[50].mxu0 }
0x1492   :  { %v2394_v25 = vadd.f32 %v2390_v38, %v2336_v29  ;;  %3892 = vtanh.f32 %v2393_v44  ;;  %v3703_v26 = vpop.f32.mrb[51].mxu0  ;;  %v3409_v55 = vmul.f32 -1.442695, %v2393_v44 }
0x1494   :  { %3894 = vtanh.f32 %v2394_v25  ;;  %v3410_v60 = vmul.f32 -1.442695, %v2394_v25 }
0x1495   :  { %3896 = vpow2.f32 %v3378_v5 }
0x1496   :  { %3898 = vpow2.f32 %v3379_v41 }
0x1497   :  { %3900 = vpow2.f32 %v3409_v55 }
0x149c   :  { %v3893_v52 = vpop.eup %3892 }
0x149d   :  { %2413 = vrot.lane.b32.xlu0 %v3893_v52, %s4086_s3 }
0x149e   :  { %v3895_v54 = vpop.eup %3894 }
0x149f   :  { %2415 = vrot.lane.b32.xlu1 %v3895_v54, %s4086_s3  ;;  %v3897_v7 = vpop.eup %3896 }
0x14a0   :  { %v3899_v56 = vpop.eup %3898  ;;  %v1608_v58 = vadd.f32 1.0, %v3897_v7 }
0x14a1   :  { %v1609_v61 = vadd.f32 1.0, %v3899_v56  ;;  %v3901_v62 = vpop.eup %3900 }
0x14a2   :  { %3902 = vrcp.f32 %v1608_v58  ;;  %v2401_v6 = vadd.f32 1.0, %v3901_v62 }
0x14a3   :  { %3904 = vpow2.f32 %v3410_v60 }
0x14a4   :  { %3906 = vrcp.f32 %v1609_v61 }
0x14a5   :  { %3908 = vrcp.f32 %v2401_v6 }
0x14ac   :  { %v3903_v63 = vpop.eup %3902 }
0x14ad   :  { %v3905_v4 = vpop.eup %3904  ;;  %v1616_v19 = vmul.f32 %v3903_v63, %v4448_v32 }
0x14ae   :  { %v3907_v8 = vpop.eup %3906  ;;  %v2402_v11 = vadd.f32 1.0, %v3905_v4 }
0x14af   :  { %v3909_v12 = vpop.eup %3908  ;;  %v1617_v22 = vmul.f32 %v3907_v8, %v4451_v42 }
0x14b0   :  { %3910 = vrcp.f32 %v2402_v11  ;;  %v2409_v39 = vmul.f32 0.0, %v3909_v12 }
0x14ba   :  { %v3911_v47 = vpop.eup %3910 }
0x14bb   :  { %v2410_v31 = vmul.f32 0.0, %v3911_v47 }
0x14ff   :  { %v1621_v0 = vpop.permute.xlu0 %1620 }
0x1500   :  { %v1626_v3 = vmul.f32 %v3903_v63, %v1621_v0 }
0x1501   :  { %v1623_v9 = vpop.permute.xlu1 %1622 }
0x1502   :  { %1630 = vrot.lane.b32.xlu0 %v1626_v3, %s4086_s3  ;;  %v1627_v10 = vmul.f32 %v3907_v8, %v1623_v9 }
0x1504   :  { %1632 = vrot.lane.b32.xlu1 %v1627_v10, %s4086_s3 }
0x150f   :  { %v2414_v13 = vpop.permute.xlu0 %2413 }
0x1510   :  { %v2419_v14 = vmul.f32 %v3909_v12, %v2414_v13 }
0x1511   :  { %v2416_v17 = vpop.permute.xlu1 %2415 }
0x1512   :  { %2423 = vrot.lane.b32.xlu0 %v2419_v14, %s4086_s3  ;;  %v2420_v18 = vmul.f32 %v3911_v47, %v2416_v17 }
0x1514   :  { %2425 = vrot.lane.b32.xlu1 %v2420_v18, %s4086_s3 }
0x1574   :  { %v1631_v20 = vpop.permute.xlu0 %1630 }
0x1575   :  { %v1636_v21 = vadd.f32 %v1631_v20, %v1616_v19 }
0x1576   :  { %v1633_v23 = vpop.permute.xlu1 %1632 }
0x1577   :  { %3912 = vtanh.f32 %v1636_v21  ;;  %v1637_v24 = vadd.f32 %v1633_v23, %v1617_v22 }
0x1579   :  { %3914 = vtanh.f32 %v1637_v24 }
0x1581   :  { %v3913_v2 = vpop.eup %3912 }
0x1582   :  { %1642 = vrot.lane.b32.xlu0 %v3913_v2, %s4086_s3 }
0x1583   :  { %v3915_v27 = vpop.eup %3914 }
0x1584   :  { %v2424_v40 = vpop.permute.xlu0 %2423  ;;  %1644 = vrot.lane.b32.xlu1 %v3915_v27, %s4086_s3 }
0x1585   :  { %v4574_v30 = vadd.f32 %v2424_v40, %v2409_v39 }
0x1586   :  { %v2426_v32 = vpop.permute.xlu1 %2425 }
0x1587   :  { %3916 = vtanh.f32 %v4574_v30  ;;  %v4578_v33 = vadd.f32 %v2426_v32, %v2410_v31 }
0x1589   :  { %3918 = vtanh.f32 %v4578_v33 }
0x1591   :  { %v3917_v42 = vpop.eup %3916 }
0x1592   :  { %2435 = vrot.lane.b32.xlu0 %v3917_v42, %s4086_s3 }
0x1593   :  { %v3919_v34 = vpop.eup %3918 }
0x1594   :  { %2437 = vrot.lane.b32.xlu1 %v3919_v34, %s4086_s3 }
0x1596   :  { %932 = vrot.lane.b32.xlu0 %v4339_v45, %s4087_s0 }
0x1598   :  { %934 = vrot.lane.b32.xlu1 %v4341_v50, %s4087_s0 }
0x159a   :  { %1172 = vrot.lane.b32.xlu0 %v4385_v15, %s4087_s0 }
0x159c   :  { %1174 = vrot.lane.b32.xlu1 %v4387_v16, %s4087_s0 }
0x159e   :  { %1412 = vrot.lane.b32.xlu0 %v4431_v57, %s4087_s0 }
0x15a0   :  { %1414 = vrot.lane.b32.xlu1 %v4433_v59, %s4087_s0 }
0x15f4   :  { %v1643_v36 = vpop.permute.xlu0 %1642 }
0x15f5   :  { %v1648_v37 = vmul.f32 %v3903_v63, %v1643_v36 }
0x15f6   :  { %v1645_v38 = vpop.permute.xlu1 %1644 }
0x15f7   :  { %1652 = vrot.lane.b32.xlu0 %v1648_v37, %s4087_s0  ;;  %v1649_v45 = vmul.f32 %v3907_v8, %v1645_v38 }
0x15f9   :  { %1654 = vrot.lane.b32.xlu1 %v1649_v45, %s4087_s0 }
0x1604   :  { %v2436_v50 = vpop.permute.xlu0 %2435 }
0x1605   :  { %v4597_v44 = vmul.f32 %v3909_v12, %v2436_v50 }
0x1606   :  { %v2438_v15 = vpop.permute.xlu1 %2437 }
0x1607   :  { %v4599_v35 = vmul.f32 %v3911_v47, %v2438_v15  ;;  %v2455_v57 = vpack.c.bf16 %v4597_v44, %v4597_v44 }
0x1608   :  { %v933_v16 = vpop.permute.xlu0 %932 }
0x1609   :  { %938 = vst.msk [vmem:[#allocation2 + $0x1] sm:$0x1] %vm817_vm5, %v933_v16  ;;  %v2456_v59 = vpack.c.bf16 %v4599_v35, %v4599_v35  ;;  %v2459_v26 = vunpack.c.l.b16 %v2455_v57 }
0x160a   :  { %v935_v29 = vpop.permute.xlu1 %934 }
0x160b   :  { %v2460_v43 = vunpack.c.l.b16 %v2456_v59  ;;  %939 = vst.msk [vmem:[#allocation2 + $0x9] sm:$0x1] %vm817_vm5, %v935_v29 }
0x160c   :  { %v1173_v25 = vpop.permute.xlu0 %1172 }
0x160d   :  { %1178 = vst.msk [vmem:[#allocation2 + $0x3] sm:$0x1] %vm817_vm5, %v1173_v25  ;;  %v2461_v52 = vrot.slane %v2460_v43, 7 }
0x160e   :  { %v1175_v54 = vpop.permute.xlu1 %1174 }
0x160f   :  { %1179 = vst.msk [vmem:[#allocation2 + $0xb] sm:$0x1] %vm817_vm5, %v1175_v54  ;;  %v2462_v41 = vsel %vm52_vm2, %v2461_v52, %v2459_v26 }
0x1610   :  { %v1413_v5 = vpop.permute.xlu0 %1412  ;;  %v2463_v7 = vpack.c.b16 %v2462_v41, %v2462_v41  ;;  %v1768_v55 = vld [vmem:[#allocation2 + $0x1] sm:$0x1] }
0x1611   :  { %1418 = vst.msk [vmem:[#allocation2 + $0x5] sm:$0x1] %vm817_vm5, %v1413_v5  ;;  %v1770_v60 = vpack.c.bf16 %v1768_v55, %v1768_v55 }
0x1612   :  { %2464 = vrot.lane.b32.xlu1 %v2463_v7, %s4087_s0  ;;  %v1415_v56 = vpop.permute.xlu1 %1414  ;;  %v1769_v58 = vld [vmem:[#allocation2 + $0x9] sm:$0x1] }
0x1613   :  { %1419 = vst.msk [vmem:[#allocation2 + $0xd] sm:$0x1] %vm817_vm5, %v1415_v56  ;;  %v1771_v61 = vpack.c.bf16 %v1769_v58, %v1769_v58  ;;  %v1774_v3 = vunpack.c.l.b16 %v1770_v60 }
0x1614   :  { %v1930_v63 = vld [vmem:[#allocation2 + $0x3] sm:$0x1] }
0x1615   :  { %v1775_v62 = vunpack.c.l.b16 %v1771_v61  ;;  %v1932_v9 = vpack.c.bf16 %v1930_v63, %v1930_v63 }
0x1616   :  { %v1931_v0 = vld [vmem:[#allocation2 + $0xb] sm:$0x1] }
0x1617   :  { %v1776_v4 = vrot.slane %v1775_v62, 7  ;;  %v1933_v6 = vpack.c.bf16 %v1931_v0, %v1931_v0  ;;  %v1936_v47 = vunpack.c.l.b16 %v1932_v9 }
0x1618   :  { %v2092_v17 = vld [vmem:[#allocation2 + $0x5] sm:$0x1] }
0x1619   :  { %v1777_v8 = vsel %vm52_vm2, %v1776_v4, %v1774_v3  ;;  %v1937_v10 = vunpack.c.l.b16 %v1933_v6  ;;  %v2094_v20 = vpack.c.bf16 %v2092_v17, %v2092_v17 }
0x161a   :  { %v1778_v11 = vpack.c.b16 %v1777_v8, %v1777_v8  ;;  %v2093_v12 = vld [vmem:[#allocation2 + $0xd] sm:$0x1] }
0x161b   :  { %v1938_v13 = vrot.slane %v1937_v10, 7  ;;  %v2095_v14 = vpack.c.bf16 %v2093_v12, %v2093_v12  ;;  %v2098_v23 = vunpack.c.l.b16 %v2094_v20 }
0x161c   :  { %3645 = vmatmul.mubr.msk.bf16.vlgmr.msra.gmra.mrb[32].mxu1 %vm711_vm4, %v1778_v11 }
0x161d   :  { %3657 = vmatpush3.bf16.msra.mxu1 %v4458_v49  ;;  %3660 = vmatprep.mubr.msk.bf16.mxu1 %vm4083_vm1, %v4082_v1  ;;  %v1939_v18 = vsel %vm52_vm2, %v1938_v13, %v1936_v47  ;;  %v2099_v19 = vunpack.c.l.b16 %v2095_v14 }
0x161e   :  { %3658 = vmatprep.subr.bf16.mxu1 %v4082_v1  ;;  %v1940_v21 = vpack.c.b16 %v1939_v18, %v1939_v18 }
0x161f   :  { %v2100_v22 = vrot.slane %v2099_v19, 7 }
0x1621   :  { %3659 = vmatpush3.bf16.msra.mxu1 %v4467_v46  ;;  %v2101_v24 = vsel %vm52_vm2, %v2100_v22, %v2098_v23 }
0x1622   :  { %3672 = vmatprep.subr.bf16.mxu1 %v4082_v1  ;;  %v2102_v2 = vpack.c.b16 %v2101_v24, %v2101_v24 }
0x1624   :  { %3661 = vmatmul.mubr.msk.bf16.vlgmr.msra.gmra.mrb[36].mxu1 %vm711_vm4, %v1940_v21 }
0x1625   :  { %3673 = vmatpush3.bf16.msra.mxu1 %v4458_v49  ;;  %3676 = vmatprep.mubr.msk.bf16.mxu1 %vm4083_vm1, %v4082_v1 }
0x1626   :  { %3674 = vmatprep.subr.bf16.mxu1 %v4082_v1 }
0x1629   :  { %3675 = vmatpush3.bf16.msra.mxu1 %v4467_v46 }
0x162a   :  { %3688 = vmatprep.subr.bf16.mxu1 %v4082_v1 }
0x162c   :  { %3677 = vmatmul.mubr.msk.bf16.vlgmr.msra.gmra.mrb[40].mxu1 %vm711_vm4, %v2102_v2 }
0x162d   :  { %3689 = vmatpush3.bf16.msra.mxu1 %v4458_v49  ;;  %3692 = vmatprep.mubr.msk.bf16.mxu1 %vm4083_vm1, %v4082_v1 }
0x162e   :  { %3690 = vmatprep.subr.bf16.mxu1 %v4082_v1 }
0x1631   :  { %3691 = vmatpush3.bf16.msra.mxu1 %v4467_v46 }
0x1632   :  { %3704 = vmatprep.subr.bf16.mxu1 %v4082_v1 }
0x1669   :  { %v1653_v39 = vpop.permute.xlu0 %1652 }
0x166a   :  { %1658 = vst.msk [vmem:[#allocation2 + $0x7] sm:$0x1] %vm817_vm5, %v1653_v39 }
0x166b   :  { %v1655_v27 = vpop.permute.xlu1 %1654 }
0x166c   :  { %1659 = vst.msk [vmem:[#allocation2 + $0xf] sm:$0x1] %vm817_vm5, %v1655_v27 }
0x1671   :  { %v2254_v40 = vld [vmem:[#allocation2 + $0x7] sm:$0x1] }
0x1672   :  { %v2256_v32 = vpack.c.bf16 %v2254_v40, %v2254_v40 }
0x1673   :  { %v2255_v31 = vld [vmem:[#allocation2 + $0xf] sm:$0x1] }
0x1674   :  { %v2257_v42 = vpack.c.bf16 %v2255_v31, %v2255_v31  ;;  %v2260_v34 = vunpack.c.l.b16 %v2256_v32 }
0x1676   :  { %v2261_v49 = vunpack.c.l.b16 %v2257_v42 }
0x1678   :  { %v2262_v36 = vrot.slane %v2261_v49, 7 }
0x167a   :  { %v2263_v37 = vsel %vm52_vm2, %v2262_v36, %v2260_v34 }
0x167b   :  { %v2264_v38 = vpack.c.b16 %v2263_v37, %v2263_v37 }
0x167d   :  { %3693 = vmatmul.mubr.msk.bf16.vlgmr.msra.gmra.mrb[44].mxu1 %vm711_vm4, %v2264_v38 }
0x167e   :  { %3705 = vmatpush3.bf16.msra.mxu1 %v4527_v51  ;;  %3708 = vmatprep.mubr.msk.bf16.mxu1 %vm4083_vm1, %v4082_v1 }
0x167f   :  { %3706 = vmatprep.subr.bf16.mxu1 %v4082_v1 }
0x1682   :  { %3707 = vmatpush3.bf16.msra.mxu1 %v4536_v53 }
0x1683   :  { %3720 = vmatprep.subr.bf16.mxu1 %v4082_v1 }
0x1684   :  { %v2465_v46 = vpop.permute.xlu1 %2464 }
0x1685   :  { %3709 = vmatmul.mubr.msk.bf16.vlgmr.msra.gmra.mrb[48].mxu1 %vm711_vm4, %v2465_v46 }
0x1686   :  { %3721 = vmatpush3.bf16.msra.mxu1 %v4527_v51  ;;  %3724 = vmatprep.mubr.msk.bf16.mxu1 %vm4083_vm1, %v4082_v1 }
0x1687   :  { %3722 = vmatprep.subr.bf16.mxu1 %v4082_v1 }
0x168a   :  { %3723 = vmatpush3.bf16.msra.mxu1 %v4536_v53 }
0x168b   :  { %3736 = vmatprep.subr.bf16.mxu1 %v4082_v1 }
0x16ef   :  { %v1816_v45 = vpop.f32.mrb[32].mxu1 }
0x16f0   :  { %v1817_v50 = vadd.f32 %v4553_v28, %v1816_v45  ;;  %v3646_v15 = vpop.f32.mrb[33].mxu1 }
0x16f1   :  { %v1819_v16 = vpop.f32.mrb[34].mxu1 }
0x16f2   :  { %v1829_v57 = vrot.slane %v1817_v50, %v4224_v48  ;;  %v3647_v59 = vpop.f32.mrb[35].mxu1 }
0x16f4   :  { %v1830_v29 = vcombine.high %v1829_v57, %v1829_v57  ;;  %3387 = vst.sshfl [vmem:[#allocation3 + $0x1] sm:$0x1 pattern:$0x73625140] %v1829_v57 }
0x16f6   :  { %3388 = vst.sshfl [vmem:[#allocation3 + $0x9] sm:$0x1 pattern:$0x73625140] %v1830_v29 }
0x16f7   :  { %v1978_v43 = vpop.f32.mrb[36].mxu1 }
0x16f8   :  { %v1979_v25 = vadd.f32 %v4553_v28, %v1978_v43  ;;  %v3662_v26 = vpop.f32.mrb[37].mxu1 }
0x16f9   :  { %v1981_v52 = vpop.f32.mrb[38].mxu1 }
0x16fa   :  { %v1991_v54 = vrot.slane %v1979_v25, %v4224_v48  ;;  %v3663_v5 = vpop.f32.mrb[39].mxu1 }
0x16fb   :  { %v2453_v10 = vld [vmem:[#allocation3 + $0x1] sm:$0x1]  ;;  %v2573_v5 = vld [vmem:[#allocation3 + $0x2] sm:$0x1] }
0x16fc   :  { %v1992_v41 = vcombine.high %v1991_v54, %v1991_v54  ;;  %3393 = vst.sshfl [vmem:[#allocation3 + $0x3] sm:$0x1 pattern:$0x73625140] %v1991_v54 }
0x16fd   :  { %v2454_v47 = vld [vmem:[#allocation3 + $0x9] sm:$0x1] }
0x16fe   :  { %3394 = vst.sshfl [vmem:[#allocation3 + $0xb] sm:$0x1 pattern:$0x73625140] %v1992_v41 }
0x16ff   :  { %v2140_v7 = vpop.f32.mrb[40].mxu1 }
0x1700   :  { %v2141_v55 = vadd.f32 %v4553_v28, %v2140_v7  ;;  %v3678_v56 = vpop.f32.mrb[41].mxu1 }
0x1701   :  { %v2143_v58 = vpop.f32.mrb[42].mxu1 }
0x1702   :  { %v2153_v60 = vrot.slane %v2141_v55, %v4224_v48  ;;  %v3679_v61 = vpop.f32.mrb[43].mxu1  ;;  %v2574_v58 = vld [vmem:[#allocation3 + $0xa] sm:$0x1] }
0x1704   :  { %v2154_v62 = vcombine.high %v2153_v60, %v2153_v60  ;;  %3399 = vst.sshfl [vmem:[#allocation3 + $0x5] sm:$0x1 pattern:$0x73625140] %v2153_v60 }
0x1706   :  { %3400 = vst.sshfl [vmem:[#allocation3 + $0xd] sm:$0x1 pattern:$0x73625140] %v2154_v62 }
0x1750   :  { %v2302_v63 = vpop.f32.mrb[44].mxu1 }
0x1751   :  { %v2303_v0 = vadd.f32 %v4553_v28, %v2302_v63  ;;  %v3694_v3 = vpop.f32.mrb[45].mxu1 }
0x1752   :  { %v2305_v4 = vpop.f32.mrb[46].mxu1 }
0x1753   :  { %v2315_v6 = vrot.slane %v2303_v0, %v4224_v48  ;;  %v3695_v8 = vpop.f32.mrb[47].mxu1 }
0x1755   :  { %v2316_v9 = vcombine.high %v2315_v6, %v2315_v6  ;;  %3405 = vst.sshfl [vmem:[#allocation3 + $0x7] sm:$0x1 pattern:$0x73625140] %v2315_v6 }
0x1757   :  { %3406 = vst.sshfl [vmem:[#allocation3 + $0xf] sm:$0x1 pattern:$0x73625140] %v2316_v9 }
0x1758   :  { %v2503_v11 = vpop.f32.mrb[48].mxu1 }
0x1759   :  { %v2510_v12 = vrot.slane %v2503_v11, 1  ;;  %v2513_v13 = vadd.f32 %v2503_v11, %v2453_v10  ;;  %v3710_v14 = vpop.f32.mrb[49].mxu1 }
0x175a   :  { %v2506_v17 = vpop.f32.mrb[50].mxu1 }
0x175b   :  { %v2514_v18 = vadd.f32 %v2510_v12, %v2454_v47  ;;  %3920 = vtanh.f32 %v2513_v13  ;;  %v3711_v19 = vpop.f32.mrb[51].mxu1  ;;  %v3412_v48 = vmul.f32 -1.442695, %v2513_v13 }
0x175d   :  { %3922 = vtanh.f32 %v2514_v18  ;;  %v3413_v21 = vmul.f32 -1.442695, %v2514_v18 }
0x175e   :  { %3924 = vpow2.f32 %v3412_v48 }
0x175f   :  { %3926 = vpow2.f32 %v3413_v21 }
0x1765   :  { %v3921_v28 = vpop.eup %3920 }
0x1766   :  { %2533 = vrot.lane.b32.xlu1 %v3921_v28, %s4086_s3 }
0x1767   :  { %v3923_v20 = vpop.eup %3922 }
0x1768   :  { %2535 = vrot.lane.b32.xlu0 %v3923_v20, %s4086_s3  ;;  %v3925_v22 = vpop.eup %3924 }
0x1769   :  { %v3927_v23 = vpop.eup %3926  ;;  %v2521_v24 = vadd.f32 1.0, %v3925_v22 }
0x176a   :  { %v2522_v2 = vadd.f32 1.0, %v3927_v23 }
0x176b   :  { %3928 = vrcp.f32 %v2521_v24 }
0x176c   :  { %3930 = vrcp.f32 %v2522_v2 }
0x1775   :  { %v3929_v39 = vpop.eup %3928 }
0x1776   :  { %v3931_v31 = vpop.eup %3930  ;;  %v2529_v49 = vmul.f32 %v3929_v39, %v4574_v30 }
0x1777   :  { %v2530_v37 = vmul.f32 %v3931_v31, %v4578_v33 }
0x17d8   :  { %v2534_v27 = vpop.permute.xlu1 %2533 }
0x17d9   :  { %v2539_v40 = vmul.f32 %v3929_v39, %v2534_v27 }
0x17da   :  { %v2536_v32 = vpop.permute.xlu0 %2535 }
0x17db   :  { %2543 = vrot.lane.b32.xlu1 %v2539_v40, %s4086_s3  ;;  %v2540_v42 = vmul.f32 %v3931_v31, %v2536_v32 }
0x17dd   :  { %2545 = vrot.lane.b32.xlu0 %v2540_v42, %s4086_s3 }
0x184d   :  { %v2544_v34 = vpop.permute.xlu1 %2543 }
0x184e   :  { %v2549_v36 = vadd.f32 %v2544_v34, %v2529_v49 }
0x184f   :  { %v2546_v38 = vpop.permute.xlu0 %2545 }
0x1850   :  { %3932 = vtanh.f32 %v2549_v36  ;;  %v2550_v46 = vadd.f32 %v2546_v38, %v2530_v37  ;;  %v2693_v38 = vld [vmem:[#allocation3 + $0x3] sm:$0x1] }
0x1852   :  { %3934 = vtanh.f32 %v2550_v46 }
0x185a   :  { %v3933_v45 = vpop.eup %3932 }
0x185b   :  { %2555 = vrot.lane.b32.xlu1 %v3933_v45, %s4086_s3 }
0x185c   :  { %v3935_v50 = vpop.eup %3934 }
0x185d   :  { %2557 = vrot.lane.b32.xlu0 %v3935_v50, %s4086_s3 }
0x18cd   :  { %v2556_v15 = vpop.permute.xlu1 %2555 }
0x18ce   :  { %v4670_v16 = vmul.f32 %v3929_v39, %v2556_v15 }
0x18cf   :  { %v2558_v57 = vpop.permute.xlu0 %2557 }
0x18d0   :  { %v4672_v59 = vmul.f32 %v3931_v31, %v2558_v57  ;;  %v2575_v30 = vpack.c.bf16 %v4670_v16, %v4670_v16  ;;  %v2694_v57 = vld [vmem:[#allocation3 + $0xb] sm:$0x1] }
0x18d2   :  { %v2576_v33 = vpack.c.bf16 %v4672_v59, %v4672_v59  ;;  %v2579_v43 = vunpack.c.l.b16 %v2575_v30 }
0x18d4   :  { %v2580_v29 = vunpack.c.l.b16 %v2576_v33 }
0x18d6   :  { %v2581_v25 = vrot.slane %v2580_v29, 7 }
0x18d8   :  { %v2582_v26 = vsel %vm52_vm2, %v2581_v25, %v2579_v43 }
0x18d9   :  { %v2583_v52 = vpack.c.b16 %v2582_v26, %v2582_v26 }
0x18db   :  { %2584 = vrot.lane.b32.xlu0 %v2583_v52, %s4087_s0 }
0x194d   :  { %v2585_v54 = vpop.permute.xlu0 %2584 }
0x194e   :  { %3717 = vmatmul.mubr.msk.bf16.vlgmr.msra.gmra.mrb[52].mxu0 %vm711_vm4, %v2585_v54 }
0x194f   :  { %3729 = vmatpush3.bf16.msra.mxu0 %v4527_v51  ;;  %3732 = vmatprep.mubr.msk.bf16.mxu0 %vm4083_vm1, %v4082_v1 }
0x1950   :  { %3730 = vmatprep.subr.bf16.mxu0 %v4082_v1 }
0x1953   :  { %3731 = vmatpush3.bf16.msra.mxu0 %v4536_v53 }
0x1954   :  { %3744 = vmatprep.subr.bf16.mxu0 %v4082_v1 }
0x1a21   :  { %v2623_v41 = vpop.f32.mrb[52].mxu0 }
0x1a22   :  { %v2630_v7 = vrot.slane %v2623_v41, 1  ;;  %v2633_v55 = vadd.f32 %v2623_v41, %v2573_v5  ;;  %v3718_v56 = vpop.f32.mrb[53].mxu0 }
0x1a23   :  { %v2626_v60 = vpop.f32.mrb[54].mxu0 }
0x1a24   :  { %v2634_v61 = vadd.f32 %v2630_v7, %v2574_v58  ;;  %3936 = vtanh.f32 %v2633_v55  ;;  %v3719_v62 = vpop.f32.mrb[55].mxu0  ;;  %v3415_v3 = vmul.f32 -1.442695, %v2633_v55 }
0x1a26   :  { %3938 = vtanh.f32 %v2634_v61  ;;  %v3416_v4 = vmul.f32 -1.442695, %v2634_v61 }
0x1a27   :  { %3940 = vpow2.f32 %v3415_v3 }
0x1a28   :  { %3942 = vpow2.f32 %v3416_v4 }
0x1a2e   :  { %v3937_v63 = vpop.eup %3936 }
0x1a2f   :  { %2653 = vrot.lane.b32.xlu0 %v3937_v63, %s4086_s3 }
0x1a30   :  { %v3939_v0 = vpop.eup %3938 }
0x1a31   :  { %2655 = vrot.lane.b32.xlu1 %v3939_v0, %s4086_s3  ;;  %v3941_v6 = vpop.eup %3940 }
0x1a32   :  { %v3943_v8 = vpop.eup %3942  ;;  %v2641_v9 = vadd.f32 1.0, %v3941_v6 }
0x1a33   :  { %v2642_v10 = vadd.f32 1.0, %v3943_v8 }
0x1a34   :  { %3944 = vrcp.f32 %v2641_v9 }
0x1a35   :  { %3946 = vrcp.f32 %v2642_v10 }
0x1a3e   :  { %v3945_v11 = vpop.eup %3944 }
0x1a3f   :  { %v3947_v14 = vpop.eup %3946  ;;  %v2649_v18 = vmul.f32 %v3945_v11, %v2549_v36 }
0x1a40   :  { %v2650_v20 = vmul.f32 %v3947_v14, %v2550_v46 }
0x1aa1   :  { %v2654_v12 = vpop.permute.xlu0 %2653 }
0x1aa2   :  { %v2659_v13 = vmul.f32 %v3945_v11, %v2654_v12 }
0x1aa3   :  { %v2656_v47 = vpop.permute.xlu1 %2655 }
0x1aa4   :  { %2663 = vrot.lane.b32.xlu0 %v2659_v13, %s4086_s3  ;;  %v2660_v17 = vmul.f32 %v3947_v14, %v2656_v47 }
0x1aa6   :  { %2665 = vrot.lane.b32.xlu1 %v2660_v17, %s4086_s3 }
0x1b16   :  { %v2664_v19 = vpop.permute.xlu0 %2663 }
0x1b17   :  { %v2669_v28 = vadd.f32 %v2664_v19, %v2649_v18 }
0x1b18   :  { %v2666_v48 = vpop.permute.xlu1 %2665 }
0x1b19   :  { %3948 = vtanh.f32 %v2669_v28  ;;  %v2670_v21 = vadd.f32 %v2666_v48, %v2650_v20 }
0x1b1b   :  { %3950 = vtanh.f32 %v2670_v21 }
0x1b23   :  { %v3949_v22 = vpop.eup %3948 }
0x1b24   :  { %2675 = vrot.lane.b32.xlu0 %v3949_v22, %s4086_s3  ;;  %v2813_v22 = vld [vmem:[#allocation3 + $0x4] sm:$0x1] }
0x1b25   :  { %v3951_v23 = vpop.eup %3950 }
0x1b26   :  { %2677 = vrot.lane.b32.xlu1 %v3951_v23, %s4086_s3 }
0x1b96   :  { %v2676_v24 = vpop.permute.xlu0 %2675 }
0x1b97   :  { %v4693_v2 = vmul.f32 %v3945_v11, %v2676_v24 }
0x1b98   :  { %v2678_v39 = vpop.permute.xlu1 %2677 }
0x1b99   :  { %v4695_v27 = vmul.f32 %v3947_v14, %v2678_v39  ;;  %v2695_v40 = vpack.c.bf16 %v4693_v2, %v4693_v2 }
0x1b9b   :  { %v2696_v31 = vpack.c.bf16 %v4695_v27, %v4695_v27  ;;  %v2699_v42 = vunpack.c.l.b16 %v2695_v40 }
0x1b9d   :  { %v2700_v32 = vunpack.c.l.b16 %v2696_v31  ;;  %v2814_v31 = vld [vmem:[#allocation3 + $0xc] sm:$0x1] }
0x1b9f   :  { %v2701_v49 = vrot.slane %v2700_v32, 7 }
0x1ba1   :  { %v2702_v34 = vsel %vm52_vm2, %v2701_v49, %v2699_v42 }
0x1ba2   :  { %v2703_v36 = vpack.c.b16 %v2702_v34, %v2702_v34 }
0x1ba4   :  { %2704 = vrot.lane.b32.xlu1 %v2703_v36, %s4087_s0 }
0x1c16   :  { %v2705_v37 = vpop.permute.xlu1 %2704 }
0x1c17   :  { %3725 = vmatmul.mubr.msk.bf16.vlgmr.msra.gmra.mrb[52].mxu1 %vm711_vm4, %v2705_v37 }
0x1c18   :  { %3737 = vmatpush3.bf16.msra.mxu1 %v4527_v51  ;;  %3740 = vmatprep.mubr.msk.bf16.mxu1 %vm4083_vm1, %v4082_v1 }
0x1c19   :  { %3738 = vmatprep.subr.bf16.mxu1 %v4082_v1 }
0x1c1c   :  { %3739 = vmatpush3.bf16.msra.mxu1 %v4536_v53 }
0x1c1d   :  { %3752 = vmatprep.subr.bf16.mxu1 %v4082_v1 }
0x1cea   :  { %v2743_v46 = vpop.f32.mrb[52].mxu1 }
0x1ceb   :  { %v2750_v45 = vrot.slane %v2743_v46, 1  ;;  %v2753_v50 = vadd.f32 %v2743_v46, %v2693_v38  ;;  %v3726_v15 = vpop.f32.mrb[53].mxu1 }
0x1cec   :  { %v2746_v30 = vpop.f32.mrb[54].mxu1 }
0x1ced   :  { %v2754_v33 = vadd.f32 %v2750_v45, %v2694_v57  ;;  %3952 = vtanh.f32 %v2753_v50  ;;  %v3727_v29 = vpop.f32.mrb[55].mxu1  ;;  %v3418_v26 = vmul.f32 -1.442695, %v2753_v50 }
0x1cef   :  { %3954 = vtanh.f32 %v2754_v33  ;;  %v3419_v52 = vmul.f32 -1.442695, %v2754_v33 }
0x1cf0   :  { %3956 = vpow2.f32 %v3418_v26 }
0x1cf1   :  { %3958 = vpow2.f32 %v3419_v52 }
0x1cf7   :  { %v3953_v43 = vpop.eup %3952 }
0x1cf8   :  { %2773 = vrot.lane.b32.xlu1 %v3953_v43, %s4086_s3 }
0x1cf9   :  { %v3955_v25 = vpop.eup %3954 }
0x1cfa   :  { %2775 = vrot.lane.b32.xlu0 %v3955_v25, %s4086_s3  ;;  %v3957_v54 = vpop.eup %3956 }
0x1cfb   :  { %v3959_v5 = vpop.eup %3958  ;;  %v2761_v41 = vadd.f32 1.0, %v3957_v54 }
0x1cfc   :  { %v2762_v7 = vadd.f32 1.0, %v3959_v5 }
0x1cfd   :  { %3960 = vrcp.f32 %v2761_v41 }
0x1cfe   :  { %3962 = vrcp.f32 %v2762_v7 }
0x1d07   :  { %v3961_v55 = vpop.eup %3960 }
0x1d08   :  { %v3963_v60 = vpop.eup %3962  ;;  %v2769_v63 = vmul.f32 %v3961_v55, %v2669_v28 }
0x1d09   :  { %v2770_v4 = vmul.f32 %v3963_v60, %v2670_v21 }
0x1d6a   :  { %v2774_v56 = vpop.permute.xlu1 %2773 }
0x1d6b   :  { %v2779_v58 = vmul.f32 %v3961_v55, %v2774_v56 }
0x1d6c   :  { %v2776_v61 = vpop.permute.xlu0 %2775 }
0x1d6d   :  { %2783 = vrot.lane.b32.xlu1 %v2779_v58, %s4086_s3  ;;  %v2780_v62 = vmul.f32 %v3963_v60, %v2776_v61 }
0x1d6f   :  { %2785 = vrot.lane.b32.xlu0 %v2780_v62, %s4086_s3 }
0x1ddf   :  { %v2784_v0 = vpop.permute.xlu1 %2783 }
0x1de0   :  { %v2789_v3 = vadd.f32 %v2784_v0, %v2769_v63 }
0x1de1   :  { %v2786_v6 = vpop.permute.xlu0 %2785 }
0x1de2   :  { %3964 = vtanh.f32 %v2789_v3  ;;  %v2790_v8 = vadd.f32 %v2786_v6, %v2770_v4 }
0x1de4   :  { %3966 = vtanh.f32 %v2790_v8 }
0x1dec   :  { %v3965_v9 = vpop.eup %3964 }
0x1ded   :  { %2795 = vrot.lane.b32.xlu1 %v3965_v9, %s4086_s3  ;;  %v4032_v9 = vld [vmem:[%s4887_s5] sm:$0xff]  }
0x1dee   :  { %v3967_v10 = vpop.eup %3966 }
0x1def   :  { %2797 = vrot.lane.b32.xlu0 %v3967_v10, %s4086_s3  ;;  %v4033_v10 = vld [vmem:[%s4887_s5 + $0x8] sm:$0xff]   ;;  %s4088_s5 = smov [#allocation4]  }
0x1e5f   :  { %v2796_v11 = vpop.permute.xlu1 %2795 }
0x1e60   :  { %v4716_v12 = vmul.f32 %v3961_v55, %v2796_v11  ;;  %v2933_v11 = vld [vmem:[#allocation3 + $0x5] sm:$0x1] }
0x1e61   :  { %v2798_v13 = vpop.permute.xlu0 %2797 }
0x1e62   :  { %v4718_v14 = vmul.f32 %v3963_v60, %v2798_v13  ;;  %v2815_v47 = vpack.c.bf16 %v4716_v12, %v4716_v12 }
0x1e64   :  { %v2816_v17 = vpack.c.bf16 %v4718_v14, %v4718_v14  ;;  %v2819_v19 = vunpack.c.l.b16 %v2815_v47 }
0x1e66   :  { %v2820_v18 = vunpack.c.l.b16 %v2816_v17 }
0x1e68   :  { %v2821_v28 = vrot.slane %v2820_v18, 7 }
0x1e6a   :  { %v2822_v20 = vsel %vm52_vm2, %v2821_v28, %v2819_v19  ;;  %v2934_v19 = vld [vmem:[#allocation3 + $0xd] sm:$0x1] }
0x1e6b   :  { %v2823_v48 = vpack.c.b16 %v2822_v20, %v2822_v20 }
0x1e6d   :  { %2824 = vrot.lane.b32.xlu0 %v2823_v48, %s4087_s0 }
0x1edf   :  { %v2825_v21 = vpop.permute.xlu0 %2824 }
0x1ee0   :  { %3733 = vmatmul.mubr.msk.bf16.vlgmr.msra.gmra.mrb[56].mxu0 %vm711_vm4, %v2825_v21 }
0x1ee1   :  { %3745 = vmatpush3.bf16.msra.mxu0 %v4527_v51  ;;  %3748 = vmatprep.mubr.msk.bf16.mxu0 %vm4083_vm1, %v4082_v1 }
0x1ee2   :  { %3746 = vmatprep.subr.bf16.mxu0 %v4082_v1 }
0x1ee5   :  { %3747 = vmatpush3.bf16.msra.mxu0 %v4536_v53 }
0x1fb3   :  { %v2863_v23 = vpop.f32.mrb[56].mxu0 }
0x1fb4   :  { %v2870_v24 = vrot.slane %v2863_v23, 1  ;;  %v2873_v39 = vadd.f32 %v2863_v23, %v2813_v22  ;;  %v3734_v40 = vpop.f32.mrb[57].mxu0 }
0x1fb5   :  { %v2866_v32 = vpop.f32.mrb[58].mxu0 }
0x1fb6   :  { %v2874_v42 = vadd.f32 %v2870_v24, %v2814_v31  ;;  %3968 = vtanh.f32 %v2873_v39  ;;  %v3735_v49 = vpop.f32.mrb[59].mxu0  ;;  %v3421_v36 = vmul.f32 -1.442695, %v2873_v39 }
0x1fb8   :  { %3970 = vtanh.f32 %v2874_v42  ;;  %v3422_v37 = vmul.f32 -1.442695, %v2874_v42 }
0x1fb9   :  { %3972 = vpow2.f32 %v3421_v36 }
0x1fba   :  { %3974 = vpow2.f32 %v3422_v37 }
0x1fc0   :  { %v3969_v34 = vpop.eup %3968 }
0x1fc1   :  { %2893 = vrot.lane.b32.xlu0 %v3969_v34, %s4086_s3 }
0x1fc2   :  { %v3971_v51 = vpop.eup %3970 }
0x1fc3   :  { %2895 = vrot.lane.b32.xlu1 %v3971_v51, %s4086_s3  ;;  %v3973_v53 = vpop.eup %3972 }
0x1fc4   :  { %v3975_v38 = vpop.eup %3974  ;;  %v2881_v46 = vadd.f32 1.0, %v3973_v53 }
0x1fc5   :  { %v2882_v45 = vadd.f32 1.0, %v3975_v38 }
0x1fc6   :  { %3976 = vrcp.f32 %v2881_v46 }
0x1fc7   :  { %3978 = vrcp.f32 %v2882_v45 }
0x1fd0   :  { %v3977_v50 = vpop.eup %3976 }
0x1fd1   :  { %v3979_v30 = vpop.eup %3978  ;;  %v2889_v43 = vmul.f32 %v3977_v50, %v2789_v3 }
0x1fd2   :  { %v2890_v52 = vmul.f32 %v3979_v30, %v2790_v8 }
0x2033   :  { %v2894_v15 = vpop.permute.xlu0 %2893 }
0x2034   :  { %v2899_v57 = vmul.f32 %v3977_v50, %v2894_v15 }
0x2035   :  { %v2896_v33 = vpop.permute.xlu1 %2895 }
0x2036   :  { %2903 = vrot.lane.b32.xlu0 %v2899_v57, %s4086_s3  ;;  %v2900_v29 = vmul.f32 %v3979_v30, %v2896_v33 }
0x2038   :  { %2905 = vrot.lane.b32.xlu1 %v2900_v29, %s4086_s3 }
0x20a8   :  { %v2904_v25 = vpop.permute.xlu0 %2903 }
0x20a9   :  { %v4736_v26 = vadd.f32 %v2904_v25, %v2889_v43 }
0x20aa   :  { %v2906_v54 = vpop.permute.xlu1 %2905 }
0x20ab   :  { %3980 = vtanh.f32 %v4736_v26  ;;  %v2910_v5 = vadd.f32 %v2906_v54, %v2890_v52 }
0x20ad   :  { %3982 = vtanh.f32 %v2910_v5 }
0x20b5   :  { %v3981_v41 = vpop.eup %3980 }
0x20b6   :  { %2915 = vrot.lane.b32.xlu0 %v3981_v41, %s4086_s3 }
0x20b7   :  { %v3983_v7 = vpop.eup %3982 }
0x20b8   :  { %2917 = vrot.lane.b32.xlu1 %v3983_v7, %s4086_s3 }
0x2128   :  { %v2916_v55 = vpop.permute.xlu0 %2915 }
0x2129   :  { %v4741_v56 = vmul.f32 %v3977_v50, %v2916_v55 }
0x212a   :  { %v2918_v58 = vpop.permute.xlu1 %2917 }
0x212b   :  { %v4743_v60 = vmul.f32 %v3979_v30, %v2918_v58  ;;  %v2935_v61 = vpack.c.bf16 %v4741_v56, %v4741_v56  ;;  %v3053_v58 = vld [vmem:[#allocation3 + $0x6] sm:$0x1] }
0x212d   :  { %v2936_v62 = vpack.c.bf16 %v4743_v60, %v4743_v60  ;;  %v2939_v0 = vunpack.c.l.b16 %v2935_v61 }
0x212f   :  { %v2940_v63 = vunpack.c.l.b16 %v2936_v62 }
0x2131   :  { %v2941_v3 = vrot.slane %v2940_v63, 7 }
0x2133   :  { %v2942_v4 = vsel %vm52_vm2, %v2941_v3, %v2939_v0  ;;  %v3054_v3 = vld [vmem:[#allocation3 + $0xe] sm:$0x1] }
0x2134   :  { %v2943_v6 = vpack.c.b16 %v2942_v4, %v2942_v4 }
0x2136   :  { %2944 = vrot.lane.b32.xlu1 %v2943_v6, %s4087_s0 }
0x21a8   :  { %v2945_v8 = vpop.permute.xlu1 %2944 }
0x21a9   :  { %3741 = vmatmul.mubr.msk.bf16.vlgmr.msra.gmra.mrb[56].mxu1 %vm711_vm4, %v2945_v8 }
0x21aa   :  { %3753 = vmatpush3.bf16.msra.mxu1 %v4032_v9  ;;  %3756 = vmatprep.mubr.msk.bf16.mxu1 %vm4083_vm1, %v4082_v1 }
0x21ab   :  { %3754 = vmatprep.subr.bf16.mxu1 %v4082_v1 }
0x21ae   :  { %3755 = vmatpush3.bf16.msra.mxu1 %v4033_v10 }
0x227c   :  { %v2983_v13 = vpop.f32.mrb[56].mxu1 }
0x227d   :  { %v2990_v47 = vrot.slane %v2983_v13, 1  ;;  %v2993_v17 = vadd.f32 %v2983_v13, %v2933_v11  ;;  %v3742_v18 = vpop.f32.mrb[57].mxu1 }
0x227e   :  { %v2986_v28 = vpop.f32.mrb[58].mxu1 }
0x227f   :  { %v2994_v20 = vadd.f32 %v2990_v47, %v2934_v19  ;;  %3984 = vtanh.f32 %v2993_v17  ;;  %v3743_v48 = vpop.f32.mrb[59].mxu1  ;;  %v3424_v22 = vmul.f32 -1.442695, %v2993_v17 }
0x2281   :  { %3986 = vtanh.f32 %v2994_v20  ;;  %v3425_v23 = vmul.f32 -1.442695, %v2994_v20 }
0x2282   :  { %3988 = vpow2.f32 %v3424_v22 }
0x2283   :  { %3990 = vpow2.f32 %v3425_v23 }
0x2289   :  { %v3985_v21 = vpop.eup %3984 }
0x228a   :  { %3013 = vrot.lane.b32.xlu1 %v3985_v21, %s4086_s3 }
0x228b   :  { %v3987_v1 = vpop.eup %3986 }
0x228c   :  { %3015 = vrot.lane.b32.xlu0 %v3987_v1, %s4086_s3  ;;  %v3989_v24 = vpop.eup %3988 }
0x228d   :  { %v3991_v39 = vpop.eup %3990  ;;  %v3001_v40 = vadd.f32 1.0, %v3989_v24 }
0x228e   :  { %v3002_v31 = vadd.f32 1.0, %v3991_v39 }
0x228f   :  { %3992 = vrcp.f32 %v3001_v40 }
0x2290   :  { %3994 = vrcp.f32 %v3002_v31 }
0x2299   :  { %v3993_v32 = vpop.eup %3992 }
0x229a   :  { %v3995_v34 = vpop.eup %3994  ;;  %v3009_v37 = vmul.f32 %v3993_v32, %v4736_v26 }
0x229b   :  { %v3010_v46 = vmul.f32 %v3995_v34, %v2910_v5 }
0x22fc   :  { %v3014_v42 = vpop.permute.xlu1 %3013 }
0x22fd   :  { %v3019_v49 = vmul.f32 %v3993_v32, %v3014_v42 }
0x22fe   :  { %v3016_v51 = vpop.permute.xlu0 %3015 }
0x22ff   :  { %3023 = vrot.lane.b32.xlu1 %v3019_v49, %s4086_s3  ;;  %v3020_v36 = vmul.f32 %v3995_v34, %v3016_v51 }
0x2301   :  { %3025 = vrot.lane.b32.xlu0 %v3020_v36, %s4086_s3 }
0x2371   :  { %v3024_v53 = vpop.permute.xlu1 %3023 }
0x2372   :  { %v3029_v38 = vadd.f32 %v3024_v53, %v3009_v37 }
0x2373   :  { %v3026_v45 = vpop.permute.xlu0 %3025 }
0x2374   :  { %3996 = vtanh.f32 %v3029_v38  ;;  %v3030_v50 = vadd.f32 %v3026_v45, %v3010_v46 }
0x2376   :  { %3998 = vtanh.f32 %v3030_v50 }
0x237e   :  { %v3997_v15 = vpop.eup %3996 }
0x237f   :  { %3035 = vrot.lane.b32.xlu1 %v3997_v15, %s4086_s3 }
0x2380   :  { %v3999_v57 = vpop.eup %3998 }
0x2381   :  { %3037 = vrot.lane.b32.xlu0 %v3999_v57, %s4086_s3 }
0x23f1   :  { %v3036_v30 = vpop.permute.xlu1 %3035 }
0x23f2   :  { %v4768_v33 = vmul.f32 %v3993_v32, %v3036_v30 }
0x23f3   :  { %v3038_v29 = vpop.permute.xlu0 %3037 }
0x23f4   :  { %v4770_v43 = vmul.f32 %v3995_v34, %v3038_v29  ;;  %v3055_v25 = vpack.c.bf16 %v4768_v33, %v4768_v33  ;;  %v3173_v29 = vld [vmem:[#allocation3 + $0x7] sm:$0x1] }
0x23f6   :  { %v3056_v26 = vpack.c.bf16 %v4770_v43, %v4770_v43  ;;  %v3059_v54 = vunpack.c.l.b16 %v3055_v25 }
0x23f8   :  { %v3060_v52 = vunpack.c.l.b16 %v3056_v26 }
0x23fa   :  { %v3061_v5 = vrot.slane %v3060_v52, 7 }
0x23fc   :  { %v3062_v41 = vsel %vm52_vm2, %v3061_v5, %v3059_v54  ;;  %v3174_v5 = vld [vmem:[#allocation3 + $0xf] sm:$0x1] }
0x23fd   :  { %v3063_v7 = vpack.c.b16 %v3062_v41, %v3062_v41 }
0x23ff   :  { %3064 = vrot.lane.b32.xlu0 %v3063_v7, %s4087_s0 }
0x2471   :  { %v3065_v55 = vpop.permute.xlu0 %3064 }
0x2472   :  { %3749 = vmatmul.mubr.msk.bf16.vlgmr.msra.gmra.mrb[60].mxu0 %vm711_vm4, %v3065_v55 }
0x2545   :  { %v3103_v61 = vpop.f32.mrb[60].mxu0 }
0x2546   :  { %v3110_v62 = vrot.slane %v3103_v61, 1  ;;  %v3113_v63 = vadd.f32 %v3103_v61, %v3053_v58  ;;  %v3750_v0 = vpop.f32.mrb[61].mxu0 }
0x2547   :  { %v3106_v4 = vpop.f32.mrb[62].mxu0 }
0x2548   :  { %v3114_v6 = vadd.f32 %v3110_v62, %v3054_v3  ;;  %4000 = vtanh.f32 %v3113_v63  ;;  %v3751_v8 = vpop.f32.mrb[63].mxu0  ;;  %v3427_v11 = vmul.f32 -1.442695, %v3113_v63 }
0x254a   :  { %4002 = vtanh.f32 %v3114_v6  ;;  %v3428_v13 = vmul.f32 -1.442695, %v3114_v6 }
0x254b   :  { %4004 = vpow2.f32 %v3427_v11 }
0x254c   :  { %4006 = vpow2.f32 %v3428_v13 }
0x2552   :  { %v4001_v9 = vpop.eup %4000 }
0x2553   :  { %3133 = vrot.lane.b32.xlu0 %v4001_v9, %s4086_s3 }
0x2554   :  { %v4003_v10 = vpop.eup %4002 }
0x2555   :  { %3135 = vrot.lane.b32.xlu1 %v4003_v10, %s4086_s3  ;;  %v4005_v47 = vpop.eup %4004 }
0x2556   :  { %v4007_v17 = vpop.eup %4006  ;;  %v3121_v18 = vadd.f32 1.0, %v4005_v47 }
0x2557   :  { %v3122_v19 = vadd.f32 1.0, %v4007_v17 }
0x2558   :  { %4008 = vrcp.f32 %v3121_v18 }
0x2559   :  { %4010 = vrcp.f32 %v3122_v19 }
0x2562   :  { %v4009_v28 = vpop.eup %4008 }
0x2563   :  { %v4011_v21 = vpop.eup %4010  ;;  %v3129_v23 = vmul.f32 %v4009_v28, %v3029_v38 }
0x2564   :  { %v3130_v40 = vmul.f32 %v4011_v21, %v3030_v50 }
0x25c5   :  { %v3134_v20 = vpop.permute.xlu0 %3133 }
0x25c6   :  { %v3139_v48 = vmul.f32 %v4009_v28, %v3134_v20 }
0x25c7   :  { %v3136_v1 = vpop.permute.xlu1 %3135 }
0x25c8   :  { %3143 = vrot.lane.b32.xlu0 %v3139_v48, %s4086_s3  ;;  %v3140_v22 = vmul.f32 %v4011_v21, %v3136_v1 }
0x25ca   :  { %3145 = vrot.lane.b32.xlu1 %v3140_v22, %s4086_s3 }
0x263a   :  { %v3144_v24 = vpop.permute.xlu0 %3143 }
0x263b   :  { %v3149_v39 = vadd.f32 %v3144_v24, %v3129_v23 }
0x263c   :  { %v3146_v31 = vpop.permute.xlu1 %3145 }
0x263d   :  { %4012 = vtanh.f32 %v3149_v39  ;;  %v3150_v32 = vadd.f32 %v3146_v31, %v3130_v40 }
0x263f   :  { %4014 = vtanh.f32 %v3150_v32 }
0x2647   :  { %v4013_v42 = vpop.eup %4012 }
0x2648   :  { %3155 = vrot.lane.b32.xlu0 %v4013_v42, %s4086_s3 }
0x2649   :  { %v4015_v49 = vpop.eup %4014 }
0x264a   :  { %3157 = vrot.lane.b32.xlu1 %v4015_v49, %s4086_s3 }
0x26ba   :  { %v3156_v34 = vpop.permute.xlu0 %3155 }
0x26bb   :  { %v4785_v51 = vmul.f32 %v4009_v28, %v3156_v34 }
0x26bc   :  { %v3158_v36 = vpop.permute.xlu1 %3157 }
0x26bd   :  { %v4787_v37 = vmul.f32 %v4011_v21, %v3158_v36  ;;  %v3175_v53 = vpack.c.bf16 %v4785_v51, %v4785_v51 }
0x26bf   :  { %v3176_v38 = vpack.c.bf16 %v4787_v37, %v4787_v37  ;;  %v3179_v45 = vunpack.c.l.b16 %v3175_v53 }
0x26c1   :  { %v3180_v46 = vunpack.c.l.b16 %v3176_v38 }
0x26c3   :  { %v3181_v50 = vrot.slane %v3180_v46, 7 }
0x26c5   :  { %v3182_v15 = vsel %vm52_vm2, %v3181_v50, %v3179_v45 }
0x26c6   :  { %v3183_v57 = vpack.c.b16 %v3182_v15, %v3182_v15 }
0x26c8   :  { %3184 = vrot.lane.b32.xlu1 %v3183_v57, %s4087_s0 }
0x273a   :  { %v3185_v30 = vpop.permute.xlu1 %3184 }
0x273b   :  { %3757 = vmatmul.mubr.msk.bf16.vlgmr.msra.gmra.mrb[60].mxu1 %vm711_vm4, %v3185_v30 }
0x280e   :  { %v3223_v25 = vpop.f32.mrb[60].mxu1 }
0x280f   :  { %v3230_v26 = vrot.slane %v3223_v25, 1  ;;  %v3233_v52 = vadd.f32 %v3223_v25, %v3173_v29  ;;  %v3758_v54 = vpop.f32.mrb[61].mxu1 }
0x2810   :  { %v3226_v41 = vpop.f32.mrb[62].mxu1 }
0x2811   :  { %v3234_v7 = vadd.f32 %v3230_v26, %v3174_v5  ;;  %4016 = vtanh.f32 %v3233_v52  ;;  %v3759_v55 = vpop.f32.mrb[63].mxu1  ;;  %v3430_v62 = vmul.f32 -1.442695, %v3233_v52 }
0x2813   :  { %4018 = vtanh.f32 %v3234_v7  ;;  %v3431_v63 = vmul.f32 -1.442695, %v3234_v7 }
0x2814   :  { %4020 = vpow2.f32 %v3430_v62 }
0x2815   :  { %4022 = vpow2.f32 %v3431_v63 }
0x281b   :  { %v4017_v58 = vpop.eup %4016 }
0x281c   :  { %3253 = vrot.lane.b32.xlu1 %v4017_v58, %s4086_s3 }
0x281d   :  { %v4019_v61 = vpop.eup %4018 }
0x281e   :  { %3255 = vrot.lane.b32.xlu0 %v4019_v61, %s4086_s3  ;;  %v4021_v0 = vpop.eup %4020 }
0x281f   :  { %v4023_v3 = vpop.eup %4022  ;;  %v3241_v4 = vadd.f32 1.0, %v4021_v0 }
0x2820   :  { %v3242_v6 = vadd.f32 1.0, %v4023_v3 }
0x2821   :  { %4024 = vrcp.f32 %v3241_v4 }
0x2822   :  { %4026 = vrcp.f32 %v3242_v6 }
0x282b   :  { %v4025_v8 = vpop.eup %4024 }
0x282c   :  { %v4027_v11 = vpop.eup %4026  ;;  %v3249_v17 = vmul.f32 %v4025_v8, %v3149_v39 }
0x282d   :  { %v3250_v28 = vmul.f32 %v4027_v11, %v3150_v32 }
0x288e   :  { %v3254_v9 = vpop.permute.xlu1 %3253 }
0x288f   :  { %v3259_v10 = vmul.f32 %v4025_v8, %v3254_v9 }
0x2890   :  { %v3256_v13 = vpop.permute.xlu0 %3255 }
0x2891   :  { %3263 = vrot.lane.b32.xlu1 %v3259_v10, %s4086_s3  ;;  %v3260_v47 = vmul.f32 %v4027_v11, %v3256_v13 }
0x2893   :  { %3265 = vrot.lane.b32.xlu0 %v3260_v47, %s4086_s3 }
0x2903   :  { %v3264_v18 = vpop.permute.xlu1 %3263 }
0x2904   :  { %v3269_v19 = vadd.f32 %v3264_v18, %v3249_v17 }
0x2905   :  { %v3266_v20 = vpop.permute.xlu0 %3265 }
0x2906   :  { %4028 = vtanh.f32 %v3269_v19  ;;  %v3270_v48 = vadd.f32 %v3266_v20, %v3250_v28 }
0x2908   :  { %4030 = vtanh.f32 %v3270_v48 }
0x2910   :  { %v4029_v21 = vpop.eup %4028 }
0x2911   :  { %3275 = vrot.lane.b32.xlu1 %v4029_v21, %s4086_s3 }
0x2912   :  { %v4031_v1 = vpop.eup %4030 }
0x2913   :  { %3277 = vrot.lane.b32.xlu0 %v4031_v1, %s4086_s3  ;;  %s3305_s3 = sshll.u32 %s4088_s5, 4  ;;  %s3306_s3 = int_to_ptr.vmem [resolvable:$true] %s3305_s3 }
0x2914   :  { %s4034_s1 = scalar_lea.vmem %s3306_s3, 256  ;;  %p4039_p1 = scmp.lt.s32.totalorder %s3306_s3, %s3306_s3 }
0x2915   :  { %2447 = vrot.lane.b32.xlu1 %v4599_v35, %s4087_s0  ;;  %p4035_p0 = scmp.ne.s32.totalorder %s3306_s3, %s4034_s1  ;;  %p4040_p2 = scmp.lt.s32.totalorder %s4034_s1, %s4034_s1 }
0x2917   :  { %2445 = vrot.lane.b32.xlu0 %v4597_v44, %s4087_s0  ;;  %p4041_p3 = por %p4040_p2, %p4039_p1 }
0x2919   :  { %2567 = vrot.lane.b32.xlu1 %v4672_v59, %s4087_s0  ;;  %p4042_p4 = pnand %p4041_p3, %p4035_p0 }
0x291b   :  { %2565 = vrot.lane.b32.xlu0 %v4670_v16, %s4087_s0 }
0x291d   :  { %2687 = vrot.lane.b32.xlu1 %v4695_v27, %s4087_s0 }
0x291f   :  { %2685 = vrot.lane.b32.xlu0 %v4693_v2, %s4087_s0 }
0x2921   :  { %2807 = vrot.lane.b32.xlu1 %v4718_v14, %s4087_s0 }
0x2923   :  { %2805 = vrot.lane.b32.xlu0 %v4716_v12, %s4087_s0 }
0x2925   :  { %2927 = vrot.lane.b32.xlu1 %v4743_v60, %s4087_s0 }
0x2927   :  { %2925 = vrot.lane.b32.xlu0 %v4741_v56, %s4087_s0 }
0x2929   :  { %3047 = vrot.lane.b32.xlu1 %v4770_v43, %s4087_s0 }
0x292b   :  { %3045 = vrot.lane.b32.xlu0 %v4768_v33, %s4087_s0 }
0x292d   :  { %3167 = vrot.lane.b32.xlu1 %v4787_v37, %s4087_s0 }
0x292f   :  { %3165 = vrot.lane.b32.xlu0 %v4785_v51, %s4087_s0 }
0x2983   :  { %v3276_v44 = vpop.permute.xlu1 %3275 }
0x2984   :  { %v3281_v35 = vmul.f32 %v4025_v8, %v3276_v44 }
0x2985   :  { %v3278_v16 = vpop.permute.xlu0 %3277 }
0x2986   :  { %3285 = vrot.lane.b32.xlu0 %v3281_v35, %s4087_s0  ;;  %v3282_v59 = vmul.f32 %v4027_v11, %v3278_v16 }
0x2987   :  { %v2448_v2 = vpop.permute.xlu1 %2447 }
0x2988   :  { %2452 = vst.msk [vmem:[#allocation4 + $0x8] sm:$0x1] %vm817_vm5, %v2448_v2  ;;  %v3293_v27 = vrot.slane %v3282_v59, 7  ;;  %3287 = vrot.lane.b32.xlu1 %v3282_v59, %s4087_s0 }
0x2989   :  { %v2446_v12 = vpop.permute.xlu0 %2445 }
0x298a   :  { %2451 = vst.msk [vmem:[#allocation4] sm:$0x1] %vm817_vm5, %v2446_v12  ;;  %v3294_v56 = vsel %vm52_vm2, %v3293_v27, %v3281_v35 }
0x298b   :  { %v2568_v14 = vpop.permute.xlu1 %2567  ;;  %3295 = vrot.lane.b32.xlu0 %v3294_v56, %s4087_s0 }
0x298c   :  { %2572 = vst.msk [vmem:[#allocation4 + $0x9] sm:$0x1] %vm817_vm5, %v2568_v14 }
0x298d   :  { %v2566_v60 = vpop.permute.xlu0 %2565 }
0x298e   :  { %2571 = vst.msk [vmem:[#allocation4 + $0x1] sm:$0x1] %vm817_vm5, %v2566_v60 }
0x298f   :  { %v2688_v33 = vpop.permute.xlu1 %2687 }
0x2990   :  { %2692 = vst.msk [vmem:[#allocation4 + $0xa] sm:$0x1] %vm817_vm5, %v2688_v33 }
0x2991   :  { %v2686_v43 = vpop.permute.xlu0 %2685 }
0x2992   :  { %2691 = vst.msk [vmem:[#allocation4 + $0x2] sm:$0x1] %vm817_vm5, %v2686_v43 }
0x2993   :  { %v2808_v22 = vpop.permute.xlu1 %2807 }
0x2994   :  { %2812 = vst.msk [vmem:[#allocation4 + $0xb] sm:$0x1] %vm817_vm5, %v2808_v22 }
0x2995   :  { %v2806_v23 = vpop.permute.xlu0 %2805 }
0x2996   :  { %2811 = vst.msk [vmem:[#allocation4 + $0x3] sm:$0x1] %vm817_vm5, %v2806_v23 }
0x2997   :  { %v2928_v24 = vpop.permute.xlu1 %2927 }
0x2998   :  { %2932 = vst.msk [vmem:[#allocation4 + $0xc] sm:$0x1] %vm817_vm5, %v2928_v24 }
0x2999   :  { %v2926_v39 = vpop.permute.xlu0 %2925 }
0x299a   :  { %2931 = vst.msk [vmem:[#allocation4 + $0x4] sm:$0x1] %vm817_vm5, %v2926_v39 }
0x299b   :  { %v3048_v40 = vpop.permute.xlu1 %3047 }
0x299c   :  { %3052 = vst.msk [vmem:[#allocation4 + $0xd] sm:$0x1] %vm817_vm5, %v3048_v40 }
0x299d   :  { %v3046_v31 = vpop.permute.xlu0 %3045 }
0x299e   :  { %3051 = vst.msk [vmem:[#allocation4 + $0x5] sm:$0x1] %vm817_vm5, %v3046_v31 }
0x299f   :  { %v3168_v32 = vpop.permute.xlu1 %3167 }
0x29a0   :  { %3172 = vst.msk [vmem:[#allocation4 + $0xe] sm:$0x1] %vm817_vm5, %v3168_v32 }
0x29a1   :  { %v3166_v42 = vpop.permute.xlu0 %3165 }
0x29a2   :  { %3171 = vst.msk [vmem:[#allocation4 + $0x6] sm:$0x1] %vm817_vm5, %v3166_v42 }
0x29f8   :  { %v3286_v49 = vpop.permute.xlu0 %3285 }
0x29f9   :  { %3291 = vst.msk [vmem:[#allocation4 + $0x7] sm:$0x1] %vm817_vm5, %v3286_v49 }
0x29fa   :  { %v3288_v34 = vpop.permute.xlu1 %3287 }
0x29fb   :  { %3292 = vst.msk [vmem:[#allocation4 + $0xf] sm:$0x1] %vm817_vm5, %v3288_v34 }
0x29fc   :  { %4045 = shalt.err (!%p4042_p4)
}
0x29fd   :  { %s4046_s13 = scalar_lea.hbm %s4889_s7, 256 }
0x29fe   :  { %p4047_p5 = scmp.ne.s32.totalorder %s4889_s7, %s4046_s13  ;;  %p4050_p6 = scmp.lt.u32.totalorder %s4046_s13, %s4889_s7 }
0x2a00   :  { %p4052_p7 = pnand %p4050_p6, %p4047_p5 }
0x2a02   :  { %4055 = shalt.err (!%p4052_p7)
}
0x2a03   :  { %s4090_s18 = smov 128   ;;  %s4091_s19 = smov 8   ;;  %v3296_v51 = vpop.permute.xlu0 %3295 }
0x2a04   :  { %3311 = dma.vmem_to_hbm [thread:$0]  %s3306_s3, 256, %s4889_s7, [#allocation5], %s4090_s18, %s4090_s18, %s4091_s19   ;;  %3299 = vst.msk [vmem:[#allocation6] sm:$0x3] %vm3298_vm6, %v3296_v51 }
0x2a05   :  { %s4056_s21 = scalar_lea.vmem %s4850_s10, 32  ;;  %p4061_p9 = scmp.lt.s32.totalorder %s4850_s10, %s4850_s10 }
0x2a06   :  { %p4057_p8 = scmp.ne.s32.totalorder %s4850_s10, %s4056_s21  ;;  %p4062_p10 = scmp.lt.s32.totalorder %s4056_s21, %s4056_s21 }
0x2a08   :  { %p4063_p11 = por %p4062_p10, %p4061_p9 }
0x2a0a   :  { %p4064_p12 = pnand %p4063_p11, %p4057_p8 }
0x2a0c   :  { %4067 = shalt.err (!%p4064_p12)
}
0x2a0d   :  { %s4068_s4 = scalar_lea.hbm %s4890_s8, 32 }
0x2a0e   :  { %p4069_p13 = scmp.ne.s32.totalorder %s4890_s8, %s4068_s4  ;;  %p4072_p0 = scmp.lt.u32.totalorder %s4068_s4, %s4890_s8 }
0x2a10   :  { %p4074_p1 = pnand %p4072_p0, %p4069_p13 }
0x2a12   :  { %4077 = shalt.err (!%p4074_p1)
}
0x2a13   :  { %3321 = dma.vmem_to_hbm [thread:$0]  %s4850_s10, 32, %s4890_s8, [#allocation7]  }
0x2a14   :  { %4078 = dma.done.wait [#allocation5], 256  }
0x2a15   :  { %4079 = vsyncadd [#allocation5], 4294967040 }
0x2a16   :  { %4080 = dma.done.wait [#allocation7], 32  }
0x2a17   :  { %4081 = vsyncadd [#allocation7], 4294967264 }
0x2a18   :  { %3328 = vsyncpa [#allocation5], 1 }
0x2a19   :  { %3329 = vsyncpa [#allocation7], 1 }

</bundles_post_ra>
